<compile_context>
chip_gen: v7x
topology: tpu7x:2x2x1
jax: 0.10.0
libtpu: 0.0.40
codegen_flags: <defaults>
</compile_context>

<pallas_src>
import functools

import jax
import jax.numpy as jnp
from jax.experimental import pallas as pl
from jax.experimental.pallas import tpu as pltpu

_LN_EPS = 1e-5
_INV_SQRT2 = 0.7071067811865476


def _layernorm(x, gamma, beta):
    mu = jnp.mean(x, axis=-1, keepdims=True)
    xc = x - mu
    var = jnp.mean(xc * xc, axis=-1, keepdims=True)
    return xc * jax.lax.rsqrt(var + _LN_EPS) * gamma + beta


def _gelu_exact(x):
    # matches torch nn.GELU() default (erf-based, not tanh approximation)
    return 0.5 * x * (1.0 + jax.scipy.special.erf(x * _INV_SQRT2))


def _moe_block_kernel(
    # inputs
    x_ref,
    ln1_g_ref, ln1_b_ref, ln2_g_ref, ln2_b_ref,
    wqkv_ref, bqkv_ref, wo_ref, bo_ref,
    wg_ref, bg_ref,
    w1_ref, b1_ref, w2_ref, b2_ref,
    wfc_ref, bfc_ref,
    # output
    out_ref,
    # scratch (persist across the expert grid axis)
    x1_ref, h2_ref, gw_ref, acc_ref, ctx_ref,
    *, num_heads, top_k, approx_recip,
):
    e = pl.program_id(1)                       # expert grid axis (innermost)
    n_experts = pl.num_programs(1)
    TB, S, D = x_ref.shape
    N = TB * S
    hd = D // num_heads
    scale = float(hd) ** -0.5
    cdt = wqkv_ref.dtype                       # MXU input dtype (f32 or bf16)

    # ------- per-batch-tile prologue: LN1 + attention + residual + LN2 + gating
    @pl.when(e == 0)
    def _prologue():
        xf = x_ref[...].reshape(N, D)
        h = _layernorm(xf, ln1_g_ref[...], ln1_b_ref[...]).astype(cdt)

        # Single lane-dense fused qkv projection (full 3D output lanes).
        qkv = (jnp.dot(h, wqkv_ref[...], preferred_element_type=jnp.float32)
               + bqkv_ref[...])                                    # (N, 3D)

        for hi in range(num_heads):            # static unroll (small H)
            lo = hi * hd
            qh = qkv[:, lo:lo + hd].reshape(TB, S, hd).astype(cdt)
            kh = qkv[:, D + lo:D + lo + hd].reshape(TB, S, hd).astype(cdt)
            vh = qkv[:, 2 * D + lo:2 * D + lo + hd].reshape(TB, S, hd).astype(cdt)
            logits = jnp.einsum('bqd,bkd->bqk', qh, kh,
                                preferred_element_type=jnp.float32) * scale
            logits = logits - jnp.max(logits, axis=-1, keepdims=True)
            p = jnp.exp(logits)
            p = p * pl.reciprocal(jnp.sum(p, axis=-1, keepdims=True),
                                  approx=approx_recip)
            ctxh = jnp.einsum('bqk,bkd->bqd', p.astype(cdt), vh,
                              preferred_element_type=jnp.float32)
            # Stash this head's context at its lane offset; one full-K output
            # projection below replaces H accumulated K=hd matmuls.
            ctx_ref[:, lo:lo + hd] = ctxh.reshape(N, hd).astype(ctx_ref.dtype)

        attn = (jnp.dot(ctx_ref[...], wo_ref[...],
                        preferred_element_type=jnp.float32) + bo_ref[...])
        x1 = xf + attn                         # residual (f32)
        x1_ref[...] = x1

        h2 = _layernorm(x1, ln2_g_ref[...], ln2_b_ref[...])
        h2_ref[...] = h2.astype(h2_ref.dtype)

        gates = (jnp.dot(h2.astype(cdt), wg_ref[...],
                         preferred_element_type=jnp.float32) + bg_ref[...])
        # top-k (k in {1,2}) gate weights: softmax over the selected logits.
        # TODO(synk): exact ties at the k-th logit select >k experts, unlike
        #             torch.topk's index-ordered tie-break (measure-zero for
        #             continuous inputs).
        top1 = jnp.max(gates, axis=-1, keepdims=True)
        if top_k == 1:
            kth = top1
        else:
            masked = jnp.where(gates >= top1, jnp.float32(-1e30), gates)
            kth = jnp.max(masked, axis=-1, keepdims=True)
        sel = gates >= kth
        w = jnp.where(sel, jnp.exp(gates - top1), jnp.float32(0.0))
        w = w * pl.reciprocal(jnp.sum(w, axis=-1, keepdims=True),
                              approx=approx_recip)
        gw_ref[...] = w                        # (N, E) routing weights
        acc_ref[...] = jnp.zeros_like(acc_ref)

    # ------- expert `e`: weights streamed by BlockSpec; skipped when unrouted
    gw = gw_ref[...]                                               # (N, E)
    lane = jax.lax.broadcasted_iota(jnp.int32, gw.shape, 1)
    w_col = jnp.sum(jnp.where(lane == e, gw, jnp.float32(0.0)),
                    axis=-1, keepdims=True)                        # (N, 1)

    @pl.when(jnp.max(w_col) > 0.0)             # skip experts with no routed tokens
    def _expert():
        h2 = h2_ref[...]
        mid = (jnp.dot(h2, w1_ref[0], preferred_element_type=jnp.float32)
               + b1_ref[0])
        mid = _gelu_exact(mid).astype(cdt)
        oe = (jnp.dot(mid, w2_ref[0], preferred_element_type=jnp.float32)
              + b2_ref[0])
        acc_ref[...] += w_col * oe

    # ------- epilogue: MoE residual + mean-pool + lane-padded classifier -------
    @pl.when(e == n_experts - 1)
    def _epilogue():
        x2 = x1_ref[...] + acc_ref[...]
        pooled = jnp.mean(x2.reshape(TB, S, D), axis=1).astype(cdt)   # (TB, D)
        out = (jnp.dot(pooled, wfc_ref[...], preferred_element_type=jnp.float32)
               + bfc_ref[...])
        out_ref[...] = out.astype(out_ref.dtype)                      # (TB, P)


def _vmem_limit_bytes():
    """VMEM budget with headroom: ~52 MiB on v7x, capped at 112 MiB on v5e/v6e."""
    mib = 1024 * 1024
    try:
        cap = pltpu.get_tpu_info().vmem_capacity_bytes
    except Exception:
        cap = 64 * mib                          # conservative (v7x-sized) fallback
    return int(max(32 * mib, min(cap - 12 * mib, 112 * mib)))


def moe_forward(x, params, *, num_heads, top_k, batch_tile=None,
                compute_dtype=jnp.float32, approx_recip=None):
    """Full MOE forward (num_layers=1) as a (batch-tile, expert)-gridded Pallas kernel.

    Pick `batch_tile` as a multiple of 8 dividing B such that N = batch_tile*S is
    a few hundred rows and there are >= ~4 tiles per TensorCore; set
    compute_dtype=jnp.bfloat16 for the bf16 MXU path (recommended on v5e).
    """
    assert top_k in (1, 2), "kernel supports k=1 or k=2 routing"
    B, S, D = x.shape
    assert D % num_heads == 0
    E = params['w1'].shape[0]
    out_dim = params['wfc'].shape[-1]
    lane_pad = -out_dim % 128
    P = out_dim + lane_pad                      # lane-dense classifier width

    if batch_tile is None:
        batch_tile = B
    assert B % batch_tile == 0
    assert batch_tile == B or batch_tile % 8 == 0, \
        "batch_tile should be a multiple of 8 (unmasked sublane stores)"
    nt = B // batch_tile
    N = batch_tile * S

    if approx_recip is None:
        # keep exact reciprocal (routing-weight fidelity) on the f32 path
        approx_recip = jnp.dtype(compute_dtype) != jnp.dtype(jnp.float32)

    wcast = lambda a: a.astype(compute_dtype)   # weights in MXU input dtype
    wfc = jnp.pad(params['wfc'], ((0, 0), (0, lane_pad)))
    bfc = jnp.pad(params['bfc'], ((0, 0), (0, lane_pad)))

    args = (
        x,
        params['ln1_g'], params['ln1_b'], params['ln2_g'], params['ln2_b'],
        wcast(params['wqkv']), params['bqkv'],
        wcast(params['wo']), params['bo'],
        wcast(params['wg']), params['bg'],
        wcast(params['w1']), params['b1'],
        wcast(params['w2']), params['b2'],
        wcast(wfc), bfc,
    )

    def _resident(a):                           # grid-invariant, stays in VMEM
        nd = a.ndim
        return pl.BlockSpec(a.shape, lambda b, e, _nd=nd: (0,) * _nd)

    def _expert_stream(a):                      # (E, r, c): one expert per e step
        return pl.BlockSpec((1,) + a.shape[1:], lambda b, e: (e, 0, 0))

    in_specs = [pl.BlockSpec((batch_tile, S, D), lambda b, e: (b, 0, 0))]
    in_specs += [_resident(a) for a in args[1:11]]        # LN, qkv, wo, gate
    in_specs += [_expert_stream(a) for a in args[11:15]]  # w1, b1, w2, b2
    in_specs += [_resident(a) for a in args[15:]]         # classifier
    out_spec = pl.BlockSpec((batch_tile, P), lambda b, e: (b, 0))

    kernel = functools.partial(_moe_block_kernel, num_heads=num_heads,
                               top_k=top_k, approx_recip=approx_recip)
    out = pl.pallas_call(
        kernel,
        out_shape=jax.ShapeDtypeStruct((B, P), jnp.float32),
        grid_spec=pltpu.PrefetchScalarGridSpec(
            num_scalar_prefetch=0,
            grid=(nt, E),                       # expert (reduction) axis innermost
            in_specs=in_specs,
            out_specs=out_spec,
            scratch_shapes=[
                pltpu.VMEM((N, D), jnp.float32),    # x1: post-attention residual
                pltpu.VMEM((N, D), compute_dtype),  # h2: LN2 output (expert input)
                pltpu.VMEM((N, E), jnp.float32),    # per-token routing weights
                pltpu.VMEM((N, D), jnp.float32),    # MoE accumulator
                pltpu.VMEM((N, D), compute_dtype),  # per-head attention context
            ]),
        compiler_params=pltpu.CompilerParams(
            dimension_semantics=("parallel", "arbitrary"),
            vmem_limit_bytes=_vmem_limit_bytes()),
    )(*args)
    return out[:, :out_dim]


# ---------------------------- parameter construction ----------------------------
def _linear_init(key, fan_in, fan_out):
    kw, kb = jax.random.split(key)
    bound = 1.0 / (fan_in ** 0.5)
    w = jax.random.uniform(kw, (fan_in, fan_out), jnp.float32, -bound, bound)
    b = jax.random.uniform(kb, (1, fan_out), jnp.float32, -bound, bound)
    return w, b


def init_params(key, d_model, hidden_dim, num_experts, output_dim):
    keys = jax.random.split(key, 4 + 2 * num_experts)
    wqkv, bqkv = _linear_init(keys[0], d_model, 3 * d_model)
    wo, bo = _linear_init(keys[1], d_model, d_model)
    wg, bg = _linear_init(keys[2], d_model, num_experts)
    wfc, bfc = _linear_init(keys[3], d_model, output_dim)
    w1s, b1s, w2s, b2s = [], [], [], []
    for e in range(num_experts):
        w1, b1 = _linear_init(keys[4 + 2 * e], d_model, hidden_dim)
        w2, b2 = _linear_init(keys[5 + 2 * e], hidden_dim, d_model)
        w1s.append(w1); b1s.append(b1); w2s.append(w2); b2s.append(b2)
    return dict(
        ln1_g=jnp.ones((1, d_model), jnp.float32),
        ln1_b=jnp.zeros((1, d_model), jnp.float32),
        ln2_g=jnp.ones((1, d_model), jnp.float32),
        ln2_b=jnp.zeros((1, d_model), jnp.float32),
        wqkv=wqkv, bqkv=bqkv, wo=wo, bo=bo, wg=wg, bg=bg,
        w1=jnp.stack(w1s), b1=jnp.stack(b1s),
        w2=jnp.stack(w2s), b2=jnp.stack(b2s),
        wfc=wfc, bfc=bfc,
    )


# ---------------------------- pure-JAX reference --------------------------------
def reference_forward(x, p, *, num_heads, top_k):
    B, S, D = x.shape
    hd = D // num_heads

    def ln(v, g, b):
        mu = v.mean(-1, keepdims=True)
        var = ((v - mu) ** 2).mean(-1, keepdims=True)
        return (v - mu) / jnp.sqrt(var + _LN_EPS) * g + b

    h = ln(x, p['ln1_g'][0], p['ln1_b'][0])
    qkv = h @ p['wqkv'] + p['bqkv'][0]
    q, k, v = jnp.split(qkv, 3, axis=-1)
    q = q.reshape(B, S, num_heads, hd).transpose(0, 2, 1, 3)
    k = k.reshape(B, S, num_heads, hd).transpose(0, 2, 1, 3)
    v = v.reshape(B, S, num_heads, hd).transpose(0, 2, 1, 3)
    attn = jax.nn.softmax((q @ jnp.swapaxes(k, -1, -2)) * (hd ** -0.5), axis=-1)
    ao = (attn @ v).transpose(0, 2, 1, 3).reshape(B, S, D)
    ao = ao @ p['wo'] + p['bo'][0]
    x1 = x + ao

    h2 = ln(x1, p['ln2_g'][0], p['ln2_b'][0])
    gates = h2 @ p['wg'] + p['bg'][0]
    topv, topi = jax.lax.top_k(gates, top_k)
    scores = jax.nn.softmax(topv, axis=-1)
    n_exp = p['w1'].shape[0]
    eo = jnp.stack(
        [_gelu_exact(h2 @ p['w1'][e] + p['b1'][e, 0]) @ p['w2'][e] + p['b2'][e, 0]
         for e in range(n_exp)], axis=0)                      # (E, B, S, D)
    moe = jnp.zeros_like(h2)
    for i in range(top_k):
        onehot = jax.nn.one_hot(topi[..., i], n_exp, dtype=h2.dtype)  # (B, S, E)
        chosen = jnp.einsum('ebsd,bse->bsd', eo, onehot)
        moe = moe + scores[..., i:i + 1] * chosen
    x2 = x1 + moe

    pooled = x2.mean(axis=1)
    return pooled @ p['wfc'] + p['bfc'][0]


if __name__ == "__main__":
    import numpy as np

    B, S, D = 16, 8, 32                # batch, seq, input_dim (d_model)
    num_heads, hidden_dim = 4, 32
    num_experts, top_k, output_dim = 4, 2, 8

    key = jax.random.PRNGKey(0)
    kx, kp = jax.random.split(key)
    x = jax.random.normal(kx, (B, S, D), jnp.float32)
    params = init_params(kp, D, hidden_dim, num_experts, output_dim)

    ref = reference_forward(x, params, num_heads=num_heads, top_k=top_k)

    # f32 path: grid = (2 batch tiles of 8, 4 experts), tight check.
    out = moe_forward(x, params, num_heads=num_heads, top_k=top_k, batch_tile=8)
    out = jax.block_until_ready(out)
    np.testing.assert_allclose(np.asarray(out), np.asarray(ref),
                               rtol=5e-5, atol=5e-5)

    # bf16 MXU path (f32 accumulation, approx EUP reciprocal): loose check.
    out_bf16 = moe_forward(x, params, num_heads=num_heads, top_k=top_k,
                           batch_tile=8, compute_dtype=jnp.bfloat16)
    out_bf16 = jax.block_until_ready(out_bf16)
    np.testing.assert_allclose(np.asarray(out_bf16), np.asarray(ref),
                               rtol=2.5e-1, atol=2.5e-1)

    print("KERNEL_OK")
</pallas_src>

<mosaic_0001>
module attributes {stable_mosaic.version = 11 : i64} {
  func.func @_moe_block_kernel(%arg0: i32, %arg1: i32, %arg2: memref<8x8x32xf32, #tpu.memory_space<vmem>>, %arg3: memref<1x32xf32, #tpu.memory_space<vmem>>, %arg4: memref<1x32xf32, #tpu.memory_space<vmem>>, %arg5: memref<1x32xf32, #tpu.memory_space<vmem>>, %arg6: memref<1x32xf32, #tpu.memory_space<vmem>>, %arg7: memref<32x96xf32, #tpu.memory_space<vmem>>, %arg8: memref<1x96xf32, #tpu.memory_space<vmem>>, %arg9: memref<32x32xf32, #tpu.memory_space<vmem>>, %arg10: memref<1x32xf32, #tpu.memory_space<vmem>>, %arg11: memref<32x4xf32, #tpu.memory_space<vmem>>, %arg12: memref<1x4xf32, #tpu.memory_space<vmem>>, %arg13: memref<1x32x32xf32, #tpu.memory_space<vmem>>, %arg14: memref<1x1x32xf32, #tpu.memory_space<vmem>>, %arg15: memref<1x32x32xf32, #tpu.memory_space<vmem>>, %arg16: memref<1x1x32xf32, #tpu.memory_space<vmem>>, %arg17: memref<32x128xf32, #tpu.memory_space<vmem>>, %arg18: memref<1x128xf32, #tpu.memory_space<vmem>>, %arg19: memref<8x128xf32, #tpu.memory_space<vmem>>, %arg20: memref<64x32xf32, #tpu.memory_space<vmem>>, %arg21: memref<64x32xf32, #tpu.memory_space<vmem>>, %arg22: memref<64x4xf32, #tpu.memory_space<vmem>>, %arg23: memref<64x32xf32, #tpu.memory_space<vmem>>, %arg24: memref<64x32xf32, #tpu.memory_space<vmem>>) attributes {dimension_semantics = [#tpu.dimension_semantics<parallel>, #tpu.dimension_semantics<arbitrary>], iteration_bounds = array<i64: 2, 4>, scalar_prefetch = 0 : i64, scratch_operands = 5 : i64, tpu.core_type = #tpu.core_type<tc>, window_params = [{transform_indices = @transform_0, window_bounds = array<i64: 8, 8, 32>}, {pipeline_mode = #tpu.pipeline_mode<synchronous>, transform_indices = @transform_1, window_bounds = array<i64: 1, 32>}, {pipeline_mode = #tpu.pipeline_mode<synchronous>, transform_indices = @transform_2, window_bounds = array<i64: 1, 32>}, {pipeline_mode = #tpu.pipeline_mode<synchronous>, transform_indices = @transform_3, window_bounds = array<i64: 1, 32>}, {pipeline_mode = #tpu.pipeline_mode<synchronous>, transform_indices = @transform_4, window_bounds = array<i64: 1, 32>}, {pipeline_mode = #tpu.pipeline_mode<synchronous>, transform_indices = @transform_5, window_bounds = array<i64: 32, 96>}, {pipeline_mode = #tpu.pipeline_mode<synchronous>, transform_indices = @transform_6, window_bounds = array<i64: 1, 96>}, {pipeline_mode = #tpu.pipeline_mode<synchronous>, transform_indices = @transform_7, window_bounds = array<i64: 32, 32>}, {pipeline_mode = #tpu.pipeline_mode<synchronous>, transform_indices = @transform_8, window_bounds = array<i64: 1, 32>}, {pipeline_mode = #tpu.pipeline_mode<synchronous>, transform_indices = @transform_9, window_bounds = array<i64: 32, 4>}, {pipeline_mode = #tpu.pipeline_mode<synchronous>, transform_indices = @transform_10, window_bounds = array<i64: 1, 4>}, {transform_indices = @transform_11, window_bounds = array<i64: 1, 32, 32>}, {transform_indices = @transform_12, window_bounds = array<i64: 1, 1, 32>}, {transform_indices = @transform_13, window_bounds = array<i64: 1, 32, 32>}, {transform_indices = @transform_14, window_bounds = array<i64: 1, 1, 32>}, {pipeline_mode = #tpu.pipeline_mode<synchronous>, transform_indices = @transform_15, window_bounds = array<i64: 32, 128>}, {pipeline_mode = #tpu.pipeline_mode<synchronous>, transform_indices = @transform_16, window_bounds = array<i64: 1, 128>}, {transform_indices = @transform_17, window_bounds = array<i64: 8, 128>}]} {
    %c0_i32 = arith.constant 0 : i32
    %0 = arith.cmpi eq, %arg1, %c0_i32 : i32
    %1 = arith.extui %0 : i1 to i32
    %c0_i32_0 = arith.constant 0 : i32
    %2 = arith.cmpi ne, %1, %c0_i32_0 : i32
    scf.if %2 {
      %c0_7 = arith.constant 0 : index
      %c0_8 = arith.constant 0 : index
      %c0_9 = arith.constant 0 : index
      %21 = vector.load %arg2[%c0_7, %c0_8, %c0_9] : memref<8x8x32xf32, #tpu.memory_space<vmem>>, vector<8x8x32xf32>
      %22 = vector.shape_cast %21 : vector<8x8x32xf32> to vector<64x32xf32>
      %c0_10 = arith.constant 0 : index
      %c0_11 = arith.constant 0 : index
      %23 = vector.load %arg3[%c0_10, %c0_11] : memref<1x32xf32, #tpu.memory_space<vmem>>, vector<1x32xf32>
      %c0_12 = arith.constant 0 : index
      %c0_13 = arith.constant 0 : index
      %24 = vector.load %arg4[%c0_12, %c0_13] : memref<1x32xf32, #tpu.memory_space<vmem>>, vector<1x32xf32>
      %cst_14 = arith.constant dense<0.000000e+00> : vector<64xf32>
      %25 = vector.multi_reduction <add>, %22, %cst_14 [1] : vector<64x32xf32> to vector<64xf32>
      %26 = vector.shape_cast %25 : vector<64xf32> to vector<64x1xf32>
      %cst_15 = arith.constant 3.200000e+01 : f32
      %27 = vector.broadcast %cst_15 : f32 to vector<64x1xf32>
      %28 = arith.divf %26, %27 : vector<64x1xf32>
      %29 = vector.broadcast %28 : vector<64x1xf32> to vector<64x32xf32>
      %30 = arith.subf %22, %29 : vector<64x32xf32>
      %31 = arith.mulf %30, %30 : vector<64x32xf32>
      %cst_16 = arith.constant dense<0.000000e+00> : vector<64xf32>
      %32 = vector.multi_reduction <add>, %31, %cst_16 [1] : vector<64x32xf32> to vector<64xf32>
      %33 = vector.shape_cast %32 : vector<64xf32> to vector<64x1xf32>
      %cst_17 = arith.constant 3.200000e+01 : f32
      %34 = vector.broadcast %cst_17 : f32 to vector<64x1xf32>
      %35 = arith.divf %33, %34 : vector<64x1xf32>
      %cst_18 = arith.constant 9.99999974E-6 : f32
      %36 = vector.broadcast %cst_18 : f32 to vector<64x1xf32>
      %37 = arith.addf %35, %36 : vector<64x1xf32>
      %38 = math.rsqrt %37 : vector<64x1xf32>
      %39 = vector.broadcast %38 : vector<64x1xf32> to vector<64x32xf32>
      %40 = arith.mulf %30, %39 : vector<64x32xf32>
      %41 = vector.broadcast %23 : vector<1x32xf32> to vector<64x32xf32>
      %42 = arith.mulf %40, %41 : vector<64x32xf32>
      %43 = vector.broadcast %24 : vector<1x32xf32> to vector<64x32xf32>
      %44 = arith.addf %42, %43 : vector<64x32xf32>
      %c0_19 = arith.constant 0 : index
      %c0_20 = arith.constant 0 : index
      %45 = vector.load %arg7[%c0_19, %c0_20] : memref<32x96xf32, #tpu.memory_space<vmem>>, vector<32x96xf32>
      %cst_21 = arith.constant dense<0.000000e+00> : vector<64x96xf32>
      %46 = tpu.matmul %44, %45, %cst_21 {dimension_numbers = #tpu.dot_dimension_numbers<[1], [0], [0], [1], [0, 0, 1, 1], [], []>} : vector<64x32xf32>, vector<32x96xf32>, vector<64x96xf32> -> vector<64x96xf32>
      %c0_22 = arith.constant 0 : index
      %c0_23 = arith.constant 0 : index
      %47 = vector.load %arg8[%c0_22, %c0_23] : memref<1x96xf32, #tpu.memory_space<vmem>>, vector<1x96xf32>
      %48 = vector.broadcast %47 : vector<1x96xf32> to vector<64x96xf32>
      %49 = arith.addf %46, %48 : vector<64x96xf32>
      %50 = vector.extract_strided_slice %49 {offsets = [0, 0], sizes = [64, 8], strides = [1, 1]} : vector<64x96xf32> to vector<64x8xf32>
      %51 = vector.shape_cast %50 : vector<64x8xf32> to vector<8x8x8xf32>
      %52 = vector.extract_strided_slice %49 {offsets = [0, 32], sizes = [64, 8], strides = [1, 1]} : vector<64x96xf32> to vector<64x8xf32>
      %53 = vector.shape_cast %52 : vector<64x8xf32> to vector<8x8x8xf32>
      %54 = vector.extract_strided_slice %49 {offsets = [0, 64], sizes = [64, 8], strides = [1, 1]} : vector<64x96xf32> to vector<64x8xf32>
      %55 = vector.shape_cast %54 : vector<64x8xf32> to vector<8x8x8xf32>
      "tpu.trace_start"() <{level = 10 : i32, message = "bqd,bkd->bqk"}> : () -> ()
      %cst_24 = arith.constant dense<0.000000e+00> : vector<8x8x8xf32>
      %56 = tpu.matmul %51, %53, %cst_24 {dimension_numbers = #tpu.dot_dimension_numbers<[2], [2], [1], [1], [0, 0, 0, 1, 1, 1], [0], [0]>} : vector<8x8x8xf32>, vector<8x8x8xf32>, vector<8x8x8xf32> -> vector<8x8x8xf32>
      "tpu.trace_stop"() : () -> ()
      %cst_25 = arith.constant 0.353553385 : f32
      %57 = vector.broadcast %cst_25 : f32 to vector<8x8x8xf32>
      %58 = arith.mulf %56, %57 : vector<8x8x8xf32>
      %cst_26 = arith.constant dense<0xFF800000> : vector<8x8xf32>
      %59 = vector.multi_reduction <maximumf>, %58, %cst_26 [2] : vector<8x8x8xf32> to vector<8x8xf32>
      %60 = vector.shape_cast %59 : vector<8x8xf32> to vector<8x8x1xf32>
      %61 = vector.broadcast %60 : vector<8x8x1xf32> to vector<8x8x8xf32>
      %62 = arith.subf %58, %61 : vector<8x8x8xf32>
      %63 = math.exp %62 : vector<8x8x8xf32>
      %cst_27 = arith.constant dense<0.000000e+00> : vector<8x8xf32>
      %64 = vector.multi_reduction <add>, %63, %cst_27 [2] : vector<8x8x8xf32> to vector<8x8xf32>
      %65 = vector.shape_cast %64 : vector<8x8xf32> to vector<8x8x1xf32>
      %66 = tpu.reciprocal %65 : vector<8x8x1xf32> -> vector<8x8x1xf32>
      %67 = vector.broadcast %66 : vector<8x8x1xf32> to vector<8x8x8xf32>
      %68 = arith.mulf %63, %67 : vector<8x8x8xf32>
      "tpu.trace_start"() <{level = 10 : i32, message = "bqk,bkd->bqd"}> : () -> ()
      %cst_28 = arith.constant dense<0.000000e+00> : vector<8x8x8xf32>
      %69 = tpu.matmul %68, %55, %cst_28 {dimension_numbers = #tpu.dot_dimension_numbers<[2], [1], [1], [2], [0, 0, 0, 1, 1, 2], [0], [0]>} : vector<8x8x8xf32>, vector<8x8x8xf32>, vector<8x8x8xf32> -> vector<8x8x8xf32>
      "tpu.trace_stop"() : () -> ()
      %70 = vector.shape_cast %69 : vector<8x8x8xf32> to vector<64x8xf32>
      %c0_29 = arith.constant 0 : index
      %c0_30 = arith.constant 0 : index
      %71 = vector.load %arg24[%c0_29, %c0_30] : memref<64x32xf32, #tpu.memory_space<vmem>>, vector<64x8xf32>
      tpu.vector_store %arg24[%c0_29, %c0_30], %70 {strides = array<i32>} : memref<64x32xf32, #tpu.memory_space<vmem>>, vector<64x8xf32>,
      %72 = vector.extract_strided_slice %49 {offsets = [0, 8], sizes = [64, 8], strides = [1, 1]} : vector<64x96xf32> to vector<64x8xf32>
      %73 = vector.shape_cast %72 : vector<64x8xf32> to vector<8x8x8xf32>
      %74 = vector.extract_strided_slice %49 {offsets = [0, 40], sizes = [64, 8], strides = [1, 1]} : vector<64x96xf32> to vector<64x8xf32>
      %75 = vector.shape_cast %74 : vector<64x8xf32> to vector<8x8x8xf32>
      %76 = vector.extract_strided_slice %49 {offsets = [0, 72], sizes = [64, 8], strides = [1, 1]} : vector<64x96xf32> to vector<64x8xf32>
      %77 = vector.shape_cast %76 : vector<64x8xf32> to vector<8x8x8xf32>
      "tpu.trace_start"() <{level = 10 : i32, message = "bqd,bkd->bqk"}> : () -> ()
      %cst_31 = arith.constant dense<0.000000e+00> : vector<8x8x8xf32>
      %78 = tpu.matmul %73, %75, %cst_31 {dimension_numbers = #tpu.dot_dimension_numbers<[2], [2], [1], [1], [0, 0, 0, 1, 1, 1], [0], [0]>} : vector<8x8x8xf32>, vector<8x8x8xf32>, vector<8x8x8xf32> -> vector<8x8x8xf32>
      "tpu.trace_stop"() : () -> ()
      %cst_32 = arith.constant 0.353553385 : f32
      %79 = vector.broadcast %cst_32 : f32 to vector<8x8x8xf32>
      %80 = arith.mulf %78, %79 : vector<8x8x8xf32>
      %cst_33 = arith.constant dense<0xFF800000> : vector<8x8xf32>
      %81 = vector.multi_reduction <maximumf>, %80, %cst_33 [2] : vector<8x8x8xf32> to vector<8x8xf32>
      %82 = vector.shape_cast %81 : vector<8x8xf32> to vector<8x8x1xf32>
      %83 = vector.broadcast %82 : vector<8x8x1xf32> to vector<8x8x8xf32>
      %84 = arith.subf %80, %83 : vector<8x8x8xf32>
      %85 = math.exp %84 : vector<8x8x8xf32>
      %cst_34 = arith.constant dense<0.000000e+00> : vector<8x8xf32>
      %86 = vector.multi_reduction <add>, %85, %cst_34 [2] : vector<8x8x8xf32> to vector<8x8xf32>
      %87 = vector.shape_cast %86 : vector<8x8xf32> to vector<8x8x1xf32>
      %88 = tpu.reciprocal %87 : vector<8x8x1xf32> -> vector<8x8x1xf32>
      %89 = vector.broadcast %88 : vector<8x8x1xf32> to vector<8x8x8xf32>
      %90 = arith.mulf %85, %89 : vector<8x8x8xf32>
      "tpu.trace_start"() <{level = 10 : i32, message = "bqk,bkd->bqd"}> : () -> ()
      %cst_35 = arith.constant dense<0.000000e+00> : vector<8x8x8xf32>
      %91 = tpu.matmul %90, %77, %cst_35 {dimension_numbers = #tpu.dot_dimension_numbers<[2], [1], [1], [2], [0, 0, 0, 1, 1, 2], [0], [0]>} : vector<8x8x8xf32>, vector<8x8x8xf32>, vector<8x8x8xf32> -> vector<8x8x8xf32>
      "tpu.trace_stop"() : () -> ()
      %92 = vector.shape_cast %91 : vector<8x8x8xf32> to vector<64x8xf32>
      %c0_36 = arith.constant 0 : index
      %c8 = arith.constant 8 : index
      %93 = vector.load %arg24[%c0_36, %c8] : memref<64x32xf32, #tpu.memory_space<vmem>>, vector<64x8xf32>
      tpu.vector_store %arg24[%c0_36, %c8], %92 {strides = array<i32>} : memref<64x32xf32, #tpu.memory_space<vmem>>, vector<64x8xf32>,
      %94 = vector.extract_strided_slice %49 {offsets = [0, 16], sizes = [64, 8], strides = [1, 1]} : vector<64x96xf32> to vector<64x8xf32>
      %95 = vector.shape_cast %94 : vector<64x8xf32> to vector<8x8x8xf32>
      %96 = vector.extract_strided_slice %49 {offsets = [0, 48], sizes = [64, 8], strides = [1, 1]} : vector<64x96xf32> to vector<64x8xf32>
      %97 = vector.shape_cast %96 : vector<64x8xf32> to vector<8x8x8xf32>
      %98 = vector.extract_strided_slice %49 {offsets = [0, 80], sizes = [64, 8], strides = [1, 1]} : vector<64x96xf32> to vector<64x8xf32>
      %99 = vector.shape_cast %98 : vector<64x8xf32> to vector<8x8x8xf32>
      "tpu.trace_start"() <{level = 10 : i32, message = "bqd,bkd->bqk"}> : () -> ()
      %cst_37 = arith.constant dense<0.000000e+00> : vector<8x8x8xf32>
      %100 = tpu.matmul %95, %97, %cst_37 {dimension_numbers = #tpu.dot_dimension_numbers<[2], [2], [1], [1], [0, 0, 0, 1, 1, 1], [0], [0]>} : vector<8x8x8xf32>, vector<8x8x8xf32>, vector<8x8x8xf32> -> vector<8x8x8xf32>
      "tpu.trace_stop"() : () -> ()
      %cst_38 = arith.constant 0.353553385 : f32
      %101 = vector.broadcast %cst_38 : f32 to vector<8x8x8xf32>
      %102 = arith.mulf %100, %101 : vector<8x8x8xf32>
      %cst_39 = arith.constant dense<0xFF800000> : vector<8x8xf32>
      %103 = vector.multi_reduction <maximumf>, %102, %cst_39 [2] : vector<8x8x8xf32> to vector<8x8xf32>
      %104 = vector.shape_cast %103 : vector<8x8xf32> to vector<8x8x1xf32>
      %105 = vector.broadcast %104 : vector<8x8x1xf32> to vector<8x8x8xf32>
      %106 = arith.subf %102, %105 : vector<8x8x8xf32>
      %107 = math.exp %106 : vector<8x8x8xf32>
      %cst_40 = arith.constant dense<0.000000e+00> : vector<8x8xf32>
      %108 = vector.multi_reduction <add>, %107, %cst_40 [2] : vector<8x8x8xf32> to vector<8x8xf32>
      %109 = vector.shape_cast %108 : vector<8x8xf32> to vector<8x8x1xf32>
      %110 = tpu.reciprocal %109 : vector<8x8x1xf32> -> vector<8x8x1xf32>
      %111 = vector.broadcast %110 : vector<8x8x1xf32> to vector<8x8x8xf32>
      %112 = arith.mulf %107, %111 : vector<8x8x8xf32>
      "tpu.trace_start"() <{level = 10 : i32, message = "bqk,bkd->bqd"}> : () -> ()
      %cst_41 = arith.constant dense<0.000000e+00> : vector<8x8x8xf32>
      %113 = tpu.matmul %112, %99, %cst_41 {dimension_numbers = #tpu.dot_dimension_numbers<[2], [1], [1], [2], [0, 0, 0, 1, 1, 2], [0], [0]>} : vector<8x8x8xf32>, vector<8x8x8xf32>, vector<8x8x8xf32> -> vector<8x8x8xf32>
      "tpu.trace_stop"() : () -> ()
      %114 = vector.shape_cast %113 : vector<8x8x8xf32> to vector<64x8xf32>
      %c0_42 = arith.constant 0 : index
      %c16 = arith.constant 16 : index
      %115 = vector.load %arg24[%c0_42, %c16] : memref<64x32xf32, #tpu.memory_space<vmem>>, vector<64x8xf32>
      tpu.vector_store %arg24[%c0_42, %c16], %114 {strides = array<i32>} : memref<64x32xf32, #tpu.memory_space<vmem>>, vector<64x8xf32>,
      %116 = vector.extract_strided_slice %49 {offsets = [0, 24], sizes = [64, 8], strides = [1, 1]} : vector<64x96xf32> to vector<64x8xf32>
      %117 = vector.shape_cast %116 : vector<64x8xf32> to vector<8x8x8xf32>
      %118 = vector.extract_strided_slice %49 {offsets = [0, 56], sizes = [64, 8], strides = [1, 1]} : vector<64x96xf32> to vector<64x8xf32>
      %119 = vector.shape_cast %118 : vector<64x8xf32> to vector<8x8x8xf32>
      %120 = vector.extract_strided_slice %49 {offsets = [0, 88], sizes = [64, 8], strides = [1, 1]} : vector<64x96xf32> to vector<64x8xf32>
      %121 = vector.shape_cast %120 : vector<64x8xf32> to vector<8x8x8xf32>
      "tpu.trace_start"() <{level = 10 : i32, message = "bqd,bkd->bqk"}> : () -> ()
      %cst_43 = arith.constant dense<0.000000e+00> : vector<8x8x8xf32>
      %122 = tpu.matmul %117, %119, %cst_43 {dimension_numbers = #tpu.dot_dimension_numbers<[2], [2], [1], [1], [0, 0, 0, 1, 1, 1], [0], [0]>} : vector<8x8x8xf32>, vector<8x8x8xf32>, vector<8x8x8xf32> -> vector<8x8x8xf32>
      "tpu.trace_stop"() : () -> ()
      %cst_44 = arith.constant 0.353553385 : f32
      %123 = vector.broadcast %cst_44 : f32 to vector<8x8x8xf32>
      %124 = arith.mulf %122, %123 : vector<8x8x8xf32>
      %cst_45 = arith.constant dense<0xFF800000> : vector<8x8xf32>
      %125 = vector.multi_reduction <maximumf>, %124, %cst_45 [2] : vector<8x8x8xf32> to vector<8x8xf32>
      %126 = vector.shape_cast %125 : vector<8x8xf32> to vector<8x8x1xf32>
      %127 = vector.broadcast %126 : vector<8x8x1xf32> to vector<8x8x8xf32>
      %128 = arith.subf %124, %127 : vector<8x8x8xf32>
      %129 = math.exp %128 : vector<8x8x8xf32>
      %cst_46 = arith.constant dense<0.000000e+00> : vector<8x8xf32>
      %130 = vector.multi_reduction <add>, %129, %cst_46 [2] : vector<8x8x8xf32> to vector<8x8xf32>
      %131 = vector.shape_cast %130 : vector<8x8xf32> to vector<8x8x1xf32>
      %132 = tpu.reciprocal %131 : vector<8x8x1xf32> -> vector<8x8x1xf32>
      %133 = vector.broadcast %132 : vector<8x8x1xf32> to vector<8x8x8xf32>
      %134 = arith.mulf %129, %133 : vector<8x8x8xf32>
      "tpu.trace_start"() <{level = 10 : i32, message = "bqk,bkd->bqd"}> : () -> ()
      %cst_47 = arith.constant dense<0.000000e+00> : vector<8x8x8xf32>
      %135 = tpu.matmul %134, %121, %cst_47 {dimension_numbers = #tpu.dot_dimension_numbers<[2], [1], [1], [2], [0, 0, 0, 1, 1, 2], [0], [0]>} : vector<8x8x8xf32>, vector<8x8x8xf32>, vector<8x8x8xf32> -> vector<8x8x8xf32>
      "tpu.trace_stop"() : () -> ()
      %136 = vector.shape_cast %135 : vector<8x8x8xf32> to vector<64x8xf32>
      %c0_48 = arith.constant 0 : index
      %c24 = arith.constant 24 : index
      %137 = vector.load %arg24[%c0_48, %c24] : memref<64x32xf32, #tpu.memory_space<vmem>>, vector<64x8xf32>
      tpu.vector_store %arg24[%c0_48, %c24], %136 {strides = array<i32>} : memref<64x32xf32, #tpu.memory_space<vmem>>, vector<64x8xf32>,
      %c0_49 = arith.constant 0 : index
      %c0_50 = arith.constant 0 : index
      %138 = vector.load %arg24[%c0_49, %c0_50] : memref<64x32xf32, #tpu.memory_space<vmem>>, vector<64x32xf32>
      %c0_51 = arith.constant 0 : index
      %c0_52 = arith.constant 0 : index
      %139 = vector.load %arg9[%c0_51, %c0_52] : memref<32x32xf32, #tpu.memory_space<vmem>>, vector<32x32xf32>
      %cst_53 = arith.constant dense<0.000000e+00> : vector<64x32xf32>
      %140 = tpu.matmul %138, %139, %cst_53 {dimension_numbers = #tpu.dot_dimension_numbers<[1], [0], [0], [1], [0, 0, 1, 1], [], []>} : vector<64x32xf32>, vector<32x32xf32>, vector<64x32xf32> -> vector<64x32xf32>
      %c0_54 = arith.constant 0 : index
      %c0_55 = arith.constant 0 : index
      %141 = vector.load %arg10[%c0_54, %c0_55] : memref<1x32xf32, #tpu.memory_space<vmem>>, vector<1x32xf32>
      %142 = vector.broadcast %141 : vector<1x32xf32> to vector<64x32xf32>
      %143 = arith.addf %140, %142 : vector<64x32xf32>
      %144 = arith.addf %22, %143 : vector<64x32xf32>
      %c0_56 = arith.constant 0 : index
      %c0_57 = arith.constant 0 : index
      %145 = vector.load %arg20[%c0_56, %c0_57] : memref<64x32xf32, #tpu.memory_space<vmem>>, vector<64x32xf32>
      tpu.vector_store %arg20[%c0_56, %c0_57], %144 {strides = array<i32>} : memref<64x32xf32, #tpu.memory_space<vmem>>, vector<64x32xf32>,
      %c0_58 = arith.constant 0 : index
      %c0_59 = arith.constant 0 : index
      %146 = vector.load %arg5[%c0_58, %c0_59] : memref<1x32xf32, #tpu.memory_space<vmem>>, vector<1x32xf32>
      %c0_60 = arith.constant 0 : index
      %c0_61 = arith.constant 0 : index
      %147 = vector.load %arg6[%c0_60, %c0_61] : memref<1x32xf32, #tpu.memory_space<vmem>>, vector<1x32xf32>
      %cst_62 = arith.constant dense<0.000000e+00> : vector<64xf32>
      %148 = vector.multi_reduction <add>, %144, %cst_62 [1] : vector<64x32xf32> to vector<64xf32>
      %149 = vector.shape_cast %148 : vector<64xf32> to vector<64x1xf32>
      %cst_63 = arith.constant 3.200000e+01 : f32
      %150 = vector.broadcast %cst_63 : f32 to vector<64x1xf32>
      %151 = arith.divf %149, %150 : vector<64x1xf32>
      %152 = vector.broadcast %151 : vector<64x1xf32> to vector<64x32xf32>
      %153 = arith.subf %144, %152 : vector<64x32xf32>
      %154 = arith.mulf %153, %153 : vector<64x32xf32>
      %cst_64 = arith.constant dense<0.000000e+00> : vector<64xf32>
      %155 = vector.multi_reduction <add>, %154, %cst_64 [1] : vector<64x32xf32> to vector<64xf32>
      %156 = vector.shape_cast %155 : vector<64xf32> to vector<64x1xf32>
      %cst_65 = arith.constant 3.200000e+01 : f32
      %157 = vector.broadcast %cst_65 : f32 to vector<64x1xf32>
      %158 = arith.divf %156, %157 : vector<64x1xf32>
      %cst_66 = arith.constant 9.99999974E-6 : f32
      %159 = vector.broadcast %cst_66 : f32 to vector<64x1xf32>
      %160 = arith.addf %158, %159 : vector<64x1xf32>
      %161 = math.rsqrt %160 : vector<64x1xf32>
      %162 = vector.broadcast %161 : vector<64x1xf32> to vector<64x32xf32>
      %163 = arith.mulf %153, %162 : vector<64x32xf32>
      %164 = vector.broadcast %146 : vector<1x32xf32> to vector<64x32xf32>
      %165 = arith.mulf %163, %164 : vector<64x32xf32>
      %166 = vector.broadcast %147 : vector<1x32xf32> to vector<64x32xf32>
      %167 = arith.addf %165, %166 : vector<64x32xf32>
      %c0_67 = arith.constant 0 : index
      %c0_68 = arith.constant 0 : index
      %168 = vector.load %arg21[%c0_67, %c0_68] : memref<64x32xf32, #tpu.memory_space<vmem>>, vector<64x32xf32>
      tpu.vector_store %arg21[%c0_67, %c0_68], %167 {strides = array<i32>} : memref<64x32xf32, #tpu.memory_space<vmem>>, vector<64x32xf32>,
      %c0_69 = arith.constant 0 : index
      %c0_70 = arith.constant 0 : index
      %169 = vector.load %arg11[%c0_69, %c0_70] : memref<32x4xf32, #tpu.memory_space<vmem>>, vector<32x4xf32>
      %cst_71 = arith.constant dense<0.000000e+00> : vector<64x4xf32>
      %170 = tpu.matmul %167, %169, %cst_71 {dimension_numbers = #tpu.dot_dimension_numbers<[1], [0], [0], [1], [0, 0, 1, 1], [], []>} : vector<64x32xf32>, vector<32x4xf32>, vector<64x4xf32> -> vector<64x4xf32>
      %c0_72 = arith.constant 0 : index
      %c0_73 = arith.constant 0 : index
      %171 = vector.load %arg12[%c0_72, %c0_73] : memref<1x4xf32, #tpu.memory_space<vmem>>, vector<1x4xf32>
      %172 = vector.broadcast %171 : vector<1x4xf32> to vector<64x4xf32>
      %173 = arith.addf %170, %172 : vector<64x4xf32>
      %cst_74 = arith.constant dense<0xFF800000> : vector<64xf32>
      %174 = vector.multi_reduction <maximumf>, %173, %cst_74 [1] : vector<64x4xf32> to vector<64xf32>
      %175 = vector.shape_cast %174 : vector<64xf32> to vector<64x1xf32>
      %176 = vector.broadcast %175 : vector<64x1xf32> to vector<64x4xf32>
      %177 = arith.cmpf oge, %173, %176 : vector<64x4xf32>
      %cst_75 = arith.constant -1.000000e+30 : f32
      %178 = vector.broadcast %cst_75 : f32 to vector<64x4xf32>
      %179 = arith.select %177, %178, %173 : vector<64x4xi1>, vector<64x4xf32>
      %cst_76 = arith.constant dense<0xFF800000> : vector<64xf32>
      %180 = vector.multi_reduction <maximumf>, %179, %cst_76 [1] : vector<64x4xf32> to vector<64xf32>
      %181 = vector.shape_cast %180 : vector<64xf32> to vector<64x1xf32>
      %182 = vector.broadcast %181 : vector<64x1xf32> to vector<64x4xf32>
      %183 = arith.cmpf oge, %173, %182 : vector<64x4xf32>
      %184 = vector.broadcast %175 : vector<64x1xf32> to vector<64x4xf32>
      %185 = arith.subf %173, %184 : vector<64x4xf32>
      %186 = math.exp %185 : vector<64x4xf32>
      %cst_77 = arith.constant 0.000000e+00 : f32
      %187 = vector.broadcast %cst_77 : f32 to vector<64x4xf32>
      %188 = arith.select %183, %186, %187 : vector<64x4xi1>, vector<64x4xf32>
      %cst_78 = arith.constant dense<0.000000e+00> : vector<64xf32>
      %189 = vector.multi_reduction <add>, %188, %cst_78 [1] : vector<64x4xf32> to vector<64xf32>
      %190 = vector.shape_cast %189 : vector<64xf32> to vector<64x1xf32>
      %191 = tpu.reciprocal %190 : vector<64x1xf32> -> vector<64x1xf32>
      %192 = vector.broadcast %191 : vector<64x1xf32> to vector<64x4xf32>
      %193 = arith.mulf %188, %192 : vector<64x4xf32>
      %c0_79 = arith.constant 0 : index
      %c0_80 = arith.constant 0 : index
      %194 = vector.load %arg22[%c0_79, %c0_80] : memref<64x4xf32, #tpu.memory_space<vmem>>, vector<64x4xf32>
      tpu.vector_store %arg22[%c0_79, %c0_80], %193 {strides = array<i32>} : memref<64x4xf32, #tpu.memory_space<vmem>>, vector<64x4xf32>,
      %cst_81 = arith.constant 0.000000e+00 : f32
      %195 = vector.broadcast %cst_81 : f32 to vector<64x32xf32>
      %c0_82 = arith.constant 0 : index
      %c0_83 = arith.constant 0 : index
      %196 = vector.load %arg23[%c0_82, %c0_83] : memref<64x32xf32, #tpu.memory_space<vmem>>, vector<64x32xf32>
      tpu.vector_store %arg23[%c0_82, %c0_83], %195 {strides = array<i32>} : memref<64x32xf32, #tpu.memory_space<vmem>>, vector<64x32xf32>,
    } else {
    }
    %c0 = arith.constant 0 : index
    %c0_1 = arith.constant 0 : index
    %3 = vector.load %arg22[%c0, %c0_1] : memref<64x4xf32, #tpu.memory_space<vmem>>, vector<64x4xf32>
    %4 = tpu.iota {dimensions = array<i32: 1>} : vector<64x4xi32>
    %5 = vector.broadcast %arg1 : i32 to vector<64x4xi32>
    %6 = arith.cmpi eq, %4, %5 : vector<64x4xi32>
    %cst = arith.constant 0.000000e+00 : f32
    %7 = vector.broadcast %cst : f32 to vector<64x4xf32>
    %8 = arith.select %6, %3, %7 : vector<64x4xi1>, vector<64x4xf32>
    %cst_2 = arith.constant dense<0.000000e+00> : vector<64xf32>
    %9 = vector.multi_reduction <add>, %8, %cst_2 [1] : vector<64x4xf32> to vector<64xf32>
    %10 = vector.shape_cast %9 : vector<64xf32> to vector<64x1xf32>
    %11 = vector.shape_cast %10 : vector<64x1xf32> to vector<1x64x1xf32>
    %cst_3 = arith.constant dense<0xFF800000> : vector<1xf32>
    %12 = vector.multi_reduction <maximumf>, %11, %cst_3 [1, 2] : vector<1x64x1xf32> to vector<1xf32>
    %13 = vector.shape_cast %12 : vector<1xf32> to vector<1x1x1xf32>
    %14 = vector.extract %13[0, 0, 0] : f32 from vector<1x1x1xf32>
    %cst_4 = arith.constant 0.000000e+00 : f32
    %15 = arith.cmpf ogt, %14, %cst_4 : f32
    %16 = arith.extui %15 : i1 to i32
    %c0_i32_5 = arith.constant 0 : i32
    %17 = arith.cmpi ne, %16, %c0_i32_5 : i32
    scf.if %17 {
      %c0_7 = arith.constant 0 : index
      %c0_8 = arith.constant 0 : index
      %21 = vector.load %arg21[%c0_7, %c0_8] : memref<64x32xf32, #tpu.memory_space<vmem>>, vector<64x32xf32>
      %c0_9 = arith.constant 0 : index
      %c0_10 = arith.constant 0 : index
      %c0_11 = arith.constant 0 : index
      %22 = vector.load %arg13[%c0_9, %c0_10, %c0_11] : memref<1x32x32xf32, #tpu.memory_space<vmem>>, vector<1x32x32xf32>
      %23 = vector.shape_cast %22 : vector<1x32x32xf32> to vector<32x32xf32>
      %cst_12 = arith.constant dense<0.000000e+00> : vector<64x32xf32>
      %24 = tpu.matmul %21, %23, %cst_12 {dimension_numbers = #tpu.dot_dimension_numbers<[1], [0], [0], [1], [0, 0, 1, 1], [], []>} : vector<64x32xf32>, vector<32x32xf32>, vector<64x32xf32> -> vector<64x32xf32>
      %c0_13 = arith.constant 0 : index
      %c0_14 = arith.constant 0 : index
      %c0_15 = arith.constant 0 : index
      %25 = vector.load %arg14[%c0_13, %c0_14, %c0_15] : memref<1x1x32xf32, #tpu.memory_space<vmem>>, vector<1x1x32xf32>
      %26 = vector.shape_cast %25 : vector<1x1x32xf32> to vector<1x32xf32>
      %27 = vector.broadcast %26 : vector<1x32xf32> to vector<64x32xf32>
      %28 = arith.addf %24, %27 : vector<64x32xf32>
      %cst_16 = arith.constant 5.000000e-01 : f32
      %29 = vector.broadcast %cst_16 : f32 to vector<64x32xf32>
      %30 = arith.mulf %29, %28 : vector<64x32xf32>
      %cst_17 = arith.constant 0.707106769 : f32
      %31 = vector.broadcast %cst_17 : f32 to vector<64x32xf32>
      %32 = arith.mulf %28, %31 : vector<64x32xf32>
      %33 = math.erf %32 : vector<64x32xf32>
      %cst_18 = arith.constant 1.000000e+00 : f32
      %34 = vector.broadcast %cst_18 : f32 to vector<64x32xf32>
      %35 = arith.addf %34, %33 : vector<64x32xf32>
      %36 = arith.mulf %30, %35 : vector<64x32xf32>
      %c0_19 = arith.constant 0 : index
      %c0_20 = arith.constant 0 : index
      %c0_21 = arith.constant 0 : index
      %37 = vector.load %arg15[%c0_19, %c0_20, %c0_21] : memref<1x32x32xf32, #tpu.memory_space<vmem>>, vector<1x32x32xf32>
      %38 = vector.shape_cast %37 : vector<1x32x32xf32> to vector<32x32xf32>
      %cst_22 = arith.constant dense<0.000000e+00> : vector<64x32xf32>
      %39 = tpu.matmul %36, %38, %cst_22 {dimension_numbers = #tpu.dot_dimension_numbers<[1], [0], [0], [1], [0, 0, 1, 1], [], []>} : vector<64x32xf32>, vector<32x32xf32>, vector<64x32xf32> -> vector<64x32xf32>
      %c0_23 = arith.constant 0 : index
      %c0_24 = arith.constant 0 : index
      %c0_25 = arith.constant 0 : index
      %40 = vector.load %arg16[%c0_23, %c0_24, %c0_25] : memref<1x1x32xf32, #tpu.memory_space<vmem>>, vector<1x1x32xf32>
      %41 = vector.shape_cast %40 : vector<1x1x32xf32> to vector<1x32xf32>
      %42 = vector.broadcast %41 : vector<1x32xf32> to vector<64x32xf32>
      %43 = arith.addf %39, %42 : vector<64x32xf32>
      %c0_26 = arith.constant 0 : index
      %c0_27 = arith.constant 0 : index
      %44 = vector.load %arg23[%c0_26, %c0_27] : memref<64x32xf32, #tpu.memory_space<vmem>>, vector<64x32xf32>
      %45 = vector.broadcast %10 : vector<64x1xf32> to vector<64x32xf32>
      %46 = arith.mulf %45, %43 : vector<64x32xf32>
      %47 = arith.addf %44, %46 : vector<64x32xf32>
      %c0_28 = arith.constant 0 : index
      %c0_29 = arith.constant 0 : index
      %48 = vector.load %arg23[%c0_28, %c0_29] : memref<64x32xf32, #tpu.memory_space<vmem>>, vector<64x32xf32>
      tpu.vector_store %arg23[%c0_28, %c0_29], %47 {strides = array<i32>} : memref<64x32xf32, #tpu.memory_space<vmem>>, vector<64x32xf32>,
    } else {
    }
    %c3_i32 = arith.constant 3 : i32
    %18 = arith.cmpi eq, %arg1, %c3_i32 : i32
    %19 = arith.extui %18 : i1 to i32
    %c0_i32_6 = arith.constant 0 : i32
    %20 = arith.cmpi ne, %19, %c0_i32_6 : i32
    scf.if %20 {
      %c0_7 = arith.constant 0 : index
      %c0_8 = arith.constant 0 : index
      %21 = vector.load %arg20[%c0_7, %c0_8] : memref<64x32xf32, #tpu.memory_space<vmem>>, vector<64x32xf32>
      %c0_9 = arith.constant 0 : index
      %c0_10 = arith.constant 0 : index
      %22 = vector.load %arg23[%c0_9, %c0_10] : memref<64x32xf32, #tpu.memory_space<vmem>>, vector<64x32xf32>
      %23 = arith.addf %21, %22 : vector<64x32xf32>
      %24 = vector.shape_cast %23 : vector<64x32xf32> to vector<8x8x32xf32>
      %cst_11 = arith.constant dense<0.000000e+00> : vector<8x32xf32>
      %25 = vector.multi_reduction <add>, %24, %cst_11 [1] : vector<8x8x32xf32> to vector<8x32xf32>
      %cst_12 = arith.constant 8.000000e+00 : f32
      %26 = vector.broadcast %cst_12 : f32 to vector<8x32xf32>
      %27 = arith.divf %25, %26 : vector<8x32xf32>
      %c0_13 = arith.constant 0 : index
      %c0_14 = arith.constant 0 : index
      %28 = vector.load %arg17[%c0_13, %c0_14] : memref<32x128xf32, #tpu.memory_space<vmem>>, vector<32x128xf32>
      %cst_15 = arith.constant dense<0.000000e+00> : vector<8x128xf32>
      %29 = tpu.matmul %27, %28, %cst_15 {dimension_numbers = #tpu.dot_dimension_numbers<[1], [0], [0], [1], [0, 0, 1, 1], [], []>} : vector<8x32xf32>, vector<32x128xf32>, vector<8x128xf32> -> vector<8x128xf32>
      %c0_16 = arith.constant 0 : index
      %c0_17 = arith.constant 0 : index
      %30 = vector.load %arg18[%c0_16, %c0_17] : memref<1x128xf32, #tpu.memory_space<vmem>>, vector<1x128xf32>
      %31 = vector.broadcast %30 : vector<1x128xf32> to vector<8x128xf32>
      %32 = arith.addf %29, %31 : vector<8x128xf32>
      %c0_18 = arith.constant 0 : index
      %c0_19 = arith.constant 0 : index
      %33 = vector.load %arg19[%c0_18, %c0_19] : memref<8x128xf32, #tpu.memory_space<vmem>>, vector<8x128xf32>
      tpu.vector_store %arg19[%c0_18, %c0_19], %32 {strides = array<i32>} : memref<8x128xf32, #tpu.memory_space<vmem>>, vector<8x128xf32>,
    } else {
    }
    return
  }
  func.func @transform_0(%arg0: i32, %arg1: i32) -> (i32, i32, i32) {
    %c0_i32 = arith.constant 0 : i32
    %c0_i32_0 = arith.constant 0 : i32
    %c0_i32_1 = arith.constant 0 : i32
    return %arg0, %c0_i32, %c0_i32_0 : i32, i32, i32
  }
  func.func @transform_1(%arg0: i32, %arg1: i32) -> (i32, i32) {
    %c0_i32 = arith.constant 0 : i32
    %c0_i32_0 = arith.constant 0 : i32
    %c0_i32_1 = arith.constant 0 : i32
    return %c0_i32, %c0_i32_0 : i32, i32
  }
  func.func @transform_2(%arg0: i32, %arg1: i32) -> (i32, i32) {
    %c0_i32 = arith.constant 0 : i32
    %c0_i32_0 = arith.constant 0 : i32
    %c0_i32_1 = arith.constant 0 : i32
    return %c0_i32, %c0_i32_0 : i32, i32
  }
  func.func @transform_3(%arg0: i32, %arg1: i32) -> (i32, i32) {
    %c0_i32 = arith.constant 0 : i32
    %c0_i32_0 = arith.constant 0 : i32
    %c0_i32_1 = arith.constant 0 : i32
    return %c0_i32, %c0_i32_0 : i32, i32
  }
  func.func @transform_4(%arg0: i32, %arg1: i32) -> (i32, i32) {
    %c0_i32 = arith.constant 0 : i32
    %c0_i32_0 = arith.constant 0 : i32
    %c0_i32_1 = arith.constant 0 : i32
    return %c0_i32, %c0_i32_0 : i32, i32
  }
  func.func @transform_5(%arg0: i32, %arg1: i32) -> (i32, i32) {
    %c0_i32 = arith.constant 0 : i32
    %c0_i32_0 = arith.constant 0 : i32
    %c0_i32_1 = arith.constant 0 : i32
    return %c0_i32, %c0_i32_0 : i32, i32
  }
  func.func @transform_6(%arg0: i32, %arg1: i32) -> (i32, i32) {
    %c0_i32 = arith.constant 0 : i32
    %c0_i32_0 = arith.constant 0 : i32
    %c0_i32_1 = arith.constant 0 : i32
    return %c0_i32, %c0_i32_0 : i32, i32
  }
  func.func @transform_7(%arg0: i32, %arg1: i32) -> (i32, i32) {
    %c0_i32 = arith.constant 0 : i32
    %c0_i32_0 = arith.constant 0 : i32
    %c0_i32_1 = arith.constant 0 : i32
    return %c0_i32, %c0_i32_0 : i32, i32
  }
  func.func @transform_8(%arg0: i32, %arg1: i32) -> (i32, i32) {
    %c0_i32 = arith.constant 0 : i32
    %c0_i32_0 = arith.constant 0 : i32
    %c0_i32_1 = arith.constant 0 : i32
    return %c0_i32, %c0_i32_0 : i32, i32
  }
  func.func @transform_9(%arg0: i32, %arg1: i32) -> (i32, i32) {
    %c0_i32 = arith.constant 0 : i32
    %c0_i32_0 = arith.constant 0 : i32
    %c0_i32_1 = arith.constant 0 : i32
    return %c0_i32, %c0_i32_0 : i32, i32
  }
  func.func @transform_10(%arg0: i32, %arg1: i32) -> (i32, i32) {
    %c0_i32 = arith.constant 0 : i32
    %c0_i32_0 = arith.constant 0 : i32
    %c0_i32_1 = arith.constant 0 : i32
    return %c0_i32, %c0_i32_0 : i32, i32
  }
  func.func @transform_11(%arg0: i32, %arg1: i32) -> (i32, i32, i32) {
    %c0_i32 = arith.constant 0 : i32
    %c0_i32_0 = arith.constant 0 : i32
    %c0_i32_1 = arith.constant 0 : i32
    return %arg1, %c0_i32, %c0_i32_0 : i32, i32, i32
  }
  func.func @transform_12(%arg0: i32, %arg1: i32) -> (i32, i32, i32) {
    %c0_i32 = arith.constant 0 : i32
    %c0_i32_0 = arith.constant 0 : i32
    %c0_i32_1 = arith.constant 0 : i32
    return %arg1, %c0_i32, %c0_i32_0 : i32, i32, i32
  }
  func.func @transform_13(%arg0: i32, %arg1: i32) -> (i32, i32, i32) {
    %c0_i32 = arith.constant 0 : i32
    %c0_i32_0 = arith.constant 0 : i32
    %c0_i32_1 = arith.constant 0 : i32
    return %arg1, %c0_i32, %c0_i32_0 : i32, i32, i32
  }
  func.func @transform_14(%arg0: i32, %arg1: i32) -> (i32, i32, i32) {
    %c0_i32 = arith.constant 0 : i32
    %c0_i32_0 = arith.constant 0 : i32
    %c0_i32_1 = arith.constant 0 : i32
    return %arg1, %c0_i32, %c0_i32_0 : i32, i32, i32
  }
  func.func @transform_15(%arg0: i32, %arg1: i32) -> (i32, i32) {
    %c0_i32 = arith.constant 0 : i32
    %c0_i32_0 = arith.constant 0 : i32
    %c0_i32_1 = arith.constant 0 : i32
    return %c0_i32, %c0_i32_0 : i32, i32
  }
  func.func @transform_16(%arg0: i32, %arg1: i32) -> (i32, i32) {
    %c0_i32 = arith.constant 0 : i32
    %c0_i32_0 = arith.constant 0 : i32
    %c0_i32_1 = arith.constant 0 : i32
    return %c0_i32, %c0_i32_0 : i32, i32
  }
  func.func @transform_17(%arg0: i32, %arg1: i32) -> (i32, i32) {
    %c0_i32 = arith.constant 0 : i32
    %c0_i32_0 = arith.constant 0 : i32
    return %arg0, %c0_i32 : i32, i32
  }
}

</mosaic_0001>

<bundles_post_ra>
// kernel: tpu_custom_call.1
= control target key start
LH: loop header
LB: loop body
LE: loop exit
PB: predicated region body
PF: predicated region fallthrough
CT: control target
= control target key end

     0   :  { %s11596_s0 = inlined_call_operand.hbm [shape: f32[16,8,32], index: 0, kind: input, shape index: {}]   ;;  %s11597_s1 = inlined_call_operand.vmem [shape: f32[1,32], index: 1, kind: input, shape index: {}]   ;;  %s11598_s2 = inlined_call_operand.hbm [shape: f32[1,32], index: 2, kind: input, shape index: {}]   ;;  %s11599_s3 = inlined_call_operand.hbm [shape: f32[1,32], index: 3, kind: input, shape index: {}]   ;;  %s11600_s4 = inlined_call_operand.hbm [shape: f32[1,32], index: 4, kind: input, shape index: {}]   ;;  %s11601_s5 = inlined_call_operand.vmem [shape: f32[32,96], index: 5, kind: input, shape index: {}]   ;;  %s11602_s6 = inlined_call_operand.hbm [shape: f32[1,96], index: 6, kind: input, shape index: {}]   ;;  %s11603_s7 = inlined_call_operand.hbm [shape: f32[32,32], index: 7, kind: input, shape index: {}]   ;;  %s11604_s8 = inlined_call_operand.hbm [shape: f32[1,32], index: 8, kind: input, shape index: {}]   ;;  %s11605_s9 = inlined_call_operand.vmem [shape: f32[32,4], index: 9, kind: input, shape index: {}]   ;;  %s11606_s10 = inlined_call_operand.hbm [shape: f32[1,4], index: 10, kind: input, shape index: {}]   ;;  %s11607_s11 = inlined_call_operand.hbm [shape: f32[4,32,32], index: 11, kind: input, shape index: {}]   ;;  %s11608_s12 = inlined_call_operand.vmem [shape: f32[4,1,32], index: 12, kind: input, shape index: {}]   ;;  %s11609_s13 = inlined_call_operand.hbm [shape: f32[4,32,32], index: 13, kind: input, shape index: {}]   ;;  %s11610_s14 = inlined_call_operand.vmem [shape: f32[4,1,32], index: 14, kind: input, shape index: {}]   ;;  %s11611_s15 = inlined_call_operand.vmem [shape: f32[32,128], index: 15, kind: input, shape index: {}]   ;;  %s11612_s16 = inlined_call_operand.vmem [shape: f32[1,128], index: 16, kind: input, shape index: {}]   ;;  %s11613_s17 = inlined_call_operand.hbm [shape: f32[16,128], index: 17, kind: output, shape index: {}]  }
   0x1   :  { %11652 = sst [smem:[#allocation45_spill]] %s11596_s0 }
   0x2   :  { %11653 = sst [smem:[#allocation46_spill]] %s11597_s1 }
   0x3   :  { %11654 = sst [smem:[#allocation47_spill]] %s11598_s2 }
   0x4   :  { %11655 = sst [smem:[#allocation48_spill]] %s11599_s3 }
   0x5   :  { %11656 = sst [smem:[#allocation49_spill]] %s11600_s4 }
   0x6   :  { %11657 = sst [smem:[#allocation50_spill]] %s11601_s5 }
   0x7   :  { %11658 = sst [smem:[#allocation51_spill]] %s11602_s6 }
   0x8   :  { %11659 = sst [smem:[#allocation52_spill]] %s11603_s7 }
   0x9   :  { %11660 = sst [smem:[#allocation53_spill]] %s11605_s9 }
   0xa   :  { %11661 = sst [smem:[#allocation54_spill]] %s11606_s10 }
   0xb   :  { %11662 = sst [smem:[#allocation55_spill]] %s11607_s11 }
   0xc   :  { %11663 = sst [smem:[#allocation56_spill]] %s11608_s12 }
   0xd   :  { %11664 = sst [smem:[#allocation57_spill]] %s11609_s13 }
   0xe   :  { %11665 = sst [smem:[#allocation58_spill]] %s11610_s14 }
   0xf   :  { %11666 = sst [smem:[#allocation59_spill]] %s11611_s15 }
  0x10   :  { %11667 = sst [smem:[#allocation60_spill]] %s11612_s16 }
  0x11   :  { %11668 = sst [smem:[#allocation61_spill]] %s11613_s17 }
  0x12   :  { %22 = vsyncpa [#allocation8], 0 }
  0x13   :  { %24 = vsyncpa [#allocation8 + $0x1], 0 }
  0x14   :  { %25 = vsyncpa [#allocation11], 0 }
  0x15   :  { %26 = vsyncpa [#allocation14], 0 }
  0x16   :  { %27 = vsyncpa [#allocation17], 0 }
  0x17   :  { %28 = vsyncpa [#allocation20], 0 }
  0x18   :  { %29 = vsyncpa [#allocation9], 0 }
  0x19   :  { %31 = vsyncpa [#allocation9 + $0x1], 0  ;;  %s9779_s24 = smov 0   ;;  %s9781_s25 = smov 0  }
  0x1a   :  { %s9783_s26 = smov 0   ;;  %s9785_s27 = smov 0  }
  0x1b   :  { %s9787_s28 = smov 0   ;;  %s9789_s29 = smov 0  }
  0x1c   :  { %s9791_s0 = smov 0   ;;  %s9793_s30 = smov 0  }
  0x1d   :  { %s9795_s18 = smov 0   ;;  %s9797_s19 = smov 0  }
  0x1e   :  { %s9799_s1 = smov 0  }
  0x1f LB: > { %11669 = sst [smem:[#allocation31_spill]] %s9627_s27  ;;  %s9835_s20 = sadd.s32 4294967295, %s9655_s1   ;;  %s9655_s1 = sphi %s9799_s1, %s37_s1   ;;  %s9651_s19 = sphi %s9797_s19, %s11758_s19   ;;  %s9647_s18 = sphi %s9795_s18, %s11763_s18   ;;  %s9643_s30 = sphi %s9793_s30, %s11756_s30   ;;  %s9639_s0 = sphi %s9791_s0, %s11762_s0   ;;  %s9635_s29 = sphi %s9789_s29, %s11755_s29   ;;  %s9631_s28 = sphi %s9787_s28, %s11754_s28   ;;  %s9627_s27 = sphi %s9785_s27, %s11753_s27   ;;  %s9623_s26 = sphi %s9783_s26, %s11761_s26   ;;  %s9619_s25 = sphi %s9781_s25, %s11760_s25   ;;  %s9615_s24 = sphi %s9779_s24, %s11759_s24  }
  0x20   : > { %11670 = sst [smem:[#allocation32_spill]] %s9631_s28  ;;  %s7948_s21 = sadd.s32 4294967294, %s9655_s1  }
  0x21   : > { %11671 = sst [smem:[#allocation33_spill]] %s9635_s29  ;;  %p63_p0 = scmp.ne.s32.totalorder %s9635_s29, %s9631_s28 }
  0x22   : > { %11672 = sst [smem:[#allocation34_spill]] %s9639_s0  ;;  %p11617_p1 = scmp.eq.s32.totalorder %s9655_s1, 0 }
  0x23   : > { %11673 = sst [smem:[#allocation35_spill]] %s9643_s30  ;;  %p69_p2 = scmp.ne.s32.totalorder %s9631_s28, %s9627_s27 }
  0x24   : > { %11674 = sst [smem:[#allocation36_spill]] %s9651_s19  ;;  %p11629_p3 = scmp.eq.s32.totalorder %s9835_s20, 0 }
  0x25   : > { %p9848_p4 = por %p11617_p1, %p63_p0  ;;  %p449_p5 = scmp.eq.s32.totalorder %s9835_s20, 7 }
  0x26   : > { %p9855_p6 = por %p11629_p3, %p69_p2  ;;  %p455_p7 = scmp.eq.s32.totalorder %s7948_s21, 7 }
  0x27   : > { %p9859_p8 = por %p449_p5, %p63_p0  ;;  %p7949_p9 = scmp.ge.s32.totalorder %s9655_s1, 1 }
  0x28   : > { %s11676_s30 = scalar_select %p9855_p6, 1, 0 }
  0x29   : > { %s11678_s23 = scalar_select %p9859_p8, 1, 0 }
  0x2a   : > { %11677 = sst [smem:[#allocation37_spill]] %s11676_s30  ;;  %p9864_p10 = por %p455_p7, %p69_p2 }
  0x2b   : > { %11679 = sst [smem:[#allocation38_spill]] %s11678_s23  ;;  %p462_p11 = scmp.lt.s32.totalorder %s9655_s1, 9 }
  0x2c   : > { %s11680_s22 = scalar_select %p9864_p10, 1, 0 }
  0x2d   : > { %p9869_p12 = pnand %p7949_p9, %p462_p11  ;;  %p11628_p13 = scmp.lt.s32.totalorder %s9655_s1, 8 }
  0x2e   : > { %11681 = sst [smem:[#allocation39_spill]] %s11680_s22  ;;  %s569_s21 = sand.u32 1, %s9655_s1  }
  0x2f   : > { %s11682_s27 = scalar_select %p9869_p12, 1, 0 }
  0x30   : > { %p8843_p1 = pneg %p9869_p12  ;;  %s571_s16 = sand.u32 1, %s9635_s29  }
  0x31   : > { %11683 = sst [smem:[#allocation40_spill]] %s11682_s27  ;;  %s7958_s23 = sshll.u32 %s571_s16, 6 }
  0x32   : > { %p9880_p0 = pnand %p8843_p1, %p11629_p3  ;;  %s8132_s9 = sshll.u32 %s9651_s19, 10 }
  0x33   : > { %s11685_s14 = sld [smem:[#allocation45_spill]]  ;;  %s573_s0 = scalar_lea.vmem [#allocation7], %s7958_s23 }
  0x34   : > { %s11684_s15 = scalar_select %p9880_p0, 1, 0 }
  0x35   : > { %s580_s30 = sshll.u32 %s573_s0, 4  ;;  %p9894_p2 = pnand %p11628_p13, %p9848_p4  ;;  %s9898_s30 = int_to_ptr.vmem [resolvable:$true] %s580_s30 }
  0x36   : > { %s9900_s16 = scalar_lea.sflag [#allocation8], %s569_s21 }
  0x37   : > { %p9229_p5 = pneg %p9894_p2 }
  0x39   : > { %s9888_s12 = scalar_lea.hbm %s11685_s14, %s8132_s9  ;;  %s9232_s0 = scalar_lea.hbm %s11685_s14, 2048 }
  0x3a   : > { %s9227_s5 = scalar_lea.hbm %s9888_s12, 1024  ;;  %p9233_p4 = scmp.lt.u32.totalorder %s9888_s12, %s11685_s14 }
  0x3b   : > { %p9228_p1 = scmp.ne.s32.totalorder %s9888_s12, %s9227_s5  ;;  %p9234_p11 = scmp.lt.u32.totalorder %s9232_s0, %s9227_s5 }
  0x3c   : > { %p9236_p3 = scmp.lt.u32.totalorder %s9227_s5, %s9888_s12 }
  0x3d   : > { %p9230_p7 = pnand %p9229_p5, %p9228_p1  ;;  %p9235_p13 = por %p9234_p11, %p9233_p4 }
  0x3f   : > { %p9231_p9 = pneg %p9230_p7  ;;  %p9237_p10 = por %p9236_p3, %p9235_p13 }
  0x41   : > { %p9238_p8 = pnand %p9237_p10, %p9231_p9 }
  0x43   : > { %9241 = shalt.err (!%p9238_p8)
}
  0x44   : > { %s9242_s21 = scalar_lea.vmem %s9898_s30, 1024  ;;  %s9657_s9 = smov [#allocation7]  }
  0x45   : > { %p9243_p1 = scmp.ne.s32.totalorder %s9898_s30, %s9242_s21  ;;  %s9247_s17 = sshll.u32 %s9657_s9, 4  ;;  %s9248_s17 = int_to_ptr.vmem [resolvable:$false] %s9247_s17 }
  0x46   : > { %s9249_s22 = scalar_lea.vmem %s9248_s17, 2048  ;;  %p9250_p12 = scmp.lt.s32.totalorder %s9898_s30, %s9248_s17 }
  0x47   : > { %p9245_p7 = pnand %p9243_p1, %p9229_p5  ;;  %p9251_p4 = scmp.lt.s32.totalorder %s9249_s22, %s9242_s21 }
  0x49   : > { %p9246_p6 = pneg %p9245_p7  ;;  %p9252_p11 = por %p9251_p4, %p9250_p12 }
  0x4b   : > { %p9253_p3 = pnand %p9252_p11, %p9246_p6 }
  0x4d   : > { %9256 = shalt.err (!%p9253_p3)
}
  0x4e   : > { %s11637_s5 = smov 128   ;;  %s11639_s0 = smov 8  }
  0x4f   : > { %8868 = dma.hbm_to_vmem [thread:$0]  (!%p9894_p2), %s9888_s12, 1024, %s9898_s30, %s9900_s16, %s11637_s5, %s11637_s5, %s11639_s0  }
  0x50   : > { %s9660_s23 = smov [#allocation10]   ;;  %s9661_s14 = smov [#allocation13]  }
  0x51   : > { %s478_s9 = sshll.u32 %s9660_s23, 4  ;;  %s500_s17 = sshll.u32 %s9661_s14, 4  ;;  %s479_s9 = int_to_ptr.vmem [resolvable:$true] %s478_s9  ;;  %s9931_s17 = int_to_ptr.vmem [resolvable:$true] %s500_s17 }
  0x52   : > { %s11687_s2 = sld [smem:[#allocation47_spill]]  ;;  %p9941_p8 = pneg %p9880_p0 }
  0x58   : > { %s9257_s27 = scalar_lea.hbm %s11687_s2, 16 }
  0x59   : > { %p9258_p6 = scmp.ne.s32.totalorder %s11687_s2, %s9257_s27  ;;  %p9264_p13 = scmp.lt.u32.totalorder %s9257_s27, %s11687_s2 }
  0x5b   : > { %p9260_p10 = pnand %p9941_p8, %p9258_p6 }
  0x5d   : > { %p9261_p12 = pneg %p9260_p10 }
  0x5f   : > { %p9266_p2 = pnand %p9264_p13, %p9261_p12 }
  0x61   : > { %9269 = shalt.err (!%p9266_p2)
}
  0x62   : > { %s9270_s30 = scalar_lea.vmem %s479_s9, 16  ;;  %s9277_s10 = scalar_lea.vmem %s479_s9, 32 }
  0x63   : > { %p9271_p5 = scmp.ne.s32.totalorder %s479_s9, %s9270_s30  ;;  %p9278_p7 = scmp.lt.s32.totalorder %s479_s9, %s479_s9 }
  0x64   : > { %p9279_p4 = scmp.lt.s32.totalorder %s9277_s10, %s9270_s30 }
  0x65   : > { %p9273_p9 = pnand %p9271_p5, %p9941_p8 }
  0x66   : > { %p9280_p11 = por %p9279_p4, %p9278_p7 }
  0x67   : > { %p9274_p1 = pneg %p9273_p9 }
  0x69   : > { %p9281_p3 = pnand %p9280_p11, %p9274_p1 }
  0x6b   : > { %9284 = shalt.err (!%p9281_p3)
}
  0x6c   : > { %8846 = dma.hbm_to_vmem [thread:$0]  (!%p9880_p0), %s11687_s2, 16, %s479_s9, [#allocation11]  }
  0x6d   : > { %s11689_s4 = sld [smem:[#allocation49_spill]] }
  0x73   : > { %s9285_s22 = scalar_lea.hbm %s11689_s4, 16 }
  0x74   : > { %p9286_p6 = scmp.ne.s32.totalorder %s11689_s4, %s9285_s22  ;;  %p9292_p13 = scmp.lt.u32.totalorder %s9285_s22, %s11689_s4 }
  0x76   : > { %p9288_p10 = pnand %p9286_p6, %p9941_p8 }
  0x78   : > { %p9289_p12 = pneg %p9288_p10 }
  0x7a   : > { %p9294_p2 = pnand %p9292_p13, %p9289_p12 }
  0x7c   : > { %9297 = shalt.err (!%p9294_p2)
}
  0x7d   : > { %s9298_s9 = scalar_lea.vmem %s9931_s17, 16  ;;  %s9305_s13 = scalar_lea.vmem %s9931_s17, 32 }
  0x7e   : > { %p9299_p5 = scmp.ne.s32.totalorder %s9931_s17, %s9298_s9  ;;  %p9306_p7 = scmp.lt.s32.totalorder %s9931_s17, %s9931_s17 }
  0x7f   : > { %p9307_p4 = scmp.lt.s32.totalorder %s9305_s13, %s9298_s9 }
  0x80   : > { %p9301_p9 = pnand %p9299_p5, %p9941_p8 }
  0x81   : > { %p9308_p11 = por %p9307_p4, %p9306_p7 }
  0x82   : > { %p9302_p1 = pneg %p9301_p9 }
  0x84   : > { %p9309_p3 = pnand %p9308_p11, %p9302_p1 }
  0x86   : > { %9312 = shalt.err (!%p9309_p3)
}
  0x87   : > { %8852 = dma.hbm_to_vmem [thread:$0]  (!%p9880_p0), %s11689_s4, 16, %s9931_s17, [#allocation14]  }
  0x88   : > { %s9662_s21 = smov [#allocation16]   ;;  %s11690_s7 = sld [smem:[#allocation52_spill]] }
  0x89   : > { %s524_s22 = sshll.u32 %s9662_s21, 4  ;;  %s525_s22 = int_to_ptr.vmem [resolvable:$true] %s524_s22 }
  0x8e   : > { %s9313_s30 = scalar_lea.hbm %s11690_s7, 512 }
  0x8f   : > { %p9314_p6 = scmp.ne.s32.totalorder %s11690_s7, %s9313_s30  ;;  %p9320_p13 = scmp.lt.u32.totalorder %s9313_s30, %s11690_s7 }
  0x91   : > { %p9316_p10 = pnand %p9314_p6, %p9941_p8 }
  0x93   : > { %p9317_p12 = pneg %p9316_p10 }
  0x95   : > { %p9322_p2 = pnand %p9320_p13, %p9317_p12 }
  0x97   : > { %9325 = shalt.err (!%p9322_p2)
}
  0x98   : > { %s9326_s17 = scalar_lea.vmem %s525_s22, 512  ;;  %p9334_p7 = scmp.lt.s32.totalorder %s525_s22, %s525_s22 }
  0x99   : > { %p9327_p5 = scmp.ne.s32.totalorder %s525_s22, %s9326_s17  ;;  %p9335_p4 = scmp.lt.s32.totalorder %s9326_s17, %s9326_s17 }
  0x9b   : > { %p9329_p9 = pnand %p9327_p5, %p9941_p8  ;;  %p9336_p11 = por %p9335_p4, %p9334_p7 }
  0x9d   : > { %p9330_p1 = pneg %p9329_p9 }
  0x9f   : > { %p9337_p3 = pnand %p9336_p11, %p9330_p1 }
  0xa1   : > { %9340 = shalt.err (!%p9337_p3)
}
  0xa2   : > { %s11691_s23 = smov 128   ;;  %s46_s21 = sadd.s32 1, %s9647_s18 }
  0xa3   : > { %8858 = dma.hbm_to_vmem [thread:$0]  (!%p9880_p0), %s11690_s7, 512, %s525_s22, [#allocation17], %s11691_s23, %s11691_s23, %s11639_s0  }
  0xa4   : > { %p47_p6 = scmp.ge.s32.totalorder %s46_s21, 4  ;;  %s292_s12 = sadd.s32 1, %s9623_s26 }
  0xa5   : > { %p299_p10 = scmp.ne.s32.totalorder %s9623_s26, %s9619_s25  ;;  %p305_p12 = scmp.ne.s32.totalorder %s9619_s25, %s9615_s24 }
  0xa6   : > { %s11765_s21 = smov (%p47_p6, %s46_s21), 0  ;;  %s11693_s14 = sadd.s32 1, %s9651_s19 }
  0xa7   : > { %11692 = sst [smem:[#allocation41_spill]] %s11765_s21  ;;  %s11767_s14 = smov (!%p47_p6, %s11693_s14), %s9651_s19 }
  0xa8   : > { %s289_s30 = ssub.s32 %s9647_s18, %s11765_s21  ;;  %p11694_p13 = scmp.eq.s32.totalorder %s9655_s1, 0 }
  0xa9   : > { %p51_p5 = scmp.ge.s32.totalorder %s11767_s14, 2  ;;  %p290_p9 = scmp.eq.s32.totalorder %s289_s30, 0 }
  0xaa   : > { %p10017_p2 = por %p299_p10, %p11694_p13  ;;  %p11696_p1 = scmp.eq.s32.totalorder %s9835_s20, 0 }
  0xab   : > { %s592_s22 = sand.u32 1, %s9623_s26   ;;  %s11769_s14 = smov (%p51_p5, %s11767_s14), 0 }
  0xac   : > { %p10023_p7 = por %p305_p12, %p11696_p1  ;;  %11698 = sst [smem:[#allocation42_spill]] %s11769_s14 }
  0xad   : > { %s10031_s9 = scalar_select %p290_p9, %s9623_s26, %s292_s12  }
  0xae   : > { %s11697_s24 = scalar_select %p10023_p7, 1, 0 }
  0xaf   : > { %11699 = sst [smem:[#allocation43_spill]] %s10031_s9  ;;  %s53_s13 = ssub.s32 %s9651_s19, %s11769_s14 }
  0xb0   : > { %s10035_s17 = sshll.u32 %s592_s22, 5  ;;  %p54_p4 = scmp.eq.s32.totalorder %s53_s13, 0 }
  0xb1   : > { %s11642_s5 = sshll.u32 %s9647_s18, 9  ;;  %s594_s27 = scalar_lea.vmem [#allocation21], %s10035_s17 }
  0xb2   : > { %s601_s0 = sshll.u32 %s594_s27, 4  ;;  %s11700_s30 = sadd.s32 1, %s9635_s29  ;;  %s10051_s0 = int_to_ptr.vmem [resolvable:$true] %s601_s0 }
  0xb3   : > { %s10042_s2 = scalar_select %p54_p4, %s9635_s29, %s11700_s30  }
  0xb4   : > { %s11702_s11 = sld [smem:[#allocation55_spill]]  ;;  %p11703_p11 = scmp.lt.s32.totalorder %s9655_s1, 8 }
  0xb5   : > { %11701 = sst [smem:[#allocation44_spill]] %s10042_s2  ;;  %s9663_s22 = smov [#allocation12]  }
  0xb6   : > { %p10057_p3 = pnand %p11703_p11, %p10017_p2  ;;  %s489_s13 = sshll.u32 %s9663_s22, 4  ;;  %s10061_s13 = int_to_ptr.vmem [resolvable:$true] %s489_s13 }
  0xb8   : > { %s11704_s12 = scalar_select %p10057_p3, 1, 0 }
  0xb9   : > { %p11648_p10 = pneg %p10057_p3 }
  0xba   : > { %s10049_s21 = scalar_lea.hbm %s11702_s11, %s11642_s5  ;;  %s9346_s27 = scalar_lea.hbm %s11702_s11, 2048 }
  0xbb   : > { %s9341_s4 = scalar_lea.hbm %s10049_s21, 512  ;;  %p9347_p2 = scmp.lt.u32.totalorder %s10049_s21, %s11702_s11 }
  0xbc   : > { %p9342_p6 = scmp.ne.s32.totalorder %s10049_s21, %s9341_s4  ;;  %p9348_p5 = scmp.lt.u32.totalorder %s9346_s27, %s9341_s4 }
  0xbd   : > { %p9350_p1 = scmp.lt.u32.totalorder %s9341_s4, %s10049_s21 }
  0xbe   : > { %p9344_p12 = pnand %p11648_p10, %p9342_p6  ;;  %p9349_p9 = por %p9348_p5, %p9347_p2 }
  0xc0   : > { %p9345_p13 = pneg %p9344_p12  ;;  %p9351_p4 = por %p9350_p1, %p9349_p9 }
  0xc2   : > { %p9352_p11 = pnand %p9351_p4, %p9345_p13 }
  0xc4   : > { %9355 = shalt.err (!%p9352_p11)
}
  0xc5   : > { %s9356_s22 = scalar_lea.vmem %s10051_s0, 512  ;;  %s9664_s7 = smov [#allocation21]  }
  0xc6   : > { %p9357_p6 = scmp.ne.s32.totalorder %s10051_s0, %s9356_s22  ;;  %s9361_s10 = sshll.u32 %s9664_s7, 4  ;;  %s9362_s10 = int_to_ptr.vmem [resolvable:$false] %s9361_s10 }
  0xc7   : > { %s9363_s5 = scalar_lea.vmem %s9362_s10, 1024  ;;  %p9364_p0 = scmp.lt.s32.totalorder %s10051_s0, %s9362_s10 }
  0xc8   : > { %p9359_p12 = pnand %p9357_p6, %p11648_p10  ;;  %p9365_p2 = scmp.lt.s32.totalorder %s9363_s5, %s9356_s22 }
  0xca   : > { %p9360_p7 = pneg %p9359_p12  ;;  %p9366_p5 = por %p9365_p2, %p9364_p0 }
  0xcc   : > { %p9367_p9 = pnand %p9366_p5, %p9360_p7 }
  0xce   : > { %9370 = shalt.err (!%p9367_p9)
}
  0xcf   : > { %s11705_s4 = smov 8   ;;  %s11706_s3 = sld [smem:[#allocation48_spill]] }
  0xd0   : > { %8871 = dma.hbm_to_vmem [thread:$0]  (!%p10057_p3), %s10049_s21, 512, %s10051_s0, %s9900_s16, %s11691_s23, %s11691_s23, %s11705_s4  }
  0xd5   : > { %s9371_s7 = scalar_lea.hbm %s11706_s3, 16 }
  0xd6   : > { %p9372_p0 = scmp.ne.s32.totalorder %s11706_s3, %s9371_s7  ;;  %p9378_p1 = scmp.lt.u32.totalorder %s9371_s7, %s11706_s3 }
  0xd8   : > { %p9374_p7 = pnand %p9372_p0, %p9941_p8 }
  0xda   : > { %p9375_p13 = pneg %p9374_p7 }
  0xdc   : > { %p9380_p4 = pnand %p9378_p1, %p9375_p13 }
  0xde   : > { %9383 = shalt.err (!%p9380_p4)
}
  0xdf   : > { %s9384_s0 = scalar_lea.vmem %s10061_s13, 16  ;;  %s9391_s11 = scalar_lea.vmem %s10061_s13, 32 }
  0xe0   : > { %p9385_p11 = scmp.ne.s32.totalorder %s10061_s13, %s9384_s0  ;;  %p9392_p2 = scmp.lt.s32.totalorder %s10061_s13, %s10061_s13 }
  0xe1   : > { %p9393_p5 = scmp.lt.s32.totalorder %s9391_s11, %s9384_s0 }
  0xe2   : > { %p9387_p6 = pnand %p9385_p11, %p9941_p8 }
  0xe3   : > { %p9394_p9 = por %p9393_p5, %p9392_p2 }
  0xe4   : > { %p9388_p12 = pneg %p9387_p6 }
  0xe6   : > { %p9395_p0 = pnand %p9394_p9, %p9388_p12 }
  0xe8   : > { %9398 = shalt.err (!%p9395_p0)
}
  0xe9   : > { %p11707_p7 = scmp.ne.s32.totalorder %s11684_s15, 0  ;;  %s9665_s30 = smov [#allocation15]  }
  0xea   : > { %s514_s7 = sshll.u32 %s9665_s30, 4  ;;  %s9666_s10 = smov [#allocation18]   ;;  %s515_s7 = int_to_ptr.vmem [resolvable:$true] %s514_s7 }
  0xeb   : > { %8849 = dma.hbm_to_vmem [thread:$0]  (!%p11707_p7), %s11706_s3, 16, %s10061_s13, [#allocation11]  }
  0xec   : > { %s538_s22 = sshll.u32 %s9666_s10, 4  ;;  %s11708_s6 = sld [smem:[#allocation51_spill]]  ;;  %s539_s22 = int_to_ptr.vmem [resolvable:$true] %s538_s22 }
  0xf2   : > { %s9399_s0 = scalar_lea.hbm %s11708_s6, 16 }
  0xf3   : > { %p9400_p13 = scmp.ne.s32.totalorder %s11708_s6, %s9399_s0  ;;  %p9406_p11 = scmp.lt.u32.totalorder %s9399_s0, %s11708_s6 }
  0xf5   : > { %p9402_p1 = pnand %p9400_p13, %p9941_p8 }
  0xf7   : > { %p9403_p4 = pneg %p9402_p1 }
  0xf9   : > { %p9408_p6 = pnand %p9406_p11, %p9403_p4 }
  0xfb   : > { %9411 = shalt.err (!%p9408_p6)
}
  0xfc   : > { %s9412_s13 = scalar_lea.vmem %s515_s7, 16  ;;  %s9419_s14 = scalar_lea.vmem %s515_s7, 32 }
  0xfd   : > { %p9413_p12 = scmp.ne.s32.totalorder %s515_s7, %s9412_s13  ;;  %p9420_p9 = scmp.lt.s32.totalorder %s515_s7, %s515_s7 }
  0xfe   : > { %p9421_p0 = scmp.lt.s32.totalorder %s9419_s14, %s9412_s13 }
  0xff   : > { %p9415_p2 = pnand %p9413_p12, %p9941_p8 }
 0x100   : > { %p9422_p10 = por %p9421_p0, %p9420_p9 }
 0x101   : > { %p9416_p5 = pneg %p9415_p2 }
 0x103   : > { %p9423_p3 = pnand %p9422_p10, %p9416_p5 }
 0x105   : > { %9426 = shalt.err (!%p9423_p3)
}
 0x106   : > { %8855 = dma.hbm_to_vmem [thread:$0]  (!%p11707_p7), %s11708_s6, 16, %s515_s7, [#allocation14]  }
 0x107   : > { %s9427_s10 = scalar_lea.hbm %s11604_s8, 16 }
 0x108   : > { %p9428_p13 = scmp.ne.s32.totalorder %s11604_s8, %s9427_s10  ;;  %p9434_p3 = scmp.lt.u32.totalorder %s9427_s10, %s11604_s8 }
 0x10a   : > { %p9430_p1 = pnand %p9428_p13, %p9941_p8 }
 0x10c   : > { %p9431_p10 = pneg %p9430_p1 }
 0x10e   : > { %p9436_p4 = pnand %p9434_p3, %p9431_p10 }
 0x110   : > { %9439 = shalt.err (!%p9436_p4)
}
 0x111   : > { %s9440_s13 = scalar_lea.vmem %s539_s22, 16  ;;  %s9447_s7 = scalar_lea.vmem %s539_s22, 32 }
 0x112   : > { %p9441_p11 = scmp.ne.s32.totalorder %s539_s22, %s9440_s13  ;;  %p9448_p2 = scmp.lt.s32.totalorder %s539_s22, %s539_s22 }
 0x113   : > { %p9449_p5 = scmp.lt.s32.totalorder %s9447_s7, %s9440_s13 }
 0x114   : > { %p9443_p6 = pnand %p9441_p11, %p9941_p8 }
 0x115   : > { %p9450_p9 = por %p9449_p5, %p9448_p2 }
 0x116   : > { %p9444_p12 = pneg %p9443_p6 }
 0x118   : > { %p9451_p0 = pnand %p9450_p9, %p9444_p12 }
 0x11a   : > { %9454 = shalt.err (!%p9451_p0)
}
 0x11b   : > { %8861 = dma.hbm_to_vmem [thread:$0]  (!%p11707_p7), %s11604_s8, 16, %s539_s22, [#allocation17]  }
 0x11c   : > { %s9667_s27 = smov [#allocation19]   ;;  %s11709_s30 = sshll.u32 %s9647_s18, 9 }
 0x11d   : > { %s552_s2 = sshll.u32 %s9667_s27, 4  ;;  %s11710_s0 = sld [smem:[#allocation57_spill]]  ;;  %s553_s2 = int_to_ptr.vmem [resolvable:$true] %s552_s2 }
 0x11e   : > { %s11712_s3 = sld [smem:[#allocation54_spill]] }
 0x123   : > { %s11711_s11 = smov %s11710_s0  ;;  %s10157_s21 = scalar_lea.hbm %s11710_s0, %s11709_s30 }
 0x124   : > { %s9455_s6 = scalar_lea.hbm %s11712_s3, 16 }
 0x125   : > { %p9456_p13 = scmp.ne.s32.totalorder %s11712_s3, %s9455_s6  ;;  %p9462_p3 = scmp.lt.u32.totalorder %s9455_s6, %s11712_s3 }
 0x127   : > { %p9458_p1 = pnand %p9456_p13, %p9941_p8 }
 0x129   : > { %p9459_p10 = pneg %p9458_p1 }
 0x12b   : > { %p9464_p4 = pnand %p9462_p3, %p9459_p10 }
 0x12d   : > { %9467 = shalt.err (!%p9464_p4)
}
 0x12e   : > { %s9468_s19 = scalar_lea.vmem %s553_s2, 16  ;;  %s9475_s27 = scalar_lea.vmem %s553_s2, 32 }
 0x12f   : > { %p9469_p11 = scmp.ne.s32.totalorder %s553_s2, %s9468_s19  ;;  %p9476_p2 = scmp.lt.s32.totalorder %s553_s2, %s553_s2 }
 0x130   : > { %p9477_p5 = scmp.lt.s32.totalorder %s9475_s27, %s9468_s19 }
 0x131   : > { %p9471_p6 = pnand %p9469_p11, %p9941_p8 }
 0x132   : > { %p9478_p9 = por %p9477_p5, %p9476_p2 }
 0x133   : > { %p9472_p12 = pneg %p9471_p6 }
 0x135   : > { %p9479_p0 = pnand %p9478_p9, %p9472_p12 }
 0x137   : > { %9482 = shalt.err (!%p9479_p0)
}
 0x138   : > { %8864 = dma.hbm_to_vmem [thread:$0]  (!%p11707_p7), %s11712_s3, 16, %s553_s2, [#allocation20]  }
 0x139   : > { %s621_s6 = scalar_lea.vmem [#allocation22], %s10035_s17  ;;  %s9483_s30 = scalar_lea.hbm %s10157_s21, 512 }
 0x13a   : > { %s628_s28 = sshll.u32 %s621_s6, 4  ;;  %p9484_p8 = scmp.ne.s32.totalorder %s10157_s21, %s9483_s30  ;;  %s10178_s28 = int_to_ptr.vmem [resolvable:$true] %s628_s28 }
 0x13b   : > { %p11713_p13 = scmp.ne.s32.totalorder %s11704_s12, 0  ;;  %s9488_s5 = scalar_lea.hbm %s11711_s11, 2048 }
 0x13c   : > { %p9489_p4 = scmp.lt.u32.totalorder %s10157_s21, %s11711_s11  ;;  %p9490_p11 = scmp.lt.u32.totalorder %s9488_s5, %s9483_s30 }
 0x13d   : > { %p11714_p1 = pneg %p11713_p13  ;;  %p9492_p6 = scmp.lt.u32.totalorder %s9483_s30, %s10157_s21 }
 0x13e   : > { %p9491_p7 = por %p9490_p11, %p9489_p4 }
 0x13f   : > { %p9486_p10 = pnand %p9484_p8, %p11714_p1 }
 0x140   : > { %p9493_p12 = por %p9492_p6, %p9491_p7 }
 0x141   : > { %p9487_p3 = pneg %p9486_p10 }
 0x143   : > { %p9494_p2 = pnand %p9493_p12, %p9487_p3 }
 0x145   : > { %9497 = shalt.err (!%p9494_p2)
}
 0x146   : > { %s9498_s17 = scalar_lea.vmem %s10178_s28, 512  ;;  %p11715_p9 = pmov %p11714_p1 }
 0x147   : > { %p9499_p5 = scmp.ne.s32.totalorder %s10178_s28, %s9498_s17  ;;  %s9668_s2 = smov [#allocation22]  }
 0x148   : > { %s9503_s7 = sshll.u32 %s9668_s2, 4  ;;  %s9504_s7 = int_to_ptr.vmem [resolvable:$false] %s9503_s7 }
 0x149   : > { %p9501_p0 = pnand %p9499_p5, %p11715_p9  ;;  %s9505_s22 = scalar_lea.vmem %s9504_s7, 1024 }
 0x14a   : > { %p9506_p1 = scmp.lt.s32.totalorder %s10178_s28, %s9504_s7  ;;  %p9507_p10 = scmp.lt.s32.totalorder %s9505_s22, %s9498_s17 }
 0x14b   : > { %p9502_p8 = pneg %p9501_p0 }
 0x14c   : > { %p9508_p4 = por %p9507_p10, %p9506_p1 }
 0x14e   : > { %p9509_p11 = pnand %p9508_p4, %p9502_p8 }
 0x150   : > { %9512 = shalt.err (!%p9509_p11)
}
 0x151   : > { %8874 = dma.hbm_to_vmem [thread:$0]  (!%p11713_p13), %s10157_s21, 512, %s10178_s28, %s9900_s16, %s11691_s23, %s11691_s23, %s11705_s4  }
 0x152   : > { %s11716_s14 = sld [smem:[#allocation40_spill]] }
 0x158   : > { %p11717_p3 = scmp.ne.s32.totalorder %s11716_s14, 0 }
 0x159   : > { %s11718_s19 = sld [smem:[#allocation32_spill]] (!%p11717_p3)  ;;  %s11719_s27 = sld [smem:[#allocation37_spill]] (!%p11717_p3) }
 0x15a   : > { %646 = sbr.rel (%p11717_p3) target bundleno = 5911 (0x1717), region = 88  ;;  %s648_s29 = sand.u32 (!%p11717_p3), 1, %s9835_s20  }
 0x15b   : > { %s649_s30 = scalar_lea.sflag (!%p11717_p3), [#allocation8], %s648_s29 }
 0x15f   : > { %s10211_s9 = sand.u32 (!%p11717_p3), 1, %s11718_s19   ;;  %p11720_p7 = scmp.ne.s32.totalorder (!%p11717_p3), %s11719_s27, 0 }
 0x160   : > { %s7968_s6 = sshll.u32 (!%p11717_p3), %s10211_s9, 6 }
 0x161   : > { %s10214_s12 = scalar_lea.vmem [#allocation7], %s7968_s6 }
 0x162   : > { %9586 = dma.done.wait (%p11720_p7), %s649_s30, 1024  }
 0x163   : > { %9588 = vsyncadd (%p11720_p7), %s649_s30, 4294966272  ;;  %p11721_p13 = scmp.eq.s32.totalorder %s9835_s20, 0 }
 0x165   : > { %9590 = dma.done.wait (%p11721_p13), [#allocation11], 32   ;;  %p11722_p6 = pmov %p11721_p13 }
 0x167   : > { %9592 = vsyncadd (%p11722_p6), [#allocation11], 4294967264  ;;  %p11723_p12 = pmov %p11722_p6 }
 0x168   : > { %p11724_p2 = pmov %p11722_p6 }
 0x169   : > { %9594 = dma.done.wait (%p11723_p12), [#allocation14], 32  }
 0x16a   : > { %9596 = vsyncadd (%p11724_p2), [#allocation14], 4294967264  ;;  %p11725_p5 = pmov %p11724_p2 }
 0x16b   : > { %p11726_p9 = pmov %p11724_p2 }
 0x16c   : > { %9598 = dma.done.wait (%p11725_p5), [#allocation17], 528  }
 0x16d   : > { %9600 = vsyncadd (%p11726_p9), [#allocation17], 4294966768  ;;  %p11727_p0 = pmov %p11724_p2 }
 0x16f   : > { %9602 = dma.done.wait (%p11727_p0), [#allocation20], 16   ;;  %p11728_p8 = pmov %p11727_p0 }
 0x170   : > { %s687_s16 = sand.u32 1, %s9619_s25   ;;  %p11729_p1 = scmp.ne.s32.totalorder %s11697_s24, 0 }
 0x171   : > { %9604 = vsyncadd (%p11728_p8), [#allocation20], 4294967280  ;;  %s7976_s23 = sshll.u32 %s687_s16, 5 }
 0x172   : > { %s10237_s4 = scalar_lea.vmem [#allocation21], %s7976_s23 }
 0x173   : > { %9606 = dma.done.wait (%p11729_p1), %s649_s30, 1024  }
 0x174   : > { %9608 = vsyncadd (%p11729_p1), %s649_s30, 4294966272  ;;  %s11730_s21 = sld [smem:[#allocation34_spill]]  ;;  %s7978_s28 = sshll.u32 %s10211_s9, 3 }
 0x175   : > { %s11731_s5 = sld [smem:[#allocation56_spill]]  ;;  %s11732_s2 = sld [smem:[#allocation58_spill]] }
 0x176   : > { %s10256_s22 = scalar_lea.vmem [#allocation22], %s7976_s23  ;;  %s10258_s24 = scalar_lea.vmem [#allocation23], %s7978_s28 }
 0x17a   : > { %p766_p10 = scmp.lt.s32.totalorder %s11730_s21, 3  ;;  %p7979_p4 = scmp.ne.s32.totalorder %s11730_s21, 0 }
 0x17b   : > { %v776_v0 = vld [vmem:[%s10214_s12] sm:$0xff] (!%p7979_p4)  ;;  %vm786_vm0 = vcmask (!%p7979_p4), 261120   ;;  %v778_v1 = vld [vmem:[%s10214_s12 + $0x10] sm:$0xff] (!%p7979_p4)  ;;  %v777_v2 = vld [vmem:[%s10214_s12 + $0x8] sm:$0xff] (!%p7979_p4)  ;;  %s11733_s27 = sld [smem:[#allocation50_spill]] (!%p7979_p4)  ;;  %vm9670_vm1 = vmmov (!%p7979_p4), 0  }
 0x17c   : > { %s10246_s15 = scalar_select %p766_p10, %s11730_s21, 3 }
 0x17d   : > { %775 = sbr.rel (%p7979_p4) target bundleno = 4925 (0x133d), region = 132  ;;  %v787_v3 = vsel (!%p7979_p4), %vm786_vm0, %v776_v0, 0.0  ;;  %v793_v4 = vsel (!%p7979_p4), %vm786_vm0, %v778_v1, 0.0  ;;  %v779_v5 = vld [vmem:[%s10214_s12 + $0x18] sm:$0xff] (!%p7979_p4)  ;;  %v790_v6 = vsel (!%p7979_p4), %vm786_vm0, %v777_v2, 0.0  ;;  %v780_v8 = vld [vmem:[%s10214_s12 + $0x20] sm:$0xff] (!%p7979_p4) }
 0x17e   : > { %s768_s0 = scalar_lea.vmem %s11731_s5, %s10246_s15  ;;  %s771_s7 = scalar_lea.vmem %s11732_s2, %s10246_s15  ;;  %788 = vadd.xlane.f32.xlu0 (!%p7979_p4), %v787_v3  ;;  %794 = vadd.xlane.f32.xlu1 (!%p7979_p4), %v793_v4  ;;  %v796_v7 = vsel (!%p7979_p4), %vm786_vm0, %v779_v5, 0.0  ;;  %v781_v9 = vld [vmem:[%s10214_s12 + $0x28] sm:$0xff] (!%p7979_p4)  ;;  %v799_v10 = vsel (!%p7979_p4), %vm786_vm0, %v780_v8, 0.0  ;;  %v782_v12 = vld [vmem:[%s10214_s12 + $0x30] sm:$0xff] (!%p7979_p4)  ;;  %v783_v13 = vld [vmem:[%s10214_s12 + $0x38] sm:$0xff] (!%p7979_p4)  ;;  %vm1063_vm2 = vcmask (!%p7979_p4), 64512  }
 0x17f   : > { %v802_v11 = vsel (!%p7979_p4), %vm786_vm0, %v781_v9, 0.0  ;;  %v805_v14 = vsel (!%p7979_p4), %vm786_vm0, %v782_v12, 0.0  ;;  %v808_v15 = vsel (!%p7979_p4), %vm786_vm0, %v783_v13, 0.0  ;;  %s11735_s5 = sld [smem:[#allocation46_spill]] (!%p7979_p4)  ;;  %s9671_s13 = smov (!%p7979_p4), 96   ;;  %vm3749_vm3 = vcmask (!%p7979_p4), 130112  }
 0x180   : > { %s9672_s17 = smov (!%p7979_p4), 64   ;;  %s9673_s2 = smov (!%p7979_p4), 88   ;;  %vm5118_vm4 = vcmask (!%p7979_p4), 195712   ;;  %vm6487_vm5 = vcmask (!%p7979_p4), 261312   ;;  %vm6942_vm6 = vcmask (!%p7979_p4), 31744  }
 0x181   : > { %s11734_s6 = smov (!%p7979_p4), %s11733_s27  ;;  %v920_v56 = vld [vmem:[%s11733_s27] sm:$0xff] (!%p7979_p4)  ;;  %s9674_s14 = smov (!%p7979_p4), 120  }
 0x182   : > { %791 = vadd.xlane.f32.xlu0 (!%p7979_p4), %v790_v6  ;;  %797 = vadd.xlane.f32.xlu1 (!%p7979_p4), %v796_v7  ;;  %v921_v57 = vld [vmem:[%s11734_s6 + $0x8] sm:$0xff] (!%p7979_p4)  ;;  %v922_v59 = vld [vmem:[%s11734_s6 + $0x10] sm:$0xff] (!%p7979_p4)  ;;  %v923_v60 = vld [vmem:[%s11734_s6 + $0x18] sm:$0xff] (!%p7979_p4)  ;;  %s9675_s19 = smov (!%p7979_p4), 56   ;;  %s9676_s27 = smov (!%p7979_p4), 80  }
 0x183   : > { %v8759_v58 = vpack.c.bf16 (!%p7979_p4), %v921_v57, %v920_v56  ;;  %v8763_v61 = vpack.c.bf16 (!%p7979_p4), %v923_v60, %v922_v59  ;;  %s9677_s29 = smov (!%p7979_p4), 112   ;;  %s9678_s30 = smov (!%p7979_p4), 48  }
 0x184   : > { %s9679_s16 = smov 72   ;;  %s9680_s23 = smov 104  }
 0x185   : > { %8760 = vmatprep.subr.bf16.mxu0 %v8759_v58  ;;  %s9681_s21 = smov 40   ;;  %s9682_s28 = smov 8  }
 0x186   : > { %800 = vadd.xlane.f32.xlu0 %v799_v10  ;;  %803 = vadd.xlane.f32.xlu1 %v802_v11  ;;  %s9683_s20 = smov 16   ;;  %s9684_s10 = smov 24  }
 0x187   : > { %8762 = vmatpush3.bf16.msra.mxu0 %v8759_v58 }
 0x188   : > { %8764 = vmatprep.subr.bf16.mxu0 %v8763_v61 }
 0x18a   : > { %806 = vadd.xlane.f32.xlu0 %v805_v14  ;;  %809 = vadd.xlane.f32.xlu1 %v808_v15 }
 0x18b   : > { %8766 = vmatpush3.bf16.msra.mxu0 %v8763_v61 }
 0x20b   : > { %v789_v16 = vpop.xlane.xlu0 %788  ;;  %v795_v17 = vpop.xlane.xlu1 %794 }
 0x20c   : > { %v812_v18 = vmul.f32 0.03125, %v789_v16  ;;  %v814_v19 = vmul.f32 0.03125, %v795_v17 }
 0x20e   : > { %v10277_v20 = vsub.f32 %v776_v0, %v812_v18  ;;  %v10279_v21 = vsub.f32 %v778_v1, %v814_v19 }
 0x20f   : > { %v792_v22 = vpop.xlane.xlu0 %791  ;;  %v798_v23 = vpop.xlane.xlu1 %797 }
 0x210   : > { %v813_v24 = vmul.f32 0.03125, %v792_v22  ;;  %v815_v25 = vmul.f32 0.03125, %v798_v23  ;;  %v828_v26 = vmul.f32 %v10277_v20, %v10277_v20  ;;  %v830_v27 = vmul.f32 %v10279_v21, %v10279_v21  ;;  %v7980_v22 = vld [vmem:[%s11735_s5] ss:$0 sm:$0xff] }
 0x212   : > { %v10285_v28 = vsub.f32 %v777_v2, %v813_v24  ;;  %v10287_v29 = vsub.f32 %v779_v5, %v815_v25  ;;  %v836_v30 = vsel %vm786_vm0, %v828_v26, 0.0  ;;  %v842_v33 = vsel %vm786_vm0, %v830_v27, 0.0  ;;  %v7981_v26 = vld [vmem:[#allocation10] ss:$0 sm:$0xff] }
 0x213   : > { %837 = vadd.xlane.f32.xlu0 %v836_v30  ;;  %v801_v31 = vpop.xlane.xlu0 %800  ;;  %v804_v32 = vpop.xlane.xlu1 %803 }
 0x214   : > { %v816_v34 = vmul.f32 0.03125, %v801_v31  ;;  %v817_v35 = vmul.f32 0.03125, %v804_v32  ;;  %v829_v36 = vmul.f32 %v10285_v28, %v10285_v28  ;;  %v831_v37 = vmul.f32 %v10287_v29, %v10287_v29 }
 0x216   : > { %v10295_v38 = vsub.f32 %v780_v8, %v816_v34  ;;  %v10297_v39 = vsub.f32 %v781_v9, %v817_v35  ;;  %v839_v40 = vsel %vm786_vm0, %v829_v36, 0.0  ;;  %v845_v43 = vsel %vm786_vm0, %v831_v37, 0.0 }
 0x217   : > { %843 = vadd.xlane.f32.xlu0 %v842_v33  ;;  %840 = vadd.xlane.f32.xlu1 %v839_v40  ;;  %v807_v41 = vpop.xlane.xlu0 %806  ;;  %v810_v42 = vpop.xlane.xlu1 %809 }
 0x218   : > { %v818_v44 = vmul.f32 0.03125, %v807_v41  ;;  %v819_v45 = vmul.f32 0.03125, %v810_v42  ;;  %v832_v46 = vmul.f32 %v10295_v38, %v10295_v38  ;;  %v833_v47 = vmul.f32 %v10297_v39, %v10297_v39 }
 0x21a   : > { %v10305_v48 = vsub.f32 %v782_v12, %v818_v44  ;;  %v10307_v49 = vsub.f32 %v783_v13, %v819_v45  ;;  %v848_v50 = vsel %vm786_vm0, %v832_v46, 0.0  ;;  %v851_v51 = vsel %vm786_vm0, %v833_v47, 0.0 }
 0x21b   : > { %846 = vadd.xlane.f32.xlu1 %v845_v43  ;;  %849 = vadd.xlane.f32.xlu0 %v848_v50 }
 0x21c   : > { %v834_v52 = vmul.f32 %v10305_v48, %v10305_v48  ;;  %v835_v53 = vmul.f32 %v10307_v49, %v10307_v49 }
 0x21e   : > { %v854_v54 = vsel %vm786_vm0, %v834_v52, 0.0  ;;  %v857_v55 = vsel %vm786_vm0, %v835_v53, 0.0 }
 0x21f   : > { %852 = vadd.xlane.f32.xlu1 %v851_v51  ;;  %855 = vadd.xlane.f32.xlu0 %v854_v54 }
 0x223   : > { %858 = vadd.xlane.f32.xlu1 %v857_v55 }
 0x2a0   : > { %v838_v62 = vpop.xlane.xlu0 %837 }
 0x2a1   : > { %v860_v63 = vmul.f32 0.03125, %v838_v62 }
 0x2a3   : > { %v868_v0 = vadd.f32 1e-05, %v860_v63 }
 0x2a4   : > { %v841_v1 = vpop.xlane.xlu1 %840  ;;  %v844_v2 = vpop.xlane.xlu0 %843 }
 0x2a5   : > { %9011 = vrsqrt.f32 %v868_v0  ;;  %v861_v3 = vmul.f32 0.03125, %v841_v1  ;;  %v862_v4 = vmul.f32 0.03125, %v844_v2 }
 0x2a7   : > { %v869_v5 = vadd.f32 1e-05, %v861_v3  ;;  %v870_v6 = vadd.f32 1e-05, %v862_v4 }
 0x2a8   : > { %v847_v7 = vpop.xlane.xlu1 %846  ;;  %v850_v8 = vpop.xlane.xlu0 %849 }
 0x2a9   : > { %9013 = vrsqrt.f32 %v869_v5  ;;  %v863_v9 = vmul.f32 0.03125, %v847_v7  ;;  %v864_v10 = vmul.f32 0.03125, %v850_v8 }
 0x2aa   : > { %9015 = vrsqrt.f32 %v870_v6 }
 0x2ab   : > { %v871_v11 = vadd.f32 1e-05, %v863_v9  ;;  %v872_v12 = vadd.f32 1e-05, %v864_v10 }
 0x2ac   : > { %v853_v13 = vpop.xlane.xlu1 %852  ;;  %v856_v14 = vpop.xlane.xlu0 %855 }
 0x2ad   : > { %9017 = vrsqrt.f32 %v871_v11  ;;  %v865_v15 = vmul.f32 0.03125, %v853_v13  ;;  %v866_v16 = vmul.f32 0.03125, %v856_v14 }
 0x2ae   : > { %9019 = vrsqrt.f32 %v872_v12 }
 0x2af   : > { %v9012_v17 = vpop.eup %9011  ;;  %v873_v18 = vadd.f32 1e-05, %v865_v15  ;;  %v874_v19 = vadd.f32 1e-05, %v866_v16 }
 0x2b0   : > { %v859_v23 = vpop.xlane.xlu1 %858  ;;  %v884_v24 = vmul.f32 %v9012_v17, %v10277_v20 }
 0x2b1   : > { %9021 = vrsqrt.f32 %v873_v18  ;;  %v867_v25 = vmul.f32 0.03125, %v859_v23 }
 0x2b2   : > { %9023 = vrsqrt.f32 %v874_v19  ;;  %v898_v27 = vmul.f32 %v7980_v22, %v884_v24 }
 0x2b3   : > { %v9014_v30 = vpop.eup %9013  ;;  %v875_v31 = vadd.f32 1e-05, %v867_v25 }
 0x2b4   : > { %v9016_v32 = vpop.eup %9015  ;;  %v912_v33 = vadd.f32 %v7981_v26, %v898_v27  ;;  %v885_v34 = vmul.f32 %v9014_v30, %v10285_v28 }
 0x2b5   : > { %9025 = vrsqrt.f32 %v875_v31  ;;  %v886_v35 = vmul.f32 %v9016_v32, %v10279_v21 }
 0x2b6   : > { %8336 = vmatprep.mubr.msk.f32.mxu0 %vm786_vm0, %v912_v33  ;;  %v899_v36 = vmul.f32 %v7980_v22, %v885_v34 }
 0x2b7   : > { %v9018_v37 = vpop.eup %9017  ;;  %v900_v40 = vmul.f32 %v7980_v22, %v886_v35 }
 0x2b8   : > { %v9020_v20 = vpop.eup %9019  ;;  %v913_v41 = vadd.f32 %v7981_v26, %v899_v36  ;;  %v887_v42 = vmul.f32 %v9018_v37, %v10287_v29 }
 0x2b9   : > { %v914_v43 = vadd.f32 %v7981_v26, %v900_v40  ;;  %v888_v44 = vmul.f32 %v9020_v20, %v10295_v38 }
 0x2ba   : > { %8337 = vmatmul.mubr.msk.f32.vlgmr.msra.gmra.mrb[0].mxu0 %vm786_vm0, %v913_v41  ;;  %v901_v45 = vmul.f32 %v7980_v22, %v887_v42 }
 0x2bb   : > { %v9022_v46 = vpop.eup %9021  ;;  %8339 = vmatprep.mubr.msk.f32.mxu0 %vm786_vm0, %v914_v43  ;;  %v902_v28 = vmul.f32 %v7980_v22, %v888_v44 }
 0x2bc   : > { %v9024_v21 = vpop.eup %9023  ;;  %v915_v47 = vadd.f32 %v7981_v26, %v901_v45  ;;  %v889_v50 = vmul.f32 %v9022_v46, %v10297_v39 }
 0x2bd   : > { %v916_v51 = vadd.f32 %v7981_v26, %v902_v28  ;;  %v890_v52 = vmul.f32 %v9024_v21, %v10305_v48  ;;  %v9669_v48 = vmov 0.0  }
 0x2be   : > { %8340 = vmatmul.mubr.msk.f32.gmra.mrb[2].mxu0 %vm786_vm0, %v915_v47  ;;  %v903_v29 = vmul.f32 %v7980_v22, %v889_v50  ;;  %8348 = vmatprep.subr.mxu1 %v9669_v48  ;;  %7095 = vst.msk [vmem:[#allocation5] sm:$0xff] %vm786_vm0, %v9669_v48  ;;  %7096 = vst.msk [vmem:[#allocation5 + $0x8] sm:$0xff] %vm786_vm0, %v9669_v48 }
 0x2bf   : > { %v9026_v53 = vpop.eup %9025  ;;  %8342 = vmatprep.mubr.msk.f32.mxu0 %vm786_vm0, %v916_v51  ;;  %v904_v38 = vmul.f32 %v7980_v22, %v890_v52  ;;  %7097 = vst.msk [vmem:[#allocation5 + $0x10] sm:$0xff] %vm786_vm0, %v9669_v48  ;;  %7098 = vst.msk [vmem:[#allocation5 + $0x18] sm:$0xff] %vm786_vm0, %v9669_v48  ;;  %8373 = vmatprep.subr.mxu0 %v9669_v48 }
 0x2c0   : > { %v917_v54 = vadd.f32 %v7981_v26, %v903_v29  ;;  %v891_v55 = vmul.f32 %v9026_v53, %v10307_v49  ;;  %7099 = vst.msk [vmem:[#allocation5 + $0x20] sm:$0xff] %vm786_vm0, %v9669_v48  ;;  %7100 = vst.msk [vmem:[#allocation5 + $0x28] sm:$0xff] %vm786_vm0, %v9669_v48  ;;  %8350 = vmatprep.mubr.msk.f32.mxu1 %vm9670_vm1, %v9669_v48  ;;  %v7982_v49 = vld [vmem:[#allocation15] ss:$0 sm:$0xff] }
 0x2c1   : > { %v918_v56 = vadd.f32 %v7981_v26, %v904_v38  ;;  %7101 = vst.msk [vmem:[#allocation5 + $0x30] sm:$0xff] %vm786_vm0, %v9669_v48  ;;  %7102 = vst.msk [vmem:[#allocation5 + $0x38] sm:$0xff] %vm786_vm0, %v9669_v48 }
 0x2c2   : > { %8343 = vmatmul.mubr.msk.f32.gmra.mrb[4].mxu0 %vm786_vm0, %v917_v54  ;;  %v905_v57 = vmul.f32 %v7980_v22, %v891_v55 }
 0x2c3   : > { %8345 = vmatprep.mubr.msk.f32.mxu0 %vm786_vm0, %v918_v56 }
 0x2c4   : > { %v919_v39 = vadd.f32 %v7981_v26, %v905_v57 }
 0x2c6   : > { %8346 = vmatmul.mubr.msk.f32.gmra.mrb[6].mxu0 %vm786_vm0, %v919_v39 }
 0x2c7   : > { %8375 = vmatprep.mubr.msk.f32.mxu0 %vm9670_vm1, %v9669_v48 }
 0x38d   : > { %v8338_v58 = vpop.f32.mrb[0].mxu0 }
 0x38e   : > { %v10370_v59 = vadd.f32 %v8338_v58, %v7982_v49  ;;  %v1021_v60 = vpop.f32.mrb[1].mxu0 }
 0x38f   : > { %v10372_v61 = vadd.f32 %v7982_v49, %v1021_v60 }
 0x390   : > { %1139 = vrot.lane.b32.xlu1 %v10370_v59, %s9671_s13 }
 0x391   : > { %1061 = vrot.lane.b32.xlu0 %v10372_v61, %s9671_s13  ;;  %v8341_v62 = vpop.f32.mrb[2].mxu0 }
 0x392   : > { %v1031_v63 = vpop.f32.mrb[3].mxu0  ;;  %v10379_v3 = vadd.f32 %v8341_v62, %v7982_v49 }
 0x393   : > { %v10376_v0 = vadd.f32 %v7982_v49, %v1031_v63 }
 0x395   : > { %1216 = vrot.lane.b32.xlu1 %v10376_v0, %s9671_s13  ;;  %v8344_v1 = vpop.f32.mrb[4].mxu0 }
 0x396   : > { %v1041_v2 = vpop.f32.mrb[5].mxu0  ;;  %v10385_v7 = vadd.f32 %v8344_v1, %v7982_v49 }
 0x397   : > { %v10381_v4 = vadd.f32 %v7982_v49, %v1041_v2 }
 0x399   : > { %1293 = vrot.lane.b32.xlu1 %v10379_v3, %s9671_s13  ;;  %1370 = vrot.lane.b32.xlu0 %v10381_v4, %s9671_s13  ;;  %v8347_v5 = vpop.f32.mrb[6].mxu0 }
 0x39a   : > { %v1051_v6 = vpop.f32.mrb[7].mxu0  ;;  %v10391_v9 = vadd.f32 %v8347_v5, %v7982_v49 }
 0x39b   : > { %v10387_v8 = vadd.f32 %v7982_v49, %v1051_v6 }
 0x39d   : > { %1447 = vrot.lane.b32.xlu1 %v10385_v7, %s9671_s13  ;;  %1524 = vrot.lane.b32.xlu0 %v10387_v8, %s9671_s13 }
 0x3a1   : > { %1601 = vrot.lane.b32.xlu1 %v10391_v9, %s9671_s13  ;;  %s11736_s13 = sld [smem:[#allocation53_spill]] }
 0x402   : > { %v1140_v10 = vpop.permute.xlu1 %1139 }
 0x403   : > { %v1062_v11 = vpop.permute.xlu0 %1061 }
 0x404   : > { %8349 = vmatpush3.xpose.msk.msra.mxu1 %vm1063_vm2, %v1062_v11 }
 0x405   : > { %8353 = vmatprep.subr.mxu1 %v9669_v48 }
 0x407   : > { %v1217_v12 = vpop.permute.xlu1 %1216  ;;  %8351 = vmatmul.mubr.msk.f32.vlgmr.msra.gmra.mrb[0].mxu1 %vm1063_vm2, %v10372_v61 }
 0x408   : > { %8354 = vmatpush3.xpose.msk.msra.mxu1 %vm1063_vm2, %v1140_v10  ;;  %8355 = vmatprep.mubr.msk.f32.mxu1 %vm9670_vm1, %v9669_v48 }
 0x409   : > { %8358 = vmatprep.subr.mxu1 %v9669_v48 }
 0x40b   : > { %v1294_v13 = vpop.permute.xlu1 %1293  ;;  %8356 = vmatmul.mubr.msk.f32.vlgmr.msra.gmra.mrb[2].mxu1 %vm1063_vm2, %v10370_v59  ;;  %v1371_v15 = vpop.permute.xlu0 %1370 }
 0x40c   : > { %8359 = vmatpush3.xpose.msk.msra.mxu1 %vm1063_vm2, %v1217_v12  ;;  %8360 = vmatprep.mubr.msk.f32.mxu1 %vm9670_vm1, %v9669_v48 }
 0x40d   : > { %8363 = vmatprep.subr.mxu1 %v9669_v48 }
 0x40f   : > { %v1448_v14 = vpop.permute.xlu1 %1447  ;;  %8361 = vmatmul.mubr.msk.f32.vlgmr.msra.gmra.mrb[4].mxu1 %vm1063_vm2, %v10376_v0  ;;  %v1525_v17 = vpop.permute.xlu0 %1524 }
 0x410   : > { %8364 = vmatpush3.xpose.msk.msra.mxu1 %vm1063_vm2, %v1294_v13  ;;  %8374 = vmatpush3.xpose.msk.msra.mxu0 %vm1063_vm2, %v1448_v14 }
 0x411   : > { %8365 = vmatprep.mubr.msk.f32.mxu1 %vm9670_vm1, %v9669_v48  ;;  %8383 = vmatprep.subr.mxu0 %v9669_v48 }
 0x412   : > { %8368 = vmatprep.subr.mxu1 %v9669_v48 }
 0x413   : > { %8376 = vmatmul.mubr.msk.f32.vlgmr.msra.gmra.mrb[8].mxu0 %vm1063_vm2, %v10385_v7  ;;  %v1602_v16 = vpop.permute.xlu1 %1601  ;;  %8366 = vmatmul.mubr.msk.f32.vlgmr.msra.gmra.mrb[6].mxu1 %vm1063_vm2, %v10379_v3 }
 0x414   : > { %8369 = vmatpush3.xpose.msk.msra.mxu1 %vm1063_vm2, %v1371_v15  ;;  %8384 = vmatpush3.xpose.msk.msra.mxu0 %vm1063_vm2, %v1602_v16 }
 0x415   : > { %8370 = vmatprep.mubr.msk.f32.mxu1 %vm9670_vm1, %v9669_v48  ;;  %8385 = vmatprep.mubr.msk.f32.mxu0 %vm9670_vm1, %v9669_v48 }
 0x416   : > { %8378 = vmatprep.subr.mxu1 %v9669_v48  ;;  %8393 = vmatprep.subr.mxu0 %v9669_v48 }
 0x417   : > { %8371 = vmatmul.mubr.msk.f32.vlgmr.msra.gmra.mrb[8].mxu1 %vm1063_vm2, %v10381_v4  ;;  %8386 = vmatmul.mubr.msk.f32.vlgmr.msra.gmra.mrb[10].mxu0 %vm1063_vm2, %v10391_v9 }
 0x418   : > { %8379 = vmatpush3.xpose.msk.msra.mxu1 %vm1063_vm2, %v1525_v17  ;;  %8380 = vmatprep.mubr.msk.f32.mxu1 %vm9670_vm1, %v9669_v48 }
 0x419   : > { %8388 = vmatprep.subr.mxu1 %v9669_v48  ;;  %8395 = vmatprep.mubr.msk.f32.mxu0 %vm9670_vm1, %v9669_v48 }
 0x41b   : > { %8381 = vmatmul.mubr.msk.f32.vlgmr.msra.gmra.mrb[10].mxu1 %vm1063_vm2, %v10387_v8 }
 0x41c   : > { %8390 = vmatprep.mubr.msk.f32.mxu1 %vm9670_vm1, %v9669_v48 }
 0x4da   : > { %v1134_v18 = vpop.f32.mrb[0].mxu1 }
 0x4db   : > { %v1677_v19 = vmul.f32 0.35355338, %v1134_v18  ;;  %v8352_v22 = vpop.f32.mrb[1].mxu1 }
 0x4dd   : > { %v1685_v23 = vsel %vm1063_vm2, %v1677_v19, -inf }
 0x4de   : > { %1686 = vmax.xlane.f32.xlu0 %v1685_v23  ;;  %v1211_v24 = vpop.f32.mrb[2].mxu1 }
 0x4df   : > { %v1678_v25 = vmul.f32 0.35355338, %v1211_v24  ;;  %v8357_v26 = vpop.f32.mrb[3].mxu1 }
 0x4e1   : > { %v1688_v27 = vsel %vm1063_vm2, %v1678_v25, -inf }
 0x4e2   : > { %1689 = vmax.xlane.f32.xlu1 %v1688_v27  ;;  %v1288_v30 = vpop.f32.mrb[4].mxu1 }
 0x4e3   : > { %v1679_v31 = vmul.f32 0.35355338, %v1288_v30  ;;  %v8362_v32 = vpop.f32.mrb[5].mxu1 }
 0x4e5   : > { %v1691_v33 = vsel %vm1063_vm2, %v1679_v31, -inf }
 0x4e6   : > { %v1519_v34 = vpop.f32.mrb[8].mxu0  ;;  %1692 = vmax.xlane.f32.xlu0 %v1691_v33  ;;  %v1365_v35 = vpop.f32.mrb[6].mxu1 }
 0x4e7   : > { %v1682_v36 = vmul.f32 0.35355338, %v1519_v34  ;;  %v10445_v37 = vmul.f32 0.35355338, %v1365_v35  ;;  %v8367_v40 = vpop.f32.mrb[7].mxu1  ;;  %v8377_v20 = vpop.f32.mrb[9].mxu0 }
 0x4e9   : > { %v1700_v41 = vsel %vm1063_vm2, %v1682_v36, -inf  ;;  %v1694_v42 = vsel %vm1063_vm2, %v10445_v37, -inf }
 0x4ea   : > { %v1673_v43 = vpop.f32.mrb[10].mxu0  ;;  %1701 = vmax.xlane.f32.xlu1 %v1700_v41  ;;  %1695 = vmax.xlane.f32.xlu0 %v1694_v42  ;;  %v1442_v44 = vpop.f32.mrb[8].mxu1 }
 0x4eb   : > { %v1684_v45 = vmul.f32 0.35355338, %v1673_v43  ;;  %v1681_v46 = vmul.f32 0.35355338, %v1442_v44  ;;  %v8372_v28 = vpop.f32.mrb[9].mxu1  ;;  %v8387_v21 = vpop.f32.mrb[11].mxu0 }
 0x4ed   : > { %v1706_v47 = vsel %vm1063_vm2, %v1684_v45, -inf  ;;  %v1697_v50 = vsel %vm1063_vm2, %v1681_v46, -inf }
 0x4ee   : > { %1707 = vmax.xlane.f32.xlu1 %v1706_v47  ;;  %1698 = vmax.xlane.f32.xlu0 %v1697_v50  ;;  %v1596_v51 = vpop.f32.mrb[10].mxu1 }
 0x4ef   : > { %v1683_v52 = vmul.f32 0.35355338, %v1596_v51  ;;  %v8382_v29 = vpop.f32.mrb[11].mxu1 }
 0x4f1   : > { %v1703_v53 = vsel %vm1063_vm2, %v1683_v52, -inf }
 0x4f2   : > { %1704 = vmax.xlane.f32.xlu0 %v1703_v53 }
 0x4ff   : > { %1849 = vrot.lane.b32.xlu1 %v10370_v59, %s9672_s17 }
 0x503   : > { %1925 = vrot.lane.b32.xlu1 %v10376_v0, %s9672_s17 }
 0x507   : > { %2001 = vrot.lane.b32.xlu1 %v10379_v3, %s9672_s17 }
 0x508   : > { %1773 = vrot.lane.b32.xlu0 %v10372_v61, %s9672_s17 }
 0x50b   : > { %2153 = vrot.lane.b32.xlu1 %v10385_v7, %s9672_s17 }
 0x50c   : > { %2077 = vrot.lane.b32.xlu0 %v10381_v4, %s9672_s17 }
 0x50f   : > { %2305 = vrot.lane.b32.xlu1 %v10391_v9, %s9672_s17 }
 0x510   : > { %2229 = vrot.lane.b32.xlu0 %v10387_v8, %s9672_s17 }
 0x513   : > { %2469 = vrot.lane.b32.xlu1 %v10370_v59, %s9673_s2 }
 0x514   : > { %2391 = vrot.lane.b32.xlu0 %v10372_v61, %s9673_s2 }
 0x517   : > { %2467 = vrot.lane.b32.xlu1 %v10370_v59, %s9674_s14 }
 0x518   : > { %2389 = vrot.lane.b32.xlu0 %v10372_v61, %s9674_s14 }
 0x51c   : > { %2547 = vrot.lane.b32.xlu0 %v10376_v0, %s9673_s2 }
 0x56b   : > { %v1687_v38 = vpop.xlane.xlu0 %1686 }
 0x56c   : > { %v1709_v54 = vsub.f32 %v1677_v19, %v1687_v38 }
 0x56e   : > { %v1717_v55 = vmul.f32 1.442695, %v1709_v54 }
 0x56f   : > { %v1690_v56 = vpop.xlane.xlu1 %1689 }
 0x570   : > { %9027 = vpow2.f32 %v1717_v55  ;;  %v1710_v57 = vsub.f32 %v1678_v25, %v1690_v56 }
 0x572   : > { %v1719_v39 = vmul.f32 1.442695, %v1710_v57 }
 0x573   : > { %v1693_v49 = vpop.xlane.xlu0 %1692 }
 0x574   : > { %9029 = vpow2.f32 %v1719_v39  ;;  %v1711_v58 = vsub.f32 %v1679_v31, %v1693_v49 }
 0x576   : > { %v1721_v60 = vmul.f32 1.442695, %v1711_v58 }
 0x577   : > { %v1702_v62 = vpop.xlane.xlu1 %1701  ;;  %v1696_v63 = vpop.xlane.xlu0 %1695 }
 0x578   : > { %9031 = vpow2.f32 %v1721_v60  ;;  %v1714_v1 = vsub.f32 %v1682_v36, %v1702_v62  ;;  %v1712_v6 = vsub.f32 %v10445_v37, %v1696_v63 }
 0x57a   : > { %v10471_v2 = vpop.eup %9027  ;;  %v1727_v5 = vmul.f32 1.442695, %v1714_v1  ;;  %v1723_v16 = vmul.f32 1.442695, %v1712_v6 }
 0x57b   : > { %v1708_v10 = vpop.xlane.xlu1 %1707  ;;  %v1699_v11 = vpop.xlane.xlu0 %1698  ;;  %v1733_v12 = vsel %vm1063_vm2, %v10471_v2, 0.0 }
 0x57c   : > { %9033 = vpow2.f32 %v1727_v5  ;;  %v1716_v13 = vsub.f32 %v1684_v45, %v1708_v10  ;;  %v1713_v14 = vsub.f32 %v1681_v46, %v1699_v11  ;;  %1734 = vadd.xlane.f32.xlu0 %v1733_v12 }
 0x57e   : > { %v10476_v15 = vpop.eup %9029  ;;  %v1731_v17 = vmul.f32 1.442695, %v1716_v13  ;;  %v1725_v18 = vmul.f32 1.442695, %v1713_v14 }
 0x57f   : > { %v1850_v19 = vpop.permute.xlu1 %1849  ;;  %v1705_v22 = vpop.xlane.xlu0 %1704  ;;  %v1736_v23 = vsel %vm1063_vm2, %v10476_v15, 0.0 }
 0x580   : > { %9035 = vpow2.f32 %v1731_v17  ;;  %v1715_v24 = vsub.f32 %v1683_v52, %v1705_v22  ;;  %1737 = vadd.xlane.f32.xlu1 %v1736_v23  ;;  %8394 = vmatpush3.msra.mxu0 %v1850_v19 }
 0x581   : > { %9037 = vpow2.f32 %v1725_v18  ;;  %8403 = vmatprep.subr.mxu0 %v9669_v48 }
 0x582   : > { %v10481_v25 = vpop.eup %9031  ;;  %9039 = vpow2.f32 %v1723_v16  ;;  %v1729_v26 = vmul.f32 1.442695, %v1715_v24 }
 0x583   : > { %v1774_v27 = vpop.permute.xlu0 %1773  ;;  %v1739_v30 = vsel %vm1063_vm2, %v10481_v25, 0.0  ;;  %v1926_v42 = vpop.permute.xlu1 %1925 }
 0x584   : > { %9041 = vpow2.f32 %v1729_v26  ;;  %1740 = vadd.xlane.f32.xlu0 %v1739_v30  ;;  %8389 = vmatpush3.msra.mxu1 %v1774_v27 }
 0x585   : > { %8398 = vmatprep.subr.mxu1 %v9669_v48 }
 0x586   : > { %v10486_v31 = vpop.eup %9033 }
 0x587   : > { %v1748_v32 = vsel %vm1063_vm2, %v10486_v31, 0.0  ;;  %v2078_v43 = vpop.permute.xlu0 %2077  ;;  %v2002_v44 = vpop.permute.xlu1 %2001 }
 0x588   : > { %1749 = vadd.xlane.f32.xlu1 %v1748_v32 }
 0x58a   : > { %v10490_v33 = vpop.eup %9035 }
 0x58b   : > { %v10492_v34 = vpop.eup %9037  ;;  %v1754_v35 = vsel %vm1063_vm2, %v10490_v33, 0.0  ;;  %v2230_v45 = vpop.permute.xlu0 %2229 }
 0x58c   : > { %v10496_v36 = vpop.eup %9039  ;;  %1755 = vadd.xlane.f32.xlu1 %v1754_v35  ;;  %v1745_v37 = vsel %vm1063_vm2, %v10492_v34, 0.0  ;;  %v2154_v46 = vpop.permute.xlu1 %2153 }
 0x58d   : > { %1746 = vadd.xlane.f32.xlu0 %v1745_v37  ;;  %v1742_v20 = vsel %vm1063_vm2, %v10496_v36, 0.0 }
 0x58e   : > { %v10500_v40 = vpop.eup %9041 }
 0x58f   : > { %v1751_v41 = vsel %vm1063_vm2, %v10500_v40, 0.0  ;;  %v10528_v28 = vpop.permute.xlu0 %2391 }
 0x590   : > { %1743 = vadd.xlane.f32.xlu1 %v1742_v20  ;;  %v10530_v21 = vpop.permute.xlu1 %2305 }
 0x591   : > { %1752 = vadd.xlane.f32.xlu0 %v1751_v41 }
 0x593   : > { %v10532_v47 = vpop.permute.xlu0 %2389 }
 0x594   : > { %v10534_v50 = vpop.permute.xlu1 %2469 }
 0x597   : > { %v10536_v51 = vpop.permute.xlu0 %2547 }
 0x598   : > { %v10538_v52 = vpop.permute.xlu1 %2467 }
 0x5a1   : > { %2625 = vrot.lane.b32.xlu1 %v10379_v3, %s9673_s2 }
 0x5a5   : > { %2623 = vrot.lane.b32.xlu1 %v10379_v3, %s9674_s14 }
 0x5a7   : > { %2545 = vrot.lane.b32.xlu0 %v10376_v0, %s9674_s14 }
 0x5a9   : > { %2781 = vrot.lane.b32.xlu1 %v10385_v7, %s9673_s2 }
 0x5ab   : > { %2703 = vrot.lane.b32.xlu0 %v10381_v4, %s9673_s2 }
 0x5ad   : > { %2779 = vrot.lane.b32.xlu1 %v10385_v7, %s9674_s14 }
 0x5af   : > { %2701 = vrot.lane.b32.xlu0 %v10381_v4, %s9674_s14 }
 0x5b1   : > { %2937 = vrot.lane.b32.xlu1 %v10391_v9, %s9673_s2 }
 0x5b3   : > { %2859 = vrot.lane.b32.xlu0 %v10387_v8, %s9673_s2 }
 0x5b5   : > { %2935 = vrot.lane.b32.xlu1 %v10391_v9, %s9674_s14 }
 0x5b7   : > { %2857 = vrot.lane.b32.xlu0 %v10387_v8, %s9674_s14 }
 0x609   : > { %v1735_v29 = vpop.xlane.xlu0 %1734 }
 0x60a   : > { %9043 = vrcp.f32 %v1735_v29 }
 0x60d   : > { %v1738_v53 = vpop.xlane.xlu1 %1737 }
 0x60e   : > { %9045 = vrcp.f32 %v1738_v53 }
 0x611   : > { %v1741_v38 = vpop.xlane.xlu0 %1740 }
 0x612   : > { %9047 = vrcp.f32 %v1741_v38 }
 0x614   : > { %v9044_v54 = vpop.eup %9043 }
 0x615   : > { %v1750_v55 = vpop.xlane.xlu1 %1749  ;;  %v1765_v56 = vmul.f32 %v9044_v54, %v10471_v2 }
 0x617   : > { %8391 = vmatmul.mubr.msk.f32.vlgmr.msra.gmra.mrb[12].mxu1 %vm1063_vm2, %v1765_v56 }
 0x618   : > { %v9046_v57 = vpop.eup %9045  ;;  %8399 = vmatpush3.msra.mxu1 %v1926_v42  ;;  %8400 = vmatprep.mubr.msk.f32.mxu1 %vm9670_vm1, %v9669_v48 }
 0x619   : > { %v1756_v39 = vpop.xlane.xlu1 %1755  ;;  %v1766_v49 = vmul.f32 %v9046_v57, %v10476_v15  ;;  %8408 = vmatprep.subr.mxu1 %v9669_v48 }
 0x61a   : > { %v1747_v58 = vpop.xlane.xlu0 %1746 }
 0x61b   : > { %9049 = vrcp.f32 %v1747_v58  ;;  %8396 = vmatmul.mubr.msk.f32.vlgmr.msra.gmra.mrb[12].mxu0 %vm1063_vm2, %v1766_v49 }
 0x61c   : > { %v9048_v60 = vpop.eup %9047  ;;  %8404 = vmatpush3.msra.mxu0 %v2002_v44  ;;  %8405 = vmatprep.mubr.msk.f32.mxu0 %vm9670_vm1, %v9669_v48 }
 0x61d   : > { %v1744_v62 = vpop.xlane.xlu1 %1743  ;;  %v1767_v63 = vmul.f32 %v9048_v60, %v10481_v25  ;;  %8413 = vmatprep.subr.mxu0 %v9669_v48 }
 0x61e   : > { %9051 = vrcp.f32 %v1744_v62  ;;  %v1753_v1 = vpop.xlane.xlu0 %1752 }
 0x61f   : > { %9053 = vrcp.f32 %v1753_v1  ;;  %8401 = vmatmul.mubr.msk.f32.vlgmr.msra.gmra.mrb[14].mxu1 %vm1063_vm2, %v1767_v63 }
 0x620   : > { %9055 = vrcp.f32 %v1750_v55  ;;  %8409 = vmatpush3.msra.mxu1 %v2078_v43  ;;  %8410 = vmatprep.mubr.msk.f32.mxu1 %vm9670_vm1, %v9669_v48 }
 0x621   : > { %8418 = vmatprep.subr.mxu1 %v9669_v48  ;;  %9057 = vrcp.f32 %v1756_v39  ;;  %v2626_v10 = vpop.permute.xlu1 %2625 }
 0x622   : > { %v2546_v5 = vpop.permute.xlu0 %2545 }
 0x625   : > { %v9050_v2 = vpop.eup %9049  ;;  %v2624_v17 = vpop.permute.xlu1 %2623 }
 0x626   : > { %v1769_v6 = vmul.f32 %v9050_v2, %v10492_v34  ;;  %v2704_v16 = vpop.permute.xlu0 %2703 }
 0x628   : > { %v9052_v11 = vpop.eup %9051  ;;  %8411 = vmatmul.mubr.msk.f32.vlgmr.msra.gmra.mrb[16].mxu1 %vm1063_vm2, %v1769_v6 }
 0x629   : > { %v9054_v12 = vpop.eup %9053  ;;  %8419 = vmatpush3.msra.mxu1 %v2230_v45  ;;  %8420 = vmatprep.mubr.msk.f32.mxu1 %vm9670_vm1, %v9669_v48  ;;  %v1768_v13 = vmul.f32 %v9052_v11, %v10496_v36  ;;  %v2782_v24 = vpop.permute.xlu1 %2781 }
 0x62a   : > { %v9056_v14 = vpop.eup %9055  ;;  %v1771_v15 = vmul.f32 %v9054_v12, %v10500_v40  ;;  %8428 = vmatprep.subr.mxu1 %v9669_v48  ;;  %v2702_v23 = vpop.permute.xlu0 %2701 }
 0x62b   : > { %8406 = vmatmul.mubr.msk.f32.vlgmr.msra.gmra.mrb[14].mxu0 %vm1063_vm2, %v1768_v13  ;;  %v1770_v18 = vmul.f32 %v9056_v14, %v10486_v31  ;;  %v9058_v19 = vpop.eup %9057 }
 0x62c   : > { %8414 = vmatpush3.msra.mxu0 %v2154_v46  ;;  %8421 = vmatmul.mubr.msk.f32.vlgmr.msra.gmra.mrb[18].mxu1 %vm1063_vm2, %v1771_v15  ;;  %v1772_v22 = vmul.f32 %v9058_v19, %v10490_v33 }
 0x62d   : > { %8415 = vmatprep.mubr.msk.f32.mxu0 %vm9670_vm1, %v9669_v48  ;;  %8423 = vmatprep.subr.mxu0 %v9669_v48  ;;  %v2780_v26 = vpop.permute.xlu1 %2779 }
 0x62e   : > { %8430 = vmatprep.mubr.msk.f32.mxu1 %vm9670_vm1, %v9669_v48  ;;  %v2860_v25 = vpop.permute.xlu0 %2859 }
 0x62f   : > { %8416 = vmatmul.mubr.msk.f32.vlgmr.msra.gmra.mrb[16].mxu0 %vm1063_vm2, %v1770_v18 }
 0x630   : > { %8429 = vmatpush3.xpose.msk.msra.mxu1 %vm1063_vm2, %v10528_v28  ;;  %8424 = vmatpush3.msra.mxu0 %v10530_v21 }
 0x631   : > { %8438 = vmatprep.subr.mxu1 %v9669_v48  ;;  %8425 = vmatprep.mubr.msk.f32.mxu0 %vm9670_vm1, %v9669_v48  ;;  %v2938_v30 = vpop.permute.xlu1 %2937 }
 0x632   : > { %8433 = vmatprep.subr.mxu0 %v9669_v48  ;;  %v2858_v27 = vpop.permute.xlu0 %2857 }
 0x633   : > { %8431 = vmatmul.mubr.msk.f32.vlgmr.msra.gmra.mrb[20].mxu1 %vm1063_vm2, %v10532_v47  ;;  %8426 = vmatmul.mubr.msk.f32.vlgmr.msra.gmra.mrb[18].mxu0 %vm1063_vm2, %v1772_v22 }
 0x634   : > { %8439 = vmatpush3.xpose.msk.msra.mxu1 %vm1063_vm2, %v10536_v51  ;;  %8440 = vmatprep.mubr.msk.f32.mxu1 %vm9670_vm1, %v9669_v48 }
 0x635   : > { %8448 = vmatprep.subr.mxu1 %v9669_v48  ;;  %8435 = vmatprep.mubr.msk.f32.mxu0 %vm9670_vm1, %v9669_v48  ;;  %v2936_v31 = vpop.permute.xlu1 %2935 }
 0x637   : > { %8441 = vmatmul.mubr.msk.f32.vlgmr.msra.gmra.mrb[22].mxu1 %vm1063_vm2, %v2546_v5  ;;  %8434 = vmatpush3.xpose.msk.msra.mxu0 %vm1063_vm2, %v10534_v50 }
 0x638   : > { %8449 = vmatpush3.xpose.msk.msra.mxu1 %vm1063_vm2, %v2704_v16  ;;  %8450 = vmatprep.mubr.msk.f32.mxu1 %vm9670_vm1, %v9669_v48 }
 0x639   : > { %8443 = vmatprep.subr.mxu0 %v9669_v48  ;;  %8458 = vmatprep.subr.mxu1 %v9669_v48 }
 0x63a   : > { %8436 = vmatmul.mubr.msk.f32.vlgmr.msra.gmra.mrb[20].mxu0 %vm1063_vm2, %v10538_v52 }
 0x63b   : > { %8451 = vmatmul.mubr.msk.f32.vlgmr.msra.gmra.mrb[24].mxu1 %vm1063_vm2, %v2702_v23  ;;  %8444 = vmatpush3.xpose.msk.msra.mxu0 %vm1063_vm2, %v2626_v10 }
 0x63c   : > { %8459 = vmatpush3.xpose.msk.msra.mxu1 %vm1063_vm2, %v2860_v25  ;;  %8445 = vmatprep.mubr.msk.f32.mxu0 %vm9670_vm1, %v9669_v48 }
 0x63d   : > { %8460 = vmatprep.mubr.msk.f32.mxu1 %vm9670_vm1, %v9669_v48  ;;  %8453 = vmatprep.subr.mxu0 %v9669_v48 }
 0x63e   : > { %8446 = vmatmul.mubr.msk.f32.vlgmr.msra.gmra.mrb[22].mxu0 %vm1063_vm2, %v2624_v17  ;;  %8468 = vmatprep.subr.mxu1 %v9669_v48 }
 0x63f   : > { %8461 = vmatmul.mubr.msk.f32.vlgmr.msra.gmra.mrb[26].mxu1 %vm1063_vm2, %v2858_v27  ;;  %8454 = vmatpush3.xpose.msk.msra.mxu0 %vm1063_vm2, %v2782_v24 }
 0x640   : > { %8455 = vmatprep.mubr.msk.f32.mxu0 %vm9670_vm1, %v9669_v48  ;;  %8463 = vmatprep.subr.mxu0 %v9669_v48 }
 0x641   : > { %8470 = vmatprep.mubr.msk.f32.mxu1 %vm9670_vm1, %v9669_v48 }
 0x642   : > { %8456 = vmatmul.mubr.msk.f32.vlgmr.msra.gmra.mrb[24].mxu0 %vm1063_vm2, %v2780_v26 }
 0x643   : > { %8464 = vmatpush3.xpose.msk.msra.mxu0 %vm1063_vm2, %v2938_v30  ;;  %8465 = vmatprep.mubr.msk.f32.mxu0 %vm9670_vm1, %v9669_v48 }
 0x644   : > { %8473 = vmatprep.subr.mxu0 %v9669_v48 }
 0x646   : > { %8466 = vmatmul.mubr.msk.f32.vlgmr.msra.gmra.mrb[26].mxu0 %vm1063_vm2, %v2936_v31 }
 0x647   : > { %8475 = vmatprep.mubr.msk.f32.mxu0 %vm9670_vm1, %v9669_v48 }
 0x6ea   : > { %v1845_v32 = vpop.f32.mrb[12].mxu1 }
 0x6eb   : > { %2381 = vst.msk [vmem:[#allocation6] sm:$0xff] %vm1063_vm2, %v1845_v32  ;;  %v8392_v33 = vpop.f32.mrb[13].mxu1 }
 0x6ee   : > { %v1921_v34 = vpop.f32.mrb[12].mxu0 }
 0x6ef   : > { %2382 = vst.msk [vmem:[#allocation6 + $0x8] sm:$0xff] %vm1063_vm2, %v1921_v34  ;;  %v8397_v35 = vpop.f32.mrb[13].mxu0 }
 0x6f2   : > { %v1997_v36 = vpop.f32.mrb[14].mxu1 }
 0x6f3   : > { %2383 = vst.msk [vmem:[#allocation6 + $0x10] sm:$0xff] %vm1063_vm2, %v1997_v36  ;;  %v8402_v37 = vpop.f32.mrb[15].mxu1 }
 0x6fb   : > { %v2149_v40 = vpop.f32.mrb[16].mxu1 }
 0x6fc   : > { %2385 = vst.msk [vmem:[#allocation6 + $0x20] sm:$0xff] %vm1063_vm2, %v2149_v40  ;;  %v8412_v20 = vpop.f32.mrb[17].mxu1 }
 0x6fe   : > { %v2073_v41 = vpop.f32.mrb[14].mxu0 }
 0x6ff   : > { %2384 = vst.msk [vmem:[#allocation6 + $0x18] sm:$0xff] %vm1063_vm2, %v2073_v41  ;;  %v2301_v42 = vpop.f32.mrb[18].mxu1  ;;  %v8407_v43 = vpop.f32.mrb[15].mxu0 }
 0x700   : > { %2387 = vst.msk [vmem:[#allocation6 + $0x30] sm:$0xff] %vm1063_vm2, %v2301_v42  ;;  %v8422_v44 = vpop.f32.mrb[19].mxu1 }
 0x702   : > { %v2225_v45 = vpop.f32.mrb[16].mxu0 }
 0x703   : > { %2386 = vst.msk [vmem:[#allocation6 + $0x28] sm:$0xff] %vm1063_vm2, %v2225_v45  ;;  %v8417_v46 = vpop.f32.mrb[17].mxu0 }
 0x706   : > { %v2463_v28 = vpop.f32.mrb[20].mxu1  ;;  %v2377_v21 = vpop.f32.mrb[18].mxu0 }
 0x707   : > { %v3013_v47 = vmul.f32 0.35355338, %v2463_v28  ;;  %v8432_v50 = vpop.f32.mrb[21].mxu1  ;;  %2388 = vst.msk [vmem:[#allocation6 + $0x38] sm:$0xff] %vm1063_vm2, %v2377_v21  ;;  %v8427_v51 = vpop.f32.mrb[19].mxu0 }
 0x709   : > { %v3021_v52 = vsel %vm1063_vm2, %v3013_v47, -inf }
 0x70a   : > { %3022 = vmax.xlane.f32.xlu0 %v3021_v52  ;;  %v2619_v29 = vpop.f32.mrb[22].mxu1 }
 0x70b   : > { %v3015_v53 = vmul.f32 0.35355338, %v2619_v29  ;;  %v8442_v38 = vpop.f32.mrb[23].mxu1 }
 0x70d   : > { %v2541_v54 = vpop.f32.mrb[20].mxu0  ;;  %v3027_v55 = vsel %vm1063_vm2, %v3015_v53, -inf }
 0x70e   : > { %v3014_v56 = vmul.f32 0.35355338, %v2541_v54  ;;  %3028 = vmax.xlane.f32.xlu0 %v3027_v55  ;;  %v2775_v57 = vpop.f32.mrb[24].mxu1  ;;  %v8437_v39 = vpop.f32.mrb[21].mxu0 }
 0x70f   : > { %v8452_v49 = vpop.f32.mrb[25].mxu1  ;;  %v3017_v5 = vmul.f32 0.35355338, %v2775_v57 }
 0x710   : > { %v3024_v58 = vsel %vm1063_vm2, %v3014_v56, -inf }
 0x711   : > { %3025 = vmax.xlane.f32.xlu1 %v3024_v58  ;;  %v2697_v60 = vpop.f32.mrb[22].mxu0  ;;  %v3033_v15 = vsel %vm1063_vm2, %v3017_v5, -inf }
 0x712   : > { %v3016_v62 = vmul.f32 0.35355338, %v2697_v60  ;;  %v2931_v63 = vpop.f32.mrb[26].mxu1  ;;  %v8447_v1 = vpop.f32.mrb[23].mxu0 }
 0x713   : > { %v8462_v2 = vpop.f32.mrb[27].mxu1  ;;  %v10636_v13 = vmul.f32 0.35355338, %v2931_v63 }
 0x714   : > { %v3030_v6 = vsel %vm1063_vm2, %v3016_v62, -inf }
 0x715   : > { %v2853_v10 = vpop.f32.mrb[24].mxu0  ;;  %3031 = vmax.xlane.f32.xlu0 %v3030_v6  ;;  %v3039_v18 = vsel %vm1063_vm2, %v10636_v13, -inf }
 0x716   : > { %v3018_v11 = vmul.f32 0.35355338, %v2853_v10  ;;  %v8457_v12 = vpop.f32.mrb[25].mxu0 }
 0x718   : > { %v3036_v14 = vsel %vm1063_vm2, %v3018_v11, -inf }
 0x719   : > { %3037 = vmax.xlane.f32.xlu1 %v3036_v14  ;;  %v3009_v16 = vpop.f32.mrb[26].mxu0  ;;  %3034 = vmax.xlane.f32.xlu0 %v3033_v15 }
 0x71a   : > { %v8467_v17 = vpop.f32.mrb[27].mxu0  ;;  %v10660_v19 = vmul.f32 0.35355338, %v3009_v16 }
 0x71c   : > { %v3042_v22 = vsel %vm1063_vm2, %v10660_v19, -inf }
 0x71d   : > { %3040 = vmax.xlane.f32.xlu0 %v3039_v18 }
 0x72a   : > { %3185 = vrot.lane.b32.xlu1 %v10370_v59, %s9675_s19 }
 0x72e   : > { %3261 = vrot.lane.b32.xlu1 %v10376_v0, %s9675_s19 }
 0x732   : > { %3337 = vrot.lane.b32.xlu1 %v10379_v3, %s9675_s19 }
 0x733   : > { %3109 = vrot.lane.b32.xlu0 %v10372_v61, %s9675_s19 }
 0x736   : > { %3489 = vrot.lane.b32.xlu1 %v10385_v7, %s9675_s19 }
 0x737   : > { %3413 = vrot.lane.b32.xlu0 %v10381_v4, %s9675_s19 }
 0x73a   : > { %3641 = vrot.lane.b32.xlu1 %v10391_v9, %s9675_s19 }
 0x73b   : > { %3565 = vrot.lane.b32.xlu0 %v10387_v8, %s9675_s19 }
 0x73e   : > { %3838 = vrot.lane.b32.xlu1 %v10370_v59, %s9676_s27 }
 0x73f   : > { %3760 = vrot.lane.b32.xlu0 %v10372_v61, %s9676_s27 }
 0x742   : > { %3836 = vrot.lane.b32.xlu1 %v10370_v59, %s9677_s29 }
 0x743   : > { %3758 = vrot.lane.b32.xlu0 %v10372_v61, %s9677_s29 }
 0x747   : > { %3916 = vrot.lane.b32.xlu0 %v10376_v0, %s9676_s27 }
 0x766   : > { %3043 = vmax.xlane.f32.xlu1 %v3042_v22 }
 0x777   : > { %3994 = vrot.lane.b32.xlu1 %v10379_v3, %s9676_s27 }
 0x797   : > { %v3023_v23 = vpop.xlane.xlu0 %3022 }
 0x798   : > { %v3045_v24 = vsub.f32 %v3013_v47, %v3023_v23 }
 0x79a   : > { %v3053_v25 = vmul.f32 1.442695, %v3045_v24 }
 0x79b   : > { %v3029_v26 = vpop.xlane.xlu0 %3028 }
 0x79c   : > { %9059 = vpow2.f32 %v3053_v25  ;;  %v3047_v27 = vsub.f32 %v3015_v53, %v3029_v26 }
 0x79e   : > { %v3057_v30 = vmul.f32 1.442695, %v3047_v27  ;;  %v3026_v31 = vpop.xlane.xlu1 %3025 }
 0x79f   : > { %v3046_v32 = vsub.f32 %v3014_v56, %v3026_v31 }
 0x7a0   : > { %9061 = vpow2.f32 %v3057_v30 }
 0x7a1   : > { %v3055_v33 = vmul.f32 1.442695, %v3046_v32 }
 0x7a2   : > { %v3032_v34 = vpop.xlane.xlu0 %3031 }
 0x7a3   : > { %9063 = vpow2.f32 %v3055_v33  ;;  %v3048_v35 = vsub.f32 %v3016_v62, %v3032_v34 }
 0x7a5   : > { %v3059_v36 = vmul.f32 1.442695, %v3048_v35 }
 0x7a6   : > { %v10666_v37 = vpop.eup %9059  ;;  %v3038_v40 = vpop.xlane.xlu1 %3037 }
 0x7a7   : > { %v3035_v20 = vpop.xlane.xlu0 %3034  ;;  %9065 = vpow2.f32 %v3059_v36  ;;  %v3050_v41 = vsub.f32 %v3018_v11, %v3038_v40  ;;  %v3069_v43 = vsel %vm1063_vm2, %v10666_v37, 0.0 }
 0x7a8   : > { %v3049_v42 = vsub.f32 %v3017_v5, %v3035_v20  ;;  %3070 = vadd.xlane.f32.xlu0 %v3069_v43 }
 0x7a9   : > { %v3063_v44 = vmul.f32 1.442695, %v3050_v41 }
 0x7aa   : > { %v3061_v45 = vmul.f32 1.442695, %v3049_v42  ;;  %v10670_v46 = vpop.eup %9061  ;;  %v3186_v28 = vpop.permute.xlu1 %3185 }
 0x7ab   : > { %v3041_v21 = vpop.xlane.xlu0 %3040  ;;  %9067 = vpow2.f32 %v3063_v44  ;;  %8474 = vmatpush3.msra.mxu0 %v3186_v28  ;;  %v3075_v50 = vsel %vm1063_vm2, %v10670_v46, 0.0 }
 0x7ac   : > { %v3051_v47 = vsub.f32 %v10636_v13, %v3041_v21  ;;  %9069 = vpow2.f32 %v3061_v45  ;;  %3076 = vadd.xlane.f32.xlu0 %v3075_v50  ;;  %8483 = vmatprep.subr.mxu0 %v9669_v48 }
 0x7ad   : > { %v10676_v51 = vpop.eup %9063 }
 0x7ae   : > { %v3065_v52 = vmul.f32 1.442695, %v3051_v47  ;;  %v3072_v53 = vsel %vm1063_vm2, %v10676_v51, 0.0  ;;  %v3262_v60 = vpop.permute.xlu1 %3261 }
 0x7af   : > { %v3110_v29 = vpop.permute.xlu0 %3109  ;;  %3073 = vadd.xlane.f32.xlu1 %v3072_v53 }
 0x7b0   : > { %9071 = vpow2.f32 %v3065_v52  ;;  %8469 = vmatpush3.msra.mxu1 %v3110_v29 }
 0x7b1   : > { %8478 = vmatprep.subr.mxu1 %v9669_v48  ;;  %v10681_v38 = vpop.eup %9065 }
 0x7b2   : > { %v3078_v54 = vsel %vm1063_vm2, %v10681_v38, 0.0  ;;  %v10703_v62 = vpop.permute.xlu1 %3337 }
 0x7b3   : > { %3079 = vadd.xlane.f32.xlu1 %v3078_v54  ;;  %v3414_v14 = vpop.permute.xlu0 %3413 }
 0x7b5   : > { %v10685_v55 = vpop.eup %9067 }
 0x7b6   : > { %v10687_v56 = vpop.eup %9069  ;;  %v3084_v57 = vsel %vm1063_vm2, %v10685_v55, 0.0  ;;  %v10707_v63 = vpop.permute.xlu1 %3489 }
 0x7b7   : > { %3085 = vadd.xlane.f32.xlu1 %v3084_v57  ;;  %v3081_v39 = vsel %vm1063_vm2, %v10687_v56, 0.0  ;;  %v3566_v15 = vpop.permute.xlu0 %3565 }
 0x7b8   : > { %3082 = vadd.xlane.f32.xlu0 %v3081_v39 }
 0x7ba   : > { %v10693_v49 = vpop.eup %9071  ;;  %v10713_v1 = vpop.permute.xlu1 %3641 }
 0x7bb   : > { %v3087_v58 = vsel %vm1063_vm2, %v10693_v49, 0.0  ;;  %v10742_v16 = vpop.permute.xlu0 %3760 }
 0x7bc   : > { %3088 = vadd.xlane.f32.xlu0 %v3087_v58 }
 0x7be   : > { %v10717_v2 = vpop.permute.xlu1 %3838 }
 0x7bf   : > { %v10748_v17 = vpop.permute.xlu0 %3758 }
 0x7c2   : > { %v10723_v5 = vpop.permute.xlu1 %3836 }
 0x7c3   : > { %v10752_v18 = vpop.permute.xlu0 %3916 }
 0x7c8   : > { %3992 = vrot.lane.b32.xlu1 %v10379_v3, %s9677_s29 }
 0x7d2   : > { %3914 = vrot.lane.b32.xlu0 %v10376_v0, %s9677_s29 }
 0x7d6   : > { %4072 = vrot.lane.b32.xlu0 %v10381_v4, %s9676_s27 }
 0x7da   : > { %4070 = vrot.lane.b32.xlu0 %v10381_v4, %s9677_s29 }
 0x7de   : > { %4228 = vrot.lane.b32.xlu0 %v10387_v8, %s9676_s27 }
 0x7e2   : > { %4226 = vrot.lane.b32.xlu0 %v10387_v8, %s9677_s29 }
 0x7e6   : > { %4478 = vrot.lane.b32.xlu0 %v10372_v61, %s9678_s30 }
 0x7ea   : > { %4782 = vrot.lane.b32.xlu0 %v10381_v4, %s9678_s30 }
 0x7ee   : > { %4934 = vrot.lane.b32.xlu0 %v10387_v8, %s9678_s30 }
 0x7f2   : > { %5129 = vrot.lane.b32.xlu0 %v10372_v61, %s9679_s16 }
 0x7f3   : > { %v3044_v6 = vpop.xlane.xlu1 %3043 }
 0x7f4   : > { %v3052_v10 = vsub.f32 %v10660_v19, %v3044_v6 }
 0x7f6   : > { %v3067_v11 = vmul.f32 1.442695, %v3052_v10  ;;  %5127 = vrot.lane.b32.xlu0 %v10372_v61, %s9680_s23 }
 0x7f7   : > { %v10758_v22 = vpop.permute.xlu1 %3994 }
 0x7f8   : > { %9073 = vpow2.f32 %v3067_v11 }
 0x802   : > { %v10730_v12 = vpop.eup %9073 }
 0x803   : > { %v3090_v13 = vsel %vm1063_vm2, %v10730_v12, 0.0 }
 0x804   : > { %3091 = vadd.xlane.f32.xlu1 %v3090_v13 }
 0x815   : > { %4150 = vrot.lane.b32.xlu1 %v10385_v7, %s9676_s27 }
 0x819   : > { %4148 = vrot.lane.b32.xlu1 %v10385_v7, %s9677_s29 }
 0x81d   : > { %4306 = vrot.lane.b32.xlu1 %v10391_v9, %s9676_s27 }
 0x821   : > { %4304 = vrot.lane.b32.xlu1 %v10391_v9, %s9677_s29 }
 0x825   : > { %4554 = vrot.lane.b32.xlu1 %v10370_v59, %s9678_s30 }
 0x829   : > { %4630 = vrot.lane.b32.xlu1 %v10376_v0, %s9678_s30 }
 0x82d   : > { %4706 = vrot.lane.b32.xlu1 %v10379_v3, %s9678_s30 }
 0x831   : > { %4858 = vrot.lane.b32.xlu1 %v10385_v7, %s9678_s30 }
 0x835   : > { %v3071_v19 = vpop.xlane.xlu0 %3070  ;;  %5010 = vrot.lane.b32.xlu1 %v10391_v9, %s9678_s30 }
 0x836   : > { %9075 = vrcp.f32 %v3071_v19 }
 0x839   : > { %v3077_v23 = vpop.xlane.xlu0 %3076  ;;  %5207 = vrot.lane.b32.xlu1 %v10370_v59, %s9679_s16 }
 0x83a   : > { %9077 = vrcp.f32 %v3077_v23 }
 0x83c   : > { %v3074_v24 = vpop.xlane.xlu1 %3073 }
 0x83d   : > { %9079 = vrcp.f32 %v3074_v24  ;;  %5205 = vrot.lane.b32.xlu1 %v10370_v59, %s9680_s23 }
 0x840   : > { %v9076_v25 = vpop.eup %9075  ;;  %v3080_v26 = vpop.xlane.xlu1 %3079 }
 0x841   : > { %9081 = vrcp.f32 %v3080_v26  ;;  %v3101_v27 = vmul.f32 %v9076_v25, %v10666_v37 }
 0x843   : > { %8471 = vmatmul.mubr.msk.f32.vlgmr.msra.gmra.mrb[28].mxu1 %vm1063_vm2, %v3101_v27 }
 0x844   : > { %v9078_v30 = vpop.eup %9077  ;;  %8479 = vmatpush3.msra.mxu1 %v3262_v60  ;;  %v3086_v31 = vpop.xlane.xlu1 %3085  ;;  %8480 = vmatprep.mubr.msk.f32.mxu1 %vm9670_vm1, %v9669_v48 }
 0x845   : > { %9083 = vrcp.f32 %v3086_v31  ;;  %v3083_v32 = vpop.xlane.xlu0 %3082  ;;  %8488 = vmatprep.subr.mxu1 %v9669_v48  ;;  %v3103_v33 = vmul.f32 %v9078_v30, %v10670_v46 }
 0x846   : > { %9085 = vrcp.f32 %v3083_v32 }
 0x847   : > { %v9080_v34 = vpop.eup %9079  ;;  %8481 = vmatmul.mubr.msk.f32.vlgmr.msra.gmra.mrb[30].mxu1 %vm1063_vm2, %v3103_v33 }
 0x848   : > { %8489 = vmatpush3.msra.mxu1 %v3414_v14  ;;  %v3102_v35 = vmul.f32 %v9080_v34, %v10676_v51  ;;  %8490 = vmatprep.mubr.msk.f32.mxu1 %vm9670_vm1, %v9669_v48  ;;  %v3993_v52 = vpop.permute.xlu1 %3992 }
 0x849   : > { %v3089_v36 = vpop.xlane.xlu0 %3088  ;;  %8498 = vmatprep.subr.mxu1 %v9669_v48 }
 0x84a   : > { %9087 = vrcp.f32 %v3089_v36  ;;  %8476 = vmatmul.mubr.msk.f32.vlgmr.msra.gmra.mrb[28].mxu0 %vm1063_vm2, %v3102_v35 }
 0x84b   : > { %v9082_v37 = vpop.eup %9081  ;;  %8484 = vmatpush3.msra.mxu0 %v10703_v62  ;;  %8485 = vmatprep.mubr.msk.f32.mxu0 %vm9670_vm1, %v9669_v48 }
 0x84c   : > { %8493 = vmatprep.subr.mxu0 %v9669_v48  ;;  %v3104_v40 = vmul.f32 %v9082_v37, %v10681_v38 }
 0x84d   : > { %v3915_v20 = vpop.permute.xlu0 %3914 }
 0x84e   : > { %8486 = vmatmul.mubr.msk.f32.vlgmr.msra.gmra.mrb[30].mxu0 %vm1063_vm2, %v3104_v40 }
 0x84f   : > { %v9084_v41 = vpop.eup %9083  ;;  %8494 = vmatpush3.msra.mxu0 %v10707_v63  ;;  %8495 = vmatprep.mubr.msk.f32.mxu0 %vm9670_vm1, %v9669_v48 }
 0x850   : > { %v9086_v42 = vpop.eup %9085  ;;  %8503 = vmatprep.subr.mxu0 %v9669_v48  ;;  %v3106_v43 = vmul.f32 %v9084_v41, %v10685_v55 }
 0x851   : > { %v3105_v44 = vmul.f32 %v9086_v42, %v10687_v56  ;;  %v4073_v45 = vpop.permute.xlu0 %4072 }
 0x852   : > { %8496 = vmatmul.mubr.msk.f32.vlgmr.msra.gmra.mrb[32].mxu0 %vm1063_vm2, %v3106_v43 }
 0x853   : > { %8491 = vmatmul.mubr.msk.f32.vlgmr.msra.gmra.mrb[32].mxu1 %vm1063_vm2, %v3105_v44  ;;  %8504 = vmatpush3.msra.mxu0 %v10713_v1 }
 0x854   : > { %v9088_v46 = vpop.eup %9087  ;;  %8499 = vmatpush3.msra.mxu1 %v3566_v15  ;;  %8500 = vmatprep.mubr.msk.f32.mxu1 %vm9670_vm1, %v9669_v48 }
 0x855   : > { %v3107_v28 = vmul.f32 %v9088_v46, %v10693_v49  ;;  %8508 = vmatprep.subr.mxu1 %v9669_v48  ;;  %8505 = vmatprep.mubr.msk.f32.mxu0 %vm9670_vm1, %v9669_v48  ;;  %v4071_v21 = vpop.permute.xlu0 %4070 }
 0x856   : > { %8513 = vmatprep.subr.mxu0 %v9669_v48 }
 0x857   : > { %8501 = vmatmul.mubr.msk.f32.vlgmr.msra.gmra.mrb[34].mxu1 %vm1063_vm2, %v3107_v28 }
 0x858   : > { %8510 = vmatprep.mubr.msk.f32.mxu1 %vm9670_vm1, %v9669_v48 }
 0x859   : > { %v4229_v47 = vpop.permute.xlu0 %4228 }
 0x85b   : > { %8509 = vmatpush3.xpose.msk.msra.mxu1 %vm1063_vm2, %v10742_v16 }
 0x85c   : > { %8518 = vmatprep.subr.mxu1 %v9669_v48 }
 0x85d   : > { %v4227_v50 = vpop.permute.xlu0 %4226 }
 0x85e   : > { %8511 = vmatmul.mubr.msk.f32.vlgmr.msra.gmra.mrb[36].mxu1 %vm1063_vm2, %v10748_v17 }
 0x85f   : > { %8519 = vmatpush3.xpose.msk.msra.mxu1 %vm1063_vm2, %v10752_v18  ;;  %8520 = vmatprep.mubr.msk.f32.mxu1 %vm9670_vm1, %v9669_v48 }
 0x860   : > { %8528 = vmatprep.subr.mxu1 %v9669_v48 }
 0x861   : > { %v4479_v51 = vpop.permute.xlu0 %4478 }
 0x862   : > { %8521 = vmatmul.mubr.msk.f32.vlgmr.msra.gmra.mrb[38].mxu1 %vm1063_vm2, %v3915_v20 }
 0x863   : > { %8529 = vmatpush3.xpose.msk.msra.mxu1 %vm1063_vm2, %v4073_v45  ;;  %8530 = vmatprep.mubr.msk.f32.mxu1 %vm9670_vm1, %v9669_v48 }
 0x864   : > { %8538 = vmatprep.subr.mxu1 %v9669_v48 }
 0x866   : > { %8531 = vmatmul.mubr.msk.f32.vlgmr.msra.gmra.mrb[40].mxu1 %vm1063_vm2, %v4071_v21 }
 0x867   : > { %8539 = vmatpush3.xpose.msk.msra.mxu1 %vm1063_vm2, %v4229_v47  ;;  %8540 = vmatprep.mubr.msk.f32.mxu1 %vm9670_vm1, %v9669_v48 }
 0x868   : > { %8548 = vmatprep.subr.mxu1 %v9669_v48 }
 0x86a   : > { %8541 = vmatmul.mubr.msk.f32.vlgmr.msra.gmra.mrb[42].mxu1 %vm1063_vm2, %v4227_v50 }
 0x86b   : > { %8549 = vmatpush3.msra.mxu1 %v4479_v51  ;;  %8550 = vmatprep.mubr.msk.f32.mxu1 %vm9670_vm1, %v9669_v48 }
 0x86c   : > { %8558 = vmatprep.subr.mxu1 %v9669_v48 }
 0x891   : > { %v3092_v29 = vpop.xlane.xlu1 %3091 }
 0x892   : > { %9089 = vrcp.f32 %v3092_v29 }
 0x895   : > { %v4151_v53 = vpop.permute.xlu1 %4150 }
 0x899   : > { %v4149_v54 = vpop.permute.xlu1 %4148 }
 0x89c   : > { %v9090_v38 = vpop.eup %9089 }
 0x89d   : > { %v3108_v55 = vmul.f32 %v9090_v38, %v10730_v12  ;;  %v4307_v56 = vpop.permute.xlu1 %4306 }
 0x89f   : > { %8506 = vmatmul.mubr.msk.f32.vlgmr.msra.gmra.mrb[34].mxu0 %vm1063_vm2, %v3108_v55 }
 0x8a0   : > { %8514 = vmatpush3.xpose.msk.msra.mxu0 %vm1063_vm2, %v10717_v2  ;;  %8515 = vmatprep.mubr.msk.f32.mxu0 %vm9670_vm1, %v9669_v48 }
 0x8a1   : > { %8523 = vmatprep.subr.mxu0 %v9669_v48  ;;  %v4305_v57 = vpop.permute.xlu1 %4304 }
 0x8a3   : > { %8516 = vmatmul.mubr.msk.f32.vlgmr.msra.gmra.mrb[36].mxu0 %vm1063_vm2, %v10723_v5 }
 0x8a4   : > { %8524 = vmatpush3.xpose.msk.msra.mxu0 %vm1063_vm2, %v10758_v22  ;;  %8525 = vmatprep.mubr.msk.f32.mxu0 %vm9670_vm1, %v9669_v48 }
 0x8a5   : > { %8533 = vmatprep.subr.mxu0 %v9669_v48  ;;  %v4555_v39 = vpop.permute.xlu1 %4554 }
 0x8a7   : > { %8526 = vmatmul.mubr.msk.f32.vlgmr.msra.gmra.mrb[38].mxu0 %vm1063_vm2, %v3993_v52  ;;  %v10886_v52 = vpop.permute.xlu0 %4782 }
 0x8a8   : > { %8534 = vmatpush3.xpose.msk.msra.mxu0 %vm1063_vm2, %v4151_v53  ;;  %8535 = vmatprep.mubr.msk.f32.mxu0 %vm9670_vm1, %v9669_v48 }
 0x8a9   : > { %8543 = vmatprep.subr.mxu0 %v9669_v48 }
 0x8ab   : > { %8536 = vmatmul.mubr.msk.f32.vlgmr.msra.gmra.mrb[40].mxu0 %vm1063_vm2, %v4149_v54  ;;  %v10888_v29 = vpop.permute.xlu0 %4934 }
 0x8ac   : > { %8544 = vmatpush3.xpose.msk.msra.mxu0 %vm1063_vm2, %v4307_v56  ;;  %8545 = vmatprep.mubr.msk.f32.mxu0 %vm9670_vm1, %v9669_v48 }
 0x8ad   : > { %8553 = vmatprep.subr.mxu0 %v9669_v48 }
 0x8af   : > { %8546 = vmatmul.mubr.msk.f32.vlgmr.msra.gmra.mrb[42].mxu0 %vm1063_vm2, %v4305_v57  ;;  %v10894_v54 = vpop.permute.xlu0 %5129 }
 0x8b0   : > { %8554 = vmatpush3.msra.mxu0 %v4555_v39  ;;  %8555 = vmatprep.mubr.msk.f32.mxu0 %vm9670_vm1, %v9669_v48 }
 0x8b1   : > { %8563 = vmatprep.subr.mxu0 %v9669_v48 }
 0x8b3   : > { %v10896_v55 = vpop.permute.xlu0 %5127 }
 0x916   : > { %v10853_v49 = vpop.f32.mrb[28].mxu1 }
 0x917   : > { %v8472_v58 = vpop.f32.mrb[29].mxu1 }
 0x91a   : > { %v10855_v60 = vpop.f32.mrb[30].mxu1 }
 0x91b   : > { %v8482_v62 = vpop.f32.mrb[31].mxu1 }
 0x91d   : > { %v10857_v63 = vpop.f32.mrb[28].mxu0 }
 0x91e   : > { %v8477_v1 = vpop.f32.mrb[29].mxu0 }
 0x921   : > { %v10859_v2 = vpop.f32.mrb[30].mxu0 }
 0x922   : > { %v8487_v5 = vpop.f32.mrb[31].mxu0 }
 0x925   : > { %v10861_v6 = vpop.f32.mrb[32].mxu0 }
 0x926   : > { %v10863_v10 = vpop.f32.mrb[32].mxu1  ;;  %v8497_v11 = vpop.f32.mrb[33].mxu0 }
 0x927   : > { %v8492_v12 = vpop.f32.mrb[33].mxu1 }
 0x92a   : > { %v10865_v13 = vpop.f32.mrb[34].mxu1 }
 0x92b   : > { %v8502_v14 = vpop.f32.mrb[35].mxu1 }
 0x931   : > { %v3832_v15 = vpop.f32.mrb[36].mxu1 }
 0x932   : > { %v4382_v16 = vmul.f32 0.35355338, %v3832_v15  ;;  %v8512_v17 = vpop.f32.mrb[37].mxu1  ;;  %v4631_v15 = vpop.permute.xlu1 %4630 }
 0x934   : > { %v4390_v18 = vsel %vm1063_vm2, %v4382_v16, -inf }
 0x935   : > { %4391 = vmax.xlane.f32.xlu0 %v4390_v18  ;;  %v3988_v19 = vpop.f32.mrb[38].mxu1 }
 0x936   : > { %v4384_v22 = vmul.f32 0.35355338, %v3988_v19  ;;  %v8522_v23 = vpop.f32.mrb[39].mxu1  ;;  %v10903_v17 = vpop.permute.xlu1 %4706 }
 0x938   : > { %v4396_v24 = vsel %vm1063_vm2, %v4384_v22, -inf }
 0x939   : > { %4397 = vmax.xlane.f32.xlu0 %v4396_v24  ;;  %v4144_v25 = vpop.f32.mrb[40].mxu1 }
 0x93a   : > { %v8532_v26 = vpop.f32.mrb[41].mxu1  ;;  %v4386_v41 = vmul.f32 0.35355338, %v4144_v25 }
 0x93c   : > { %v4402_v21 = vsel %vm1063_vm2, %v4386_v41, -inf }
 0x93d   : > { %v4300_v27 = vpop.f32.mrb[42].mxu1 }
 0x93e   : > { %v8542_v30 = vpop.f32.mrb[43].mxu1  ;;  %v10875_v46 = vmul.f32 0.35355338, %v4300_v27 }
 0x940   : > { %v4408_v51 = vsel %vm1063_vm2, %v10875_v46, -inf }
 0x972   : > { %v10869_v31 = vpop.f32.mrb[34].mxu0 }
 0x973   : > { %v8507_v32 = vpop.f32.mrb[35].mxu0 }
 0x976   : > { %v3910_v33 = vpop.f32.mrb[36].mxu0 }
 0x977   : > { %v4383_v34 = vmul.f32 0.35355338, %v3910_v33  ;;  %v8517_v35 = vpop.f32.mrb[37].mxu0 }
 0x979   : > { %v4393_v36 = vsel %vm1063_vm2, %v4383_v34, -inf }
 0x97a   : > { %4394 = vmax.xlane.f32.xlu1 %v4393_v36  ;;  %v4066_v37 = vpop.f32.mrb[38].mxu0 }
 0x97b   : > { %v4385_v40 = vmul.f32 0.35355338, %v4066_v37  ;;  %v8527_v20 = vpop.f32.mrb[39].mxu0 }
 0x97d   : > { %v4399_v42 = vsel %vm1063_vm2, %v4385_v40, -inf }
 0x97e   : > { %v4222_v43 = vpop.f32.mrb[40].mxu0  ;;  %4400 = vmax.xlane.f32.xlu0 %v4399_v42 }
 0x97f   : > { %v10873_v44 = vmul.f32 0.35355338, %v4222_v43  ;;  %v8537_v45 = vpop.f32.mrb[41].mxu0 }
 0x981   : > { %v4405_v28 = vsel %vm1063_vm2, %v10873_v44, -inf }
 0x982   : > { %4406 = vmax.xlane.f32.xlu1 %v4405_v28  ;;  %v4378_v47 = vpop.f32.mrb[42].mxu0  ;;  %4403 = vmax.xlane.f32.xlu0 %v4402_v21 }
 0x983   : > { %v8547_v50 = vpop.f32.mrb[43].mxu0  ;;  %v10890_v53 = vmul.f32 0.35355338, %v4378_v47 }
 0x985   : > { %v4411_v38 = vsel %vm1063_vm2, %v10890_v53, -inf }
 0x986   : > { %4409 = vmax.xlane.f32.xlu0 %v4408_v51 }
 0x993   : > { %5363 = vrot.lane.b32.xlu1 %v10379_v3, %s9679_s16 }
 0x99c   : > { %5285 = vrot.lane.b32.xlu0 %v10376_v0, %s9679_s16 }
 0x9b7   : > { %4412 = vmax.xlane.f32.xlu1 %v4411_v38 }
 0x9c2   : > { %v4392_v56 = vpop.xlane.xlu0 %4391 }
 0x9c3   : > { %v4414_v57 = vsub.f32 %v4382_v16, %v4392_v56  ;;  %v10905_v16 = vpop.permute.xlu1 %4858 }
 0x9c5   : > { %v4422_v39 = vmul.f32 1.442695, %v4414_v57 }
 0x9c6   : > { %v4398_v58 = vpop.xlane.xlu0 %4397 }
 0x9c7   : > { %9091 = vpow2.f32 %v4422_v39  ;;  %v4416_v62 = vsub.f32 %v4384_v22, %v4398_v58  ;;  %v10907_v18 = vpop.permute.xlu1 %5010 }
 0x9c9   : > { %v4426_v1 = vmul.f32 1.442695, %v4416_v62 }
 0x9cb   : > { %9093 = vpow2.f32 %v4426_v1  ;;  %v10909_v19 = vpop.permute.xlu1 %5207 }
 0x9cf   : > { %v10911_v22 = vpop.permute.xlu1 %5205 }
 0x9d1   : > { %v9092_v5 = vpop.eup %9091 }
 0x9d2   : > { %v4438_v11 = vsel %vm1063_vm2, %v9092_v5, 0.0 }
 0x9d3   : > { %4439 = vadd.xlane.f32.xlu0 %v4438_v11 }
 0x9d5   : > { %v10899_v12 = vpop.eup %9093 }
 0x9d6   : > { %v4444_v14 = vsel %vm1063_vm2, %v10899_v12, 0.0 }
 0x9d7   : > { %4445 = vadd.xlane.f32.xlu0 %v4444_v14 }
 0xa07   : > { %v4395_v23 = vpop.xlane.xlu1 %4394 }
 0xa08   : > { %v4415_v24 = vsub.f32 %v4383_v34, %v4395_v23 }
 0xa0a   : > { %v4424_v25 = vmul.f32 1.442695, %v4415_v24 }
 0xa0b   : > { %v4401_v26 = vpop.xlane.xlu0 %4400 }
 0xa0c   : > { %9095 = vpow2.f32 %v4424_v25  ;;  %v4417_v27 = vsub.f32 %v4385_v40, %v4401_v26 }
 0xa0e   : > { %v4428_v30 = vmul.f32 1.442695, %v4417_v27 }
 0xa0f   : > { %v4404_v32 = vpop.xlane.xlu0 %4403 }
 0xa10   : > { %9097 = vpow2.f32 %v4428_v30  ;;  %v4418_v33 = vsub.f32 %v4386_v41, %v4404_v32  ;;  %v4407_v41 = vpop.xlane.xlu1 %4406 }
 0xa11   : > { %v4419_v43 = vsub.f32 %v10873_v44, %v4407_v41 }
 0xa12   : > { %v4430_v35 = vmul.f32 1.442695, %v4418_v33 }
 0xa13   : > { %v4410_v45 = vpop.xlane.xlu0 %4409  ;;  %v4432_v28 = vmul.f32 1.442695, %v4419_v43 }
 0xa14   : > { %9099 = vpow2.f32 %v4430_v35  ;;  %v4420_v21 = vsub.f32 %v10875_v46, %v4410_v45  ;;  %v10943_v39 = vpop.permute.xlu1 %5363 }
 0xa15   : > { %9101 = vpow2.f32 %v4432_v28 }
 0xa16   : > { %v10913_v36 = vpop.eup %9095  ;;  %v4434_v47 = vmul.f32 1.442695, %v4420_v21 }
 0xa17   : > { %v4441_v37 = vsel %vm1063_vm2, %v10913_v36, 0.0  ;;  %v10939_v44 = vpop.permute.xlu0 %5285 }
 0xa18   : > { %4442 = vadd.xlane.f32.xlu1 %v4441_v37  ;;  %9103 = vpow2.f32 %v4434_v47 }
 0xa1a   : > { %v10917_v20 = vpop.eup %9097 }
 0xa1b   : > { %v4447_v34 = vsel %vm1063_vm2, %v10917_v20, 0.0 }
 0xa1c   : > { %4448 = vadd.xlane.f32.xlu1 %v4447_v34 }
 0xa1e   : > { %v10921_v42 = vpop.eup %9099 }
 0xa1f   : > { %v4450_v40 = vsel %vm1063_vm2, %v10921_v42, 0.0  ;;  %v10931_v50 = vpop.eup %9101 }
 0xa20   : > { %4451 = vadd.xlane.f32.xlu0 %v4450_v40  ;;  %v4453_v51 = vsel %vm1063_vm2, %v10931_v50, 0.0 }
 0xa22   : > { %v10935_v38 = vpop.eup %9103 }
 0xa23   : > { %v4456_v56 = vsel %vm1063_vm2, %v10935_v38, 0.0 }
 0xa2d   : > { %5361 = vrot.lane.b32.xlu1 %v10379_v3, %s9680_s23 }
 0xa36   : > { %5283 = vrot.lane.b32.xlu0 %v10376_v0, %s9680_s23 }
 0xa44   : > { %v4413_v1 = vpop.xlane.xlu1 %4412 }
 0xa45   : > { %v4421_v14 = vsub.f32 %v10890_v53, %v4413_v1 }
 0xa51   : > { %4454 = vadd.xlane.f32.xlu1 %v4453_v51 }
 0xa55   : > { %4457 = vadd.xlane.f32.xlu0 %v4456_v56 }
 0xa60   : > { %v4440_v57 = vpop.xlane.xlu0 %4439 }
 0xa61   : > { %9105 = vrcp.f32 %v4440_v57 }
 0xa62   : > { %5519 = vrot.lane.b32.xlu1 %v10385_v7, %s9679_s16 }
 0xa64   : > { %v4446_v46 = vpop.xlane.xlu0 %4445 }
 0xa65   : > { %9107 = vrcp.f32 %v4446_v46 }
 0xa6b   : > { %v9106_v58 = vpop.eup %9105  ;;  %5441 = vrot.lane.b32.xlu0 %v10381_v4, %s9679_s16 }
 0xa6c   : > { %v4470_v62 = vmul.f32 %v9106_v58, %v9092_v5  ;;  %v4436_v5 = vmul.f32 1.442695, %v4421_v14 }
 0xa6e   : > { %8551 = vmatmul.mubr.msk.f32.vlgmr.msra.gmra.mrb[44].mxu1 %vm1063_vm2, %v4470_v62  ;;  %9109 = vpow2.f32 %v4436_v5 }
 0xa6f   : > { %v9108_v11 = vpop.eup %9107  ;;  %8559 = vmatpush3.msra.mxu1 %v4631_v15  ;;  %8560 = vmatprep.mubr.msk.f32.mxu1 %vm9670_vm1, %v9669_v48 }
 0xa70   : > { %5439 = vrot.lane.b32.xlu0 %v10381_v4, %s9680_s23  ;;  %8568 = vmatprep.subr.mxu1 %v9669_v48  ;;  %v4472_v23 = vmul.f32 %v9108_v11, %v10899_v12 }
 0xa72   : > { %8561 = vmatmul.mubr.msk.f32.vlgmr.msra.gmra.mrb[46].mxu1 %vm1063_vm2, %v4472_v23 }
 0xa73   : > { %8569 = vmatpush3.msra.mxu1 %v10886_v52  ;;  %8570 = vmatprep.mubr.msk.f32.mxu1 %vm9670_vm1, %v9669_v48 }
 0xa74   : > { %5597 = vrot.lane.b32.xlu0 %v10387_v8, %s9679_s16  ;;  %8578 = vmatprep.subr.mxu1 %v9669_v48 }
 0xa78   : > { %5595 = vrot.lane.b32.xlu0 %v10387_v8, %s9680_s23  ;;  %v10964_v53 = vpop.eup %9109 }
 0xa79   : > { %v4459_v12 = vsel %vm1063_vm2, %v10964_v53, 0.0 }
 0xa86   : > { %4460 = vadd.xlane.f32.xlu1 %v4459_v12 }
 0xa97   : > { %5517 = vrot.lane.b32.xlu1 %v10385_v7, %s9680_s23 }
 0xa9b   : > { %5675 = vrot.lane.b32.xlu1 %v10391_v9, %s9679_s16 }
 0xa9f   : > { %5673 = vrot.lane.b32.xlu1 %v10391_v9, %s9680_s23 }
 0xaa5   : > { %v4443_v52 = vpop.xlane.xlu1 %4442 }
 0xaa6   : > { %9111 = vrcp.f32 %v4443_v52 }
 0xaa9   : > { %v4449_v15 = vpop.xlane.xlu1 %4448 }
 0xaaa   : > { %9113 = vrcp.f32 %v4449_v15 }
 0xaad   : > { %v4452_v24 = vpop.xlane.xlu0 %4451 }
 0xaae   : > { %9115 = vrcp.f32 %v4452_v24 }
 0xab0   : > { %v9112_v25 = vpop.eup %9111 }
 0xab1   : > { %v4471_v26 = vmul.f32 %v9112_v25, %v10913_v36 }
 0xab3   : > { %8556 = vmatmul.mubr.msk.f32.vlgmr.msra.gmra.mrb[44].mxu0 %vm1063_vm2, %v4471_v26 }
 0xab4   : > { %v9114_v27 = vpop.eup %9113  ;;  %8564 = vmatpush3.msra.mxu0 %v10903_v17  ;;  %8565 = vmatprep.mubr.msk.f32.mxu0 %vm9670_vm1, %v9669_v48  ;;  %v5362_v17 = vpop.permute.xlu1 %5361 }
 0xab5   : > { %8573 = vmatprep.subr.mxu0 %v9669_v48  ;;  %v4473_v30 = vmul.f32 %v9114_v27, %v10917_v20 }
 0xab7   : > { %8566 = vmatmul.mubr.msk.f32.vlgmr.msra.gmra.mrb[46].mxu0 %vm1063_vm2, %v4473_v30 }
 0xab8   : > { %8574 = vmatpush3.msra.mxu0 %v10905_v16  ;;  %8575 = vmatprep.mubr.msk.f32.mxu0 %vm9670_vm1, %v9669_v48  ;;  %v9116_v32 = vpop.eup %9115  ;;  %v5284_v16 = vpop.permute.xlu0 %5283 }
 0xab9   : > { %8583 = vmatprep.subr.mxu0 %v9669_v48  ;;  %v4474_v33 = vmul.f32 %v9116_v32, %v10921_v42 }
 0xabb   : > { %8571 = vmatmul.mubr.msk.f32.vlgmr.msra.gmra.mrb[48].mxu1 %vm1063_vm2, %v4474_v33 }
 0xabc   : > { %8579 = vmatpush3.msra.mxu1 %v10888_v29  ;;  %8580 = vmatprep.mubr.msk.f32.mxu1 %vm9670_vm1, %v9669_v48 }
 0xabd   : > { %8588 = vmatprep.subr.mxu1 %v9669_v48 }
 0xade   : > { %v4455_v35 = vpop.xlane.xlu1 %4454 }
 0xadf   : > { %9117 = vrcp.f32 %v4455_v35 }
 0xae2   : > { %v4458_v36 = vpop.xlane.xlu0 %4457  ;;  %v5520_v40 = vpop.permute.xlu1 %5519 }
 0xae3   : > { %9119 = vrcp.f32 %v4458_v36 }
 0xae6   : > { %v5442_v34 = vpop.permute.xlu0 %5441 }
 0xae9   : > { %v9118_v37 = vpop.eup %9117 }
 0xaea   : > { %v4475_v20 = vmul.f32 %v9118_v37, %v10931_v50 }
 0xaec   : > { %8576 = vmatmul.mubr.msk.f32.vlgmr.msra.gmra.mrb[48].mxu0 %vm1063_vm2, %v4475_v20 }
 0xaed   : > { %8584 = vmatpush3.msra.mxu0 %v10907_v18  ;;  %8585 = vmatprep.mubr.msk.f32.mxu0 %vm9670_vm1, %v9669_v48  ;;  %v9120_v29 = vpop.eup %9119  ;;  %v5440_v18 = vpop.permute.xlu0 %5439 }
 0xaee   : > { %8593 = vmatprep.subr.mxu0 %v9669_v48  ;;  %v4476_v42 = vmul.f32 %v9120_v29, %v10935_v38 }
 0xaf0   : > { %8581 = vmatmul.mubr.msk.f32.vlgmr.msra.gmra.mrb[50].mxu1 %vm1063_vm2, %v4476_v42 }
 0xaf1   : > { %8589 = vmatpush3.xpose.msk.msra.mxu1 %vm1063_vm2, %v10894_v54  ;;  %8590 = vmatprep.mubr.msk.f32.mxu1 %vm9670_vm1, %v9669_v48  ;;  %v5598_v54 = vpop.permute.xlu0 %5597 }
 0xaf2   : > { %8598 = vmatprep.subr.mxu1 %v9669_v48 }
 0xaf4   : > { %8591 = vmatmul.mubr.msk.f32.vlgmr.msra.gmra.mrb[52].mxu1 %vm1063_vm2, %v10896_v55 }
 0xaf5   : > { %8599 = vmatpush3.xpose.msk.msra.mxu1 %vm1063_vm2, %v10939_v44  ;;  %8600 = vmatprep.mubr.msk.f32.mxu1 %vm9670_vm1, %v9669_v48  ;;  %v5596_v55 = vpop.permute.xlu0 %5595 }
 0xaf6   : > { %8608 = vmatprep.subr.mxu1 %v9669_v48 }
 0xaf8   : > { %8601 = vmatmul.mubr.msk.f32.vlgmr.msra.gmra.mrb[54].mxu1 %vm1063_vm2, %v5284_v16 }
 0xaf9   : > { %8609 = vmatpush3.xpose.msk.msra.mxu1 %vm1063_vm2, %v5442_v34  ;;  %8610 = vmatprep.mubr.msk.f32.mxu1 %vm9670_vm1, %v9669_v48 }
 0xafa   : > { %8618 = vmatprep.subr.mxu1 %v9669_v48 }
 0xafc   : > { %8611 = vmatmul.mubr.msk.f32.vlgmr.msra.gmra.mrb[56].mxu1 %vm1063_vm2, %v5440_v18 }
 0xafd   : > { %8619 = vmatpush3.xpose.msk.msra.mxu1 %vm1063_vm2, %v5598_v54  ;;  %8620 = vmatprep.mubr.msk.f32.mxu1 %vm9670_vm1, %v9669_v48 }
 0xafe   : > { %8628 = vmatprep.subr.mxu1 %v9669_v48 }
 0xb00   : > { %8621 = vmatmul.mubr.msk.f32.vlgmr.msra.gmra.mrb[58].mxu1 %vm1063_vm2, %v5596_v55 }
 0xb01   : > { %8630 = vmatprep.mubr.msk.f32.mxu1 %vm9670_vm1, %v9669_v48 }
 0xb13   : > { %v4461_v41 = vpop.xlane.xlu1 %4460 }
 0xb14   : > { %9121 = vrcp.f32 %v4461_v41 }
 0xb17   : > { %v5518_v28 = vpop.permute.xlu1 %5517 }
 0xb1e   : > { %v9122_v43 = vpop.eup %9121 }
 0xb1f   : > { %v4477_v45 = vmul.f32 %v9122_v43, %v10964_v53 }
 0xb21   : > { %8586 = vmatmul.mubr.msk.f32.vlgmr.msra.gmra.mrb[50].mxu0 %vm1063_vm2, %v4477_v45 }
 0xb22   : > { %8594 = vmatpush3.xpose.msk.msra.mxu0 %vm1063_vm2, %v10909_v19  ;;  %8595 = vmatprep.mubr.msk.f32.mxu0 %vm9670_vm1, %v9669_v48  ;;  %v5676_v19 = vpop.permute.xlu1 %5675 }
 0xb23   : > { %8603 = vmatprep.subr.mxu0 %v9669_v48 }
 0xb25   : > { %8596 = vmatmul.mubr.msk.f32.vlgmr.msra.gmra.mrb[52].mxu0 %vm1063_vm2, %v10911_v22 }
 0xb26   : > { %8604 = vmatpush3.xpose.msk.msra.mxu0 %vm1063_vm2, %v10943_v39  ;;  %8605 = vmatprep.mubr.msk.f32.mxu0 %vm9670_vm1, %v9669_v48  ;;  %v5674_v22 = vpop.permute.xlu1 %5673 }
 0xb27   : > { %8613 = vmatprep.subr.mxu0 %v9669_v48 }
 0xb29   : > { %8606 = vmatmul.mubr.msk.f32.vlgmr.msra.gmra.mrb[54].mxu0 %vm1063_vm2, %v5362_v17 }
 0xb2a   : > { %8614 = vmatpush3.xpose.msk.msra.mxu0 %vm1063_vm2, %v5520_v40  ;;  %8615 = vmatprep.mubr.msk.f32.mxu0 %vm9670_vm1, %v9669_v48 }
 0xb2b   : > { %8623 = vmatprep.subr.mxu0 %v9669_v48 }
 0xb2d   : > { %8616 = vmatmul.mubr.msk.f32.vlgmr.msra.gmra.mrb[56].mxu0 %vm1063_vm2, %v5518_v28 }
 0xb2e   : > { %8624 = vmatpush3.xpose.msk.msra.mxu0 %vm1063_vm2, %v5676_v19  ;;  %8625 = vmatprep.mubr.msk.f32.mxu0 %vm9670_vm1, %v9669_v48 }
 0xb2f   : > { %8633 = vmatprep.subr.mxu0 %v9669_v48 }
 0xb31   : > { %8626 = vmatmul.mubr.msk.f32.vlgmr.msra.gmra.mrb[58].mxu0 %vm1063_vm2, %v5674_v22 }
 0xb32   : > { %8635 = vmatprep.mubr.msk.f32.mxu0 %vm9670_vm1, %v9669_v48 }
 0xb41   : > { %v11052_v21 = vpop.f32.mrb[44].mxu1 }
 0xb42   : > { %v8552_v47 = vpop.f32.mrb[45].mxu1 }
 0xb45   : > { %v11054_v50 = vpop.f32.mrb[46].mxu1 }
 0xb46   : > { %v8562_v51 = vpop.f32.mrb[47].mxu1 }
 0xb86   : > { %v11056_v38 = vpop.f32.mrb[44].mxu0 }
 0xb87   : > { %v8557_v56 = vpop.f32.mrb[45].mxu0 }
 0xb8a   : > { %v11058_v44 = vpop.f32.mrb[46].mxu0 }
 0xb8b   : > { %v8567_v57 = vpop.f32.mrb[47].mxu0 }
 0xb8e   : > { %v11060_v46 = vpop.f32.mrb[48].mxu1 }
 0xb8f   : > { %v8572_v39 = vpop.f32.mrb[49].mxu1 }
 0xbbf   : > { %v11062_v58 = vpop.f32.mrb[48].mxu0 }
 0xbc0   : > { %v8577_v62 = vpop.f32.mrb[49].mxu0 }
 0xbc3   : > { %v11064_v1 = vpop.f32.mrb[50].mxu1 }
 0xbc4   : > { %v8582_v11 = vpop.f32.mrb[51].mxu1 }
 0xbc7   : > { %v5201_v14 = vpop.f32.mrb[52].mxu1 }
 0xbc8   : > { %v5751_v23 = vmul.f32 0.35355338, %v5201_v14  ;;  %v8592_v5 = vpop.f32.mrb[53].mxu1 }
 0xbca   : > { %v5759_v53 = vsel %vm1063_vm2, %v5751_v23, -inf }
 0xbcb   : > { %5760 = vmax.xlane.f32.xlu0 %v5759_v53  ;;  %v5357_v12 = vpop.f32.mrb[54].mxu1 }
 0xbcc   : > { %v5753_v52 = vmul.f32 0.35355338, %v5357_v12  ;;  %v8602_v15 = vpop.f32.mrb[55].mxu1 }
 0xbce   : > { %v5765_v24 = vsel %vm1063_vm2, %v5753_v52, -inf }
 0xbcf   : > { %5766 = vmax.xlane.f32.xlu0 %v5765_v24  ;;  %v5513_v25 = vpop.f32.mrb[56].mxu1 }
 0xbd0   : > { %v8612_v26 = vpop.f32.mrb[57].mxu1  ;;  %v5755_v34 = vmul.f32 0.35355338, %v5513_v25 }
 0xbd2   : > { %v5771_v43 = vsel %vm1063_vm2, %v5755_v34, -inf }
 0xbd3   : > { %v5669_v27 = vpop.f32.mrb[58].mxu1 }
 0xbd4   : > { %v8622_v30 = vpop.f32.mrb[59].mxu1  ;;  %v5757_v40 = vmul.f32 0.35355338, %v5669_v27 }
 0xbd6   : > { %v5777_v47 = vsel %vm1063_vm2, %v5757_v40, -inf }
 0xbf4   : > { %v11068_v32 = vpop.f32.mrb[50].mxu0 }
 0xbf5   : > { %v8587_v33 = vpop.f32.mrb[51].mxu0 }
 0xbf8   : > { %v5279_v17 = vpop.f32.mrb[52].mxu0 }
 0xbf9   : > { %v5752_v35 = vmul.f32 0.35355338, %v5279_v17  ;;  %v8597_v16 = vpop.f32.mrb[53].mxu0 }
 0xbfb   : > { %v5762_v36 = vsel %vm1063_vm2, %v5752_v35, -inf }
 0xbfc   : > { %5763 = vmax.xlane.f32.xlu1 %v5762_v36  ;;  %v5435_v37 = vpop.f32.mrb[54].mxu0 }
 0xbfd   : > { %v5754_v20 = vmul.f32 0.35355338, %v5435_v37  ;;  %v8607_v29 = vpop.f32.mrb[55].mxu0 }
 0xbff   : > { %v5768_v42 = vsel %vm1063_vm2, %v5754_v20, -inf }
 0xc00   : > { %v5591_v18 = vpop.f32.mrb[56].mxu0  ;;  %5769 = vmax.xlane.f32.xlu0 %v5768_v42 }
 0xc01   : > { %v5756_v54 = vmul.f32 0.35355338, %v5591_v18  ;;  %v8617_v55 = vpop.f32.mrb[57].mxu0 }
 0xc03   : > { %v5774_v41 = vsel %vm1063_vm2, %v5756_v54, -inf }
 0xc04   : > { %5775 = vmax.xlane.f32.xlu1 %v5774_v41  ;;  %v5747_v45 = vpop.f32.mrb[58].mxu0  ;;  %5772 = vmax.xlane.f32.xlu0 %v5771_v43 }
 0xc05   : > { %v5758_v28 = vmul.f32 0.35355338, %v5747_v45  ;;  %v8627_v19 = vpop.f32.mrb[59].mxu0 }
 0xc07   : > { %v5780_v22 = vsel %vm1063_vm2, %v5758_v28, -inf }
 0xc08   : > { %5781 = vmax.xlane.f32.xlu1 %v5780_v22  ;;  %5778 = vmax.xlane.f32.xlu0 %v5777_v47 }
 0xc19   : > { %5923 = vrot.lane.b32.xlu1 %v10370_v59, %s9681_s21 }
 0xc1d   : > { %5999 = vrot.lane.b32.xlu1 %v10376_v0, %s9681_s21 }
 0xc1e   : > { %5847 = vrot.lane.b32.xlu0 %v10372_v61, %s9681_s21 }
 0xc21   : > { %6075 = vrot.lane.b32.xlu1 %v10379_v3, %s9681_s21 }
 0xc22   : > { %6151 = vrot.lane.b32.xlu0 %v10381_v4, %s9681_s21 }
 0xc25   : > { %6227 = vrot.lane.b32.xlu1 %v10385_v7, %s9681_s21 }
 0xc58   : > { %v5761_v51 = vpop.xlane.xlu0 %5760 }
 0xc59   : > { %v5783_v56 = vsub.f32 %v5751_v23, %v5761_v51 }
 0xc5b   : > { %v5791_v57 = vmul.f32 1.442695, %v5783_v56 }
 0xc5c   : > { %v5767_v39 = vpop.xlane.xlu0 %5766 }
 0xc5d   : > { %9123 = vpow2.f32 %v5791_v57  ;;  %v5785_v59 = vsub.f32 %v5753_v52, %v5767_v39 }
 0xc5f   : > { %v5795_v62 = vmul.f32 1.442695, %v5785_v59 }
 0xc61   : > { %9125 = vpow2.f32 %v5795_v62 }
 0xc67   : > { %v11088_v0 = vpop.eup %9123 }
 0xc68   : > { %v5807_v61 = vsel %vm1063_vm2, %v11088_v0, 0.0 }
 0xc69   : > { %5808 = vadd.xlane.f32.xlu0 %v5807_v61 }
 0xc6b   : > { %v11092_v3 = vpop.eup %9125 }
 0xc6c   : > { %v5813_v4 = vsel %vm1063_vm2, %v11092_v3, 0.0 }
 0xc6d   : > { %5814 = vadd.xlane.f32.xlu0 %v5813_v4 }
 0xc89   : > { %v5764_v7 = vpop.xlane.xlu1 %5763 }
 0xc8a   : > { %v5784_v11 = vsub.f32 %v5752_v35, %v5764_v7 }
 0xc8c   : > { %v5793_v14 = vmul.f32 1.442695, %v5784_v11 }
 0xc8d   : > { %v5770_v23 = vpop.xlane.xlu0 %5769 }
 0xc8e   : > { %9127 = vpow2.f32 %v5793_v14  ;;  %v5786_v5 = vsub.f32 %v5754_v20, %v5770_v23 }
 0xc90   : > { %v5797_v53 = vmul.f32 1.442695, %v5786_v5 }
 0xc91   : > { %v5776_v12 = vpop.xlane.xlu1 %5775  ;;  %v5773_v52 = vpop.xlane.xlu0 %5772 }
 0xc92   : > { %9129 = vpow2.f32 %v5797_v53  ;;  %v5788_v15 = vsub.f32 %v5756_v54, %v5776_v12  ;;  %v5787_v24 = vsub.f32 %v5755_v34, %v5773_v52 }
 0xc94   : > { %v5801_v25 = vmul.f32 1.442695, %v5788_v15  ;;  %v5799_v26 = vmul.f32 1.442695, %v5787_v24 }
 0xc95   : > { %v5782_v27 = vpop.xlane.xlu1 %5781  ;;  %v5779_v30 = vpop.xlane.xlu0 %5778 }
 0xc96   : > { %9131 = vpow2.f32 %v5801_v25  ;;  %v5790_v33 = vsub.f32 %v5758_v28, %v5782_v27  ;;  %v5789_v17 = vsub.f32 %v5757_v40, %v5779_v30 }
 0xc97   : > { %9133 = vpow2.f32 %v5799_v26 }
 0xc98   : > { %v11096_v16 = vpop.eup %9127  ;;  %v5805_v35 = vmul.f32 1.442695, %v5790_v33  ;;  %v5803_v36 = vmul.f32 1.442695, %v5789_v17 }
 0xc99   : > { %v5924_v37 = vpop.permute.xlu1 %5923  ;;  %v5848_v20 = vpop.permute.xlu0 %5847  ;;  %v5810_v29 = vsel %vm1063_vm2, %v11096_v16, 0.0 }
 0xc9a   : > { %9135 = vpow2.f32 %v5805_v35  ;;  %5811 = vadd.xlane.f32.xlu1 %v5810_v29  ;;  %8629 = vmatpush3.msra.mxu1 %v5848_v20  ;;  %v6506_v29 = vld [vmem:[#allocation16 + $0x10] sm:$0xff] }
 0xc9b   : > { %9137 = vpow2.f32 %v5803_v36  ;;  %8634 = vmatpush3.msra.mxu0 %v5924_v37  ;;  %8638 = vmatprep.subr.mxu1 %v9669_v48  ;;  %v6504_v36 = vld [vmem:[#allocation16] sm:$0xff]  ;;  %v6505_v37 = vld [vmem:[#allocation16 + $0x8] sm:$0xff] }
 0xc9c   : > { %v11101_v34 = vpop.eup %9129  ;;  %8643 = vmatprep.subr.mxu0 %v9669_v48  ;;  %v8767_v20 = vpack.c.bf16 %v6505_v37, %v6504_v36 }
 0xc9d   : > { %v5816_v42 = vsel %vm1063_vm2, %v11101_v34, 0.0 }
 0xc9e   : > { %5817 = vadd.xlane.f32.xlu1 %v5816_v42 }
 0xca0   : > { %v11106_v18 = vpop.eup %9131 }
 0xca1   : > { %v11108_v54 = vpop.eup %9133  ;;  %v5822_v55 = vsel %vm1063_vm2, %v11106_v18, 0.0 }
 0xca2   : > { %5823 = vadd.xlane.f32.xlu1 %v5822_v55  ;;  %v5819_v40 = vsel %vm1063_vm2, %v11108_v54, 0.0 }
 0xca3   : > { %5820 = vadd.xlane.f32.xlu0 %v5819_v40 }
 0xca4   : > { %v11114_v41 = vpop.eup %9135 }
 0xca5   : > { %v11116_v43 = vpop.eup %9137  ;;  %v5828_v45 = vsel %vm1063_vm2, %v11114_v41, 0.0 }
 0xca6   : > { %5829 = vadd.xlane.f32.xlu1 %v5828_v45  ;;  %v5825_v28 = vsel %vm1063_vm2, %v11116_v43, 0.0 }
 0xca7   : > { %5826 = vadd.xlane.f32.xlu0 %v5825_v28 }
 0xcb7   : > { %6379 = vrot.lane.b32.xlu1 %v10391_v9, %s9681_s21 }
 0xcbb   : > { %3727 = vrot.lane.b32.xlu1 %v10857_v63, %s9682_s28 }
 0xcbd   : > { %6303 = vrot.lane.b32.xlu0 %v10387_v8, %s9681_s21  ;;  %v6152_v8 = vpop.permute.xlu0 %6151 }
 0xcbf   : > { %5096 = vrot.lane.b32.xlu1 %v11056_v38, %s9683_s20 }
 0xcc1   : > { %3725 = vrot.lane.b32.xlu0 %v10853_v49, %s9682_s28 }
 0xcc3   : > { %3731 = vrot.lane.b32.xlu1 %v10859_v2, %s9682_s28  ;;  %v6000_v2 = vpop.permute.xlu1 %5999 }
 0xcc5   : > { %5094 = vrot.lane.b32.xlu0 %v11052_v21, %s9683_s20 }
 0xcc7   : > { %5100 = vrot.lane.b32.xlu1 %v11058_v44, %s9683_s20 }
 0xcc9   : > { %3729 = vrot.lane.b32.xlu0 %v10855_v60, %s9682_s28 }
 0xccb   : > { %3735 = vrot.lane.b32.xlu1 %v10861_v6, %s9682_s28 }
 0xccd   : > { %5098 = vrot.lane.b32.xlu0 %v11054_v50, %s9683_s20 }
 0xccf   : > { %5104 = vrot.lane.b32.xlu1 %v11062_v58, %s9683_s20 }
 0xcd1   : > { %3733 = vrot.lane.b32.xlu0 %v10863_v10, %s9682_s28 }
 0xcd3   : > { %3739 = vrot.lane.b32.xlu1 %v10869_v31, %s9682_s28 }
 0xcd5   : > { %5102 = vrot.lane.b32.xlu0 %v11060_v46, %s9683_s20 }
 0xcd7   : > { %5108 = vrot.lane.b32.xlu1 %v11068_v32, %s9683_s20 }
 0xcd9   : > { %3737 = vrot.lane.b32.xlu0 %v10865_v13, %s9682_s28  ;;  %v6076_v13 = vpop.permute.xlu1 %6075 }
 0xcdd   : > { %5106 = vrot.lane.b32.xlu0 %v11064_v1, %s9683_s20  ;;  %v6228_v31 = vpop.permute.xlu1 %6227 }
 0xcf6   : > { %v5809_v9 = vpop.xlane.xlu0 %5808 }
 0xcf7   : > { %9139 = vrcp.f32 %v5809_v9 }
 0xcfa   : > { %v5815_v49 = vpop.xlane.xlu0 %5814 }
 0xcfb   : > { %9141 = vrcp.f32 %v5815_v49 }
 0xd01   : > { %v9140_v60 = vpop.eup %9139 }
 0xd02   : > { %v5839_v63 = vmul.f32 %v9140_v60, %v11088_v0 }
 0xd04   : > { %8631 = vmatmul.mubr.msk.f32.vlgmr.msra.gmra.mrb[60].mxu1 %vm1063_vm2, %v5839_v63 }
 0xd05   : > { %v9142_v6 = vpop.eup %9141  ;;  %8639 = vmatpush3.msra.mxu1 %v6000_v2  ;;  %8640 = vmatprep.mubr.msk.f32.mxu1 %vm9670_vm1, %v9669_v48 }
 0xd06   : > { %v5841_v10 = vmul.f32 %v9142_v6, %v11092_v3  ;;  %8648 = vmatprep.subr.mxu1 %v9669_v48 }
 0xd08   : > { %8641 = vmatmul.mubr.msk.f32.vlgmr.msra.gmra.mrb[62].mxu1 %vm1063_vm2, %v5841_v10 }
 0xd09   : > { %8649 = vmatpush3.msra.mxu1 %v6152_v8  ;;  %8650 = vmatprep.mubr.msk.f32.mxu1 %vm9670_vm1, %v9669_v48 }
 0xd0a   : > { %8658 = vmatprep.subr.mxu1 %v9669_v48 }
 0xd27   : > { %v5812_v21 = vpop.xlane.xlu1 %5811 }
 0xd28   : > { %9143 = vrcp.f32 %v5812_v21 }
 0xd2b   : > { %v5818_v50 = vpop.xlane.xlu1 %5817 }
 0xd2c   : > { %9145 = vrcp.f32 %v5818_v50 }
 0xd2f   : > { %v5824_v38 = vpop.xlane.xlu1 %5823 }
 0xd30   : > { %9147 = vrcp.f32 %v5824_v38  ;;  %v5821_v44 = vpop.xlane.xlu0 %5820 }
 0xd31   : > { %9149 = vrcp.f32 %v5821_v44 }
 0xd32   : > { %v9144_v46 = vpop.eup %9143 }
 0xd33   : > { %v5840_v58 = vmul.f32 %v9144_v46, %v11096_v16  ;;  %v5830_v1 = vpop.xlane.xlu1 %5829 }
 0xd34   : > { %9151 = vrcp.f32 %v5830_v1  ;;  %v5827_v32 = vpop.xlane.xlu0 %5826 }
 0xd35   : > { %9153 = vrcp.f32 %v5827_v32  ;;  %8636 = vmatmul.mubr.msk.f32.vlgmr.msra.gmra.mrb[60].mxu0 %vm1063_vm2, %v5840_v58 }
 0xd36   : > { %v9146_v19 = vpop.eup %9145  ;;  %8644 = vmatpush3.msra.mxu0 %v6076_v13  ;;  %8645 = vmatprep.mubr.msk.f32.mxu0 %vm9670_vm1, %v9669_v48 }
 0xd37   : > { %v5842_v22 = vmul.f32 %v9146_v19, %v11101_v34  ;;  %v6380_v47 = vpop.permute.xlu1 %6379  ;;  %8653 = vmatprep.subr.mxu0 %v9669_v48  ;;  %v6507_v34 = vld [vmem:[#allocation16 + $0x18] sm:$0xff] }
 0xd38   : > { %v6304_v51 = vpop.permute.xlu0 %6303  ;;  %v8771_v42 = vpack.c.bf16 %v6507_v34, %v6506_v29  ;;  %v9209_v34 = vld [vmem:[%s10214_s12 + $0x38] sm:$0xff] }
 0xd39   : > { %8646 = vmatmul.mubr.msk.f32.vlgmr.msra.gmra.mrb[62].mxu0 %vm1063_vm2, %v5842_v22 }
 0xd3a   : > { %v9148_v56 = vpop.eup %9147  ;;  %8654 = vmatpush3.msra.mxu0 %v6228_v31  ;;  %8655 = vmatprep.mubr.msk.f32.mxu0 %vm9670_vm1, %v9669_v48 }
 0xd3b   : > { %v9150_v57 = vpop.eup %9149  ;;  %v5844_v39 = vmul.f32 %v9148_v56, %v11106_v18  ;;  %v3728_v59 = vpop.permute.xlu1 %3727  ;;  %8663 = vmatprep.subr.mxu0 %v9669_v48 }
 0xd3c   : > { %v5843_v62 = vmul.f32 %v9150_v57, %v11108_v54  ;;  %3751 = vst.msk [vmem:[#allocation6 + $0x8] sm:$0xff] %vm3749_vm3, %v3728_v59  ;;  %v3726_v0 = vpop.permute.xlu0 %3725  ;;  %v9203_v59 = vld [vmem:[%s10214_s12 + $0x8] sm:$0xff] }
 0xd3d   : > { %3750 = vst.msk [vmem:[#allocation6] sm:$0xff] %vm3749_vm3, %v3726_v0  ;;  %8656 = vmatmul.mubr.msk.f32.vlgmr.msra.gmra.mrb[64].mxu0 %vm1063_vm2, %v5844_v39  ;;  %v9204_v0 = vld [vmem:[%s10214_s12] sm:$0xff] }
 0xd3e   : > { %v9152_v61 = vpop.eup %9151  ;;  %8651 = vmatmul.mubr.msk.f32.vlgmr.msra.gmra.mrb[64].mxu1 %vm1063_vm2, %v5843_v62  ;;  %8664 = vmatpush3.msra.mxu0 %v6380_v47  ;;  %v8087_v47 = vld [vmem:[#allocation18] ss:$0 sm:$0xff] }
 0xd3f   : > { %v9154_v3 = vpop.eup %9153  ;;  %v5846_v4 = vmul.f32 %v9152_v61, %v11114_v41  ;;  %8659 = vmatpush3.msra.mxu1 %v6304_v51  ;;  %v5097_v7 = vpop.permute.xlu1 %5096  ;;  %8660 = vmatprep.mubr.msk.f32.mxu1 %vm9670_vm1, %v9669_v48 }
 0xd40   : > { %v5845_v11 = vmul.f32 %v9154_v3, %v11116_v43  ;;  %5120 = vst.msk [vmem:[#allocation6 + $0x8] sm:$0xff] %vm5118_vm4, %v5097_v7  ;;  %v5095_v14 = vpop.permute.xlu0 %5094  ;;  %8665 = vmatprep.mubr.msk.f32.mxu0 %vm9670_vm1, %v9669_v48  ;;  %8768 = vmatprep.subr.bf16.mxu1 %v8767_v20 }
 0xd41   : > { %5119 = vst.msk [vmem:[#allocation6] sm:$0xff] %vm5118_vm4, %v5095_v14  ;;  %8666 = vmatmul.mubr.msk.f32.vlgmr.msra.gmra.mrb[66].mxu0 %vm1063_vm2, %v5846_v4 }
 0xd42   : > { %8661 = vmatmul.mubr.msk.f32.vlgmr.msra.gmra.mrb[66].mxu1 %vm1063_vm2, %v5845_v11 }
 0xd43   : > { %v3732_v23 = vpop.permute.xlu1 %3731  ;;  %8770 = vmatpush3.bf16.msra.mxu1 %v8767_v20 }
 0xd44   : > { %3753 = vst.msk [vmem:[#allocation6 + $0x18] sm:$0xff] %vm3749_vm3, %v3732_v23  ;;  %v3730_v5 = vpop.permute.xlu0 %3729  ;;  %8772 = vmatprep.subr.bf16.mxu1 %v8771_v42 }
 0xd45   : > { %3752 = vst.msk [vmem:[#allocation6 + $0x10] sm:$0xff] %vm3749_vm3, %v3730_v5  ;;  %v9205_v5 = vld [vmem:[%s10214_s12 + $0x18] sm:$0xff] }
 0xd47   : > { %v5101_v53 = vpop.permute.xlu1 %5100  ;;  %8774 = vmatpush3.bf16.msra.mxu1 %v8771_v42 }
 0xd48   : > { %5122 = vst.msk [vmem:[#allocation6 + $0x18] sm:$0xff] %vm5118_vm4, %v5101_v53  ;;  %v5099_v12 = vpop.permute.xlu0 %5098 }
 0xd49   : > { %5121 = vst.msk [vmem:[#allocation6 + $0x10] sm:$0xff] %vm5118_vm4, %v5099_v12  ;;  %v9206_v12 = vld [vmem:[%s10214_s12 + $0x10] sm:$0xff] }
 0xd4b   : > { %v3736_v52 = vpop.permute.xlu1 %3735 }
 0xd4c   : > { %3755 = vst.msk [vmem:[#allocation6 + $0x28] sm:$0xff] %vm3749_vm3, %v3736_v52  ;;  %v3734_v48 = vpop.permute.xlu0 %3733 }
 0xd4d   : > { %3754 = vst.msk [vmem:[#allocation6 + $0x20] sm:$0xff] %vm3749_vm3, %v3734_v48 }
 0xd4f   : > { %v5105_v15 = vpop.permute.xlu1 %5104 }
 0xd50   : > { %5124 = vst.msk [vmem:[#allocation6 + $0x28] sm:$0xff] %vm5118_vm4, %v5105_v15  ;;  %v5103_v24 = vpop.permute.xlu0 %5102 }
 0xd51   : > { %5123 = vst.msk [vmem:[#allocation6 + $0x20] sm:$0xff] %vm5118_vm4, %v5103_v24 }
 0xd53   : > { %v3740_v25 = vpop.permute.xlu1 %3739 }
 0xd54   : > { %3757 = vst.msk [vmem:[#allocation6 + $0x38] sm:$0xff] %vm3749_vm3, %v3740_v25  ;;  %v3738_v26 = vpop.permute.xlu0 %3737 }
 0xd55   : > { %3756 = vst.msk [vmem:[#allocation6 + $0x30] sm:$0xff] %vm3749_vm3, %v3738_v26 }
 0xd57   : > { %v5109_v27 = vpop.permute.xlu1 %5108 }
 0xd58   : > { %5126 = vst.msk [vmem:[#allocation6 + $0x38] sm:$0xff] %vm5118_vm4, %v5109_v27  ;;  %v5107_v30 = vpop.permute.xlu0 %5106  ;;  %v9207_v27 = vld [vmem:[%s10214_s12 + $0x28] sm:$0xff] }
 0xd59   : > { %5125 = vst.msk [vmem:[#allocation6 + $0x30] sm:$0xff] %vm5118_vm4, %v5107_v30 }
 0xdd7   : > { %v5919_v33 = vpop.f32.mrb[60].mxu1 }
 0xdd8   : > { %6463 = vrot.lane.b32.xlu0 %v5919_v33, %s9684_s10  ;;  %v8632_v17 = vpop.f32.mrb[61].mxu1  ;;  %v9208_v33 = vld [vmem:[%s10214_s12 + $0x20] sm:$0xff] }
 0xddb   : > { %v6071_v16 = vpop.f32.mrb[62].mxu1 }
 0xddc   : > { %6467 = vrot.lane.b32.xlu0 %v6071_v16, %s9684_s10  ;;  %v8642_v35 = vpop.f32.mrb[63].mxu1 }
 0xe08   : > { %v5995_v18 = vpop.f32.mrb[60].mxu0 }
 0xe09   : > { %v8637_v54 = vpop.f32.mrb[61].mxu0  ;;  %6465 = vrot.lane.b32.xlu1 %v5995_v18, %s9684_s10  ;;  %v9210_v18 = vld [vmem:[%s10214_s12 + $0x30] sm:$0xff] }
 0xe0c   : > { %v6147_v55 = vpop.f32.mrb[62].mxu0 }
 0xe0d   : > { %6469 = vrot.lane.b32.xlu1 %v6147_v55, %s9684_s10  ;;  %v8647_v40 = vpop.f32.mrb[63].mxu0 }
 0xe10   : > { %v6299_v41 = vpop.f32.mrb[64].mxu0 }
 0xe11   : > { %v6223_v43 = vpop.f32.mrb[64].mxu1  ;;  %6473 = vrot.lane.b32.xlu1 %v6299_v41, %s9684_s10  ;;  %v8657_v45 = vpop.f32.mrb[65].mxu0 }
 0xe12   : > { %6471 = vrot.lane.b32.xlu0 %v6223_v43, %s9684_s10  ;;  %v8652_v28 = vpop.f32.mrb[65].mxu1 }
 0xe14   : > { %v6451_v8 = vpop.f32.mrb[66].mxu0 }
 0xe15   : > { %v6375_v9 = vpop.f32.mrb[66].mxu1  ;;  %6477 = vrot.lane.b32.xlu1 %v6451_v8, %s9684_s10  ;;  %v8667_v49 = vpop.f32.mrb[67].mxu0 }
 0xe16   : > { %6475 = vrot.lane.b32.xlu0 %v6375_v9, %s9684_s10  ;;  %v8662_v60 = vpop.f32.mrb[67].mxu1 }
 0xe4a   : > { %v6464_v63 = vpop.permute.xlu0 %6463 }
 0xe4b   : > { %6488 = vst.msk [vmem:[#allocation6] sm:$0xff] %vm6487_vm5, %v6464_v63 }
 0xe4e   : > { %v6468_v2 = vpop.permute.xlu0 %6467 }
 0xe4f   : > { %6490 = vst.msk [vmem:[#allocation6 + $0x10] sm:$0xff] %vm6487_vm5, %v6468_v2 }
 0xe52   : > { %v6496_v6 = vld [vmem:[#allocation6] sm:$0xff] }
 0xe53   : > { %8676 = vmatprep.mubr.msk.f32.mxu1 %vm786_vm0, %v6496_v6 }
 0xe56   : > { %v6498_v38 = vld [vmem:[#allocation6 + $0x10] sm:$0xff] }
 0xe7b   : > { %v6466_v10 = vpop.permute.xlu1 %6465 }
 0xe7c   : > { %6489 = vst.msk [vmem:[#allocation6 + $0x8] sm:$0xff] %vm6487_vm5, %v6466_v10 }
 0xe7f   : > { %v6470_v13 = vpop.permute.xlu1 %6469 }
 0xe80   : > { %6491 = vst.msk [vmem:[#allocation6 + $0x18] sm:$0xff] %vm6487_vm5, %v6470_v13 }
 0xe83   : > { %v6474_v31 = vpop.permute.xlu1 %6473  ;;  %v6497_v21 = vld [vmem:[#allocation6 + $0x8] sm:$0xff] }
 0xe84   : > { %6493 = vst.msk [vmem:[#allocation6 + $0x28] sm:$0xff] %vm6487_vm5, %v6474_v31  ;;  %v6472_v50 = vpop.permute.xlu0 %6471  ;;  %8677 = vmatmul.mubr.msk.f32.vlgmr.msra.gmra.mrb[68].mxu1 %vm786_vm0, %v6497_v21 }
 0xe85   : > { %6492 = vst.msk [vmem:[#allocation6 + $0x20] sm:$0xff] %vm6487_vm5, %v6472_v50  ;;  %8679 = vmatprep.mubr.msk.f32.mxu1 %vm786_vm0, %v6498_v38 }
 0xe87   : > { %v6478_v44 = vpop.permute.xlu1 %6477  ;;  %v6499_v46 = vld [vmem:[#allocation6 + $0x18] sm:$0xff] }
 0xe88   : > { %6495 = vst.msk [vmem:[#allocation6 + $0x38] sm:$0xff] %vm6487_vm5, %v6478_v44  ;;  %v6476_v58 = vpop.permute.xlu0 %6475  ;;  %8680 = vmatmul.mubr.msk.f32.gmra.mrb[70].mxu1 %vm786_vm0, %v6499_v46 }
 0xe89   : > { %6494 = vst.msk [vmem:[#allocation6 + $0x30] sm:$0xff] %vm6487_vm5, %v6476_v58 }
 0xe8b   : > { %v6501_v1 = vld [vmem:[#allocation6 + $0x28] sm:$0xff] }
 0xe8c   : > { %v6500_v32 = vld [vmem:[#allocation6 + $0x20] sm:$0xff] }
 0xe8d   : > { %8682 = vmatprep.mubr.msk.f32.mxu1 %vm786_vm0, %v6500_v32 }
 0xe8e   : > { %8683 = vmatmul.mubr.msk.f32.gmra.mrb[72].mxu1 %vm786_vm0, %v6501_v1 }
 0xe8f   : > { %v6503_v19 = vld [vmem:[#allocation6 + $0x38] sm:$0xff] }
 0xe90   : > { %v6502_v22 = vld [vmem:[#allocation6 + $0x30] sm:$0xff] }
 0xe91   : > { %8685 = vmatprep.mubr.msk.f32.mxu1 %vm786_vm0, %v6502_v22 }
 0xe92   : > { %8686 = vmatmul.mubr.msk.f32.gmra.mrb[74].mxu1 %vm786_vm0, %v6503_v19 }
 0xf57   : > { %v8678_v51 = vpop.f32.mrb[68].mxu1 }
 0xf58   : > { %v6611_v56 = vadd.f32 %v8678_v51, %v8087_v47  ;;  %v6605_v57 = vpop.f32.mrb[69].mxu1 }
 0xf59   : > { %v6606_v39 = vadd.f32 %v8087_v47, %v6605_v57 }
 0xf5a   : > { %v6645_v62 = vadd.f32 %v9203_v59, %v6611_v56 }
 0xf5b   : > { %v6644_v61 = vadd.f32 %v9204_v0, %v6606_v39  ;;  %v8681_v3 = vpop.f32.mrb[70].mxu1 }
 0xf5c   : > { %6653 = vst.msk [vmem:[#allocation2 + $0x8] sm:$0xff] %vm786_vm0, %v6645_v62  ;;  %v6621_v4 = vadd.f32 %v8681_v3, %v8087_v47  ;;  %v6615_v7 = vpop.f32.mrb[71].mxu1  ;;  %v6665_v11 = vsel %vm786_vm0, %v6645_v62, 0.0 }
 0xf5d   : > { %6652 = vst.msk [vmem:[#allocation2] sm:$0xff] %vm786_vm0, %v6644_v61  ;;  %v6616_v14 = vadd.f32 %v8087_v47, %v6615_v7  ;;  %6666 = vadd.xlane.f32.xlu1 %v6665_v11  ;;  %v6662_v23 = vsel %vm786_vm0, %v6644_v61, 0.0 }
 0xf5e   : > { %v6647_v53 = vadd.f32 %v9205_v5, %v6621_v4  ;;  %6663 = vadd.xlane.f32.xlu0 %v6662_v23 }
 0xf5f   : > { %v6646_v52 = vadd.f32 %v9206_v12, %v6616_v14  ;;  %v6802_v12 = vld [vmem:[%s11736_s13] sm:$0xff] }
 0xf60   : > { %6655 = vst.msk [vmem:[#allocation2 + $0x18] sm:$0xff] %vm786_vm0, %v6647_v53  ;;  %v6671_v48 = vsel %vm786_vm0, %v6647_v53, 0.0 }
 0xf61   : > { %6654 = vst.msk [vmem:[#allocation2 + $0x10] sm:$0xff] %vm786_vm0, %v6646_v52  ;;  %v8684_v15 = vpop.f32.mrb[72].mxu1  ;;  %v6668_v35 = vsel %vm786_vm0, %v6646_v52, 0.0 }
 0xf62   : > { %v6631_v24 = vadd.f32 %v8684_v15, %v8087_v47  ;;  %v6625_v25 = vpop.f32.mrb[73].mxu1  ;;  %6672 = vadd.xlane.f32.xlu0 %v6671_v48  ;;  %v6804_v15 = vld [vmem:[%s11736_s13 + $0x10] sm:$0xff] }
 0xf63   : > { %v6626_v26 = vadd.f32 %v8087_v47, %v6625_v25 }
 0xf64   : > { %v6649_v30 = vadd.f32 %v9207_v27, %v6631_v24  ;;  %v6805_v24 = vld [vmem:[%s11736_s13 + $0x18] sm:$0xff] }
 0xf65   : > { %v6648_v17 = vadd.f32 %v9208_v33, %v6626_v26  ;;  %v8687_v16 = vpop.f32.mrb[74].mxu1  ;;  %v8779_v25 = vpack.c.bf16 %v6805_v24, %v6804_v15 }
 0xf66   : > { %6657 = vst.msk [vmem:[#allocation2 + $0x28] sm:$0xff] %vm786_vm0, %v6649_v30  ;;  %v6641_v36 = vadd.f32 %v8687_v16, %v8087_v47  ;;  %v6635_v37 = vpop.f32.mrb[75].mxu1  ;;  %6669 = vadd.xlane.f32.xlu0 %v6668_v35  ;;  %v6677_v20 = vsel %vm786_vm0, %v6649_v30, 0.0 }
 0xf67   : > { %6656 = vst.msk [vmem:[#allocation2 + $0x20] sm:$0xff] %vm786_vm0, %v6648_v17  ;;  %v6636_v29 = vadd.f32 %v8087_v47, %v6635_v37  ;;  %6678 = vadd.xlane.f32.xlu1 %v6677_v20  ;;  %v6674_v55 = vsel %vm786_vm0, %v6648_v17, 0.0 }
 0xf68   : > { %v6651_v42 = vadd.f32 %v9209_v34, %v6641_v36 }
 0xf69   : > { %v6650_v54 = vadd.f32 %v9210_v18, %v6636_v29 }
 0xf6a   : > { %6659 = vst.msk [vmem:[#allocation2 + $0x38] sm:$0xff] %vm786_vm0, %v6651_v42  ;;  %6675 = vadd.xlane.f32.xlu0 %v6674_v55  ;;  %v6683_v40 = vsel %vm786_vm0, %v6651_v42, 0.0 }
 0xf6b   : > { %6658 = vst.msk [vmem:[#allocation2 + $0x30] sm:$0xff] %vm786_vm0, %v6650_v54  ;;  %6684 = vadd.xlane.f32.xlu1 %v6683_v40  ;;  %v6680_v41 = vsel %vm786_vm0, %v6650_v54, 0.0 }
 0xf6e   : > { %6681 = vadd.xlane.f32.xlu0 %v6680_v41 }
 0xfea   : > { %v6667_v43 = vpop.xlane.xlu1 %6666 }
 0xfeb   : > { %v6687_v45 = vmul.f32 0.03125, %v6667_v43  ;;  %v6664_v28 = vpop.xlane.xlu0 %6663 }
 0xfec   : > { %v6686_v8 = vmul.f32 0.03125, %v6664_v28  ;;  %v8096_v28 = vld [vmem:[#allocation12] ss:$0 sm:$0xff] }
 0xfed   : > { %v11238_v9 = vsub.f32 %v6645_v62, %v6687_v45 }
 0xfee   : > { %v11240_v49 = vsub.f32 %v6644_v61, %v6686_v8 }
 0xfef   : > { %v6673_v60 = vpop.xlane.xlu0 %6672  ;;  %v6703_v63 = vmul.f32 %v11238_v9, %v11238_v9 }
 0xff0   : > { %v6689_v2 = vmul.f32 0.03125, %v6673_v60  ;;  %v6702_v6 = vmul.f32 %v11240_v49, %v11240_v49 }
 0xff1   : > { %v6713_v10 = vsel %vm786_vm0, %v6703_v63, 0.0 }
 0xff2   : > { %v11247_v13 = vsub.f32 %v6647_v53, %v6689_v2  ;;  %6714 = vadd.xlane.f32.xlu1 %v6713_v10  ;;  %v6710_v31 = vsel %vm786_vm0, %v6702_v6, 0.0  ;;  %v8097_v10 = vld [vmem:[#allocation13] ss:$0 sm:$0xff] }
 0xff3   : > { %6711 = vadd.xlane.f32.xlu0 %v6710_v31  ;;  %v6670_v21 = vpop.xlane.xlu0 %6669 }
 0xff4   : > { %v6679_v50 = vpop.xlane.xlu1 %6678  ;;  %v6688_v38 = vmul.f32 0.03125, %v6670_v21  ;;  %v6705_v44 = vmul.f32 %v11247_v13, %v11247_v13 }
 0xff5   : > { %v6691_v46 = vmul.f32 0.03125, %v6679_v50 }
 0xff6   : > { %v11252_v58 = vsub.f32 %v6646_v52, %v6688_v38  ;;  %v6719_v1 = vsel %vm786_vm0, %v6705_v44, 0.0  ;;  %v6803_v52 = vld [vmem:[%s11736_s13 + $0x8] sm:$0xff] }
 0xff7   : > { %v11255_v32 = vsub.f32 %v6649_v30, %v6691_v46  ;;  %6720 = vadd.xlane.f32.xlu1 %v6719_v1  ;;  %v6676_v19 = vpop.xlane.xlu0 %6675  ;;  %v8775_v48 = vpack.c.bf16 %v6803_v52, %v6802_v12  ;;  %v8098_v52 = vld [vmem:[#allocation19] ss:$0 sm:$0xff] }
 0xff8   : > { %v6685_v22 = vpop.xlane.xlu1 %6684  ;;  %v6690_v47 = vmul.f32 0.03125, %v6676_v19  ;;  %v6704_v51 = vmul.f32 %v11252_v58, %v11252_v58 }
 0xff9   : > { %v6693_v56 = vmul.f32 0.03125, %v6685_v22  ;;  %v6707_v57 = vmul.f32 %v11255_v32, %v11255_v32  ;;  %8776 = vmatprep.subr.bf16.mxu0 %v8775_v48 }
 0xffa   : > { %v11261_v39 = vsub.f32 %v6648_v17, %v6690_v47  ;;  %v6716_v59 = vsel %vm786_vm0, %v6704_v51, 0.0  ;;  %8778 = vmatpush3.bf16.msra.mxu0 %v8775_v48 }
 0xffb   : > { %v11264_v62 = vsub.f32 %v6651_v42, %v6693_v56  ;;  %v6725_v0 = vsel %vm786_vm0, %v6707_v57, 0.0  ;;  %6717 = vadd.xlane.f32.xlu0 %v6716_v59  ;;  %v6682_v61 = vpop.xlane.xlu0 %6681  ;;  %8780 = vmatprep.subr.bf16.mxu0 %v8779_v25 }
 0xffc   : > { %6726 = vadd.xlane.f32.xlu1 %v6725_v0  ;;  %v6692_v3 = vmul.f32 0.03125, %v6682_v61  ;;  %v6706_v4 = vmul.f32 %v11261_v39, %v11261_v39 }
 0xffd   : > { %v6709_v7 = vmul.f32 %v11264_v62, %v11264_v62 }
 0xffe   : > { %v11271_v11 = vsub.f32 %v6650_v54, %v6692_v3  ;;  %v6722_v14 = vsel %vm786_vm0, %v6706_v4, 0.0  ;;  %8782 = vmatpush3.bf16.msra.mxu0 %v8779_v25 }
 0xfff   : > { %v6731_v23 = vsel %vm786_vm0, %v6709_v7, 0.0  ;;  %6723 = vadd.xlane.f32.xlu0 %v6722_v14 }
0x1000   : > { %6732 = vadd.xlane.f32.xlu1 %v6731_v23  ;;  %v6708_v5 = vmul.f32 %v11271_v11, %v11271_v11 }
0x1002   : > { %v6728_v53 = vsel %vm786_vm0, %v6708_v5, 0.0 }
0x1003   : > { %6729 = vadd.xlane.f32.xlu0 %v6728_v53 }
0x107f   : > { %v6715_v26 = vpop.xlane.xlu1 %6714 }
0x1080   : > { %v6735_v27 = vmul.f32 0.03125, %v6715_v26  ;;  %v6712_v30 = vpop.xlane.xlu0 %6711 }
0x1081   : > { %v6734_v33 = vmul.f32 0.03125, %v6712_v30 }
0x1082   : > { %v6743_v17 = vadd.f32 1e-05, %v6735_v27 }
0x1083   : > { %v6742_v16 = vadd.f32 1e-05, %v6734_v33 }
0x1084   : > { %9155 = vrsqrt.f32 %v6743_v17  ;;  %v6721_v35 = vpop.xlane.xlu1 %6720 }
0x1085   : > { %9157 = vrsqrt.f32 %v6742_v16  ;;  %v6737_v36 = vmul.f32 0.03125, %v6721_v35 }
0x1087   : > { %v6745_v37 = vadd.f32 1e-05, %v6737_v36 }
0x1088   : > { %v6718_v20 = vpop.xlane.xlu0 %6717 }
0x1089   : > { %9159 = vrsqrt.f32 %v6745_v37  ;;  %v6727_v29 = vpop.xlane.xlu1 %6726  ;;  %v6736_v34 = vmul.f32 0.03125, %v6718_v20 }
0x108a   : > { %v6739_v42 = vmul.f32 0.03125, %v6727_v29 }
0x108b   : > { %v6744_v18 = vadd.f32 1e-05, %v6736_v34 }
0x108c   : > { %v6747_v54 = vadd.f32 1e-05, %v6739_v42  ;;  %v6724_v55 = vpop.xlane.xlu0 %6723 }
0x108d   : > { %9161 = vrsqrt.f32 %v6744_v18  ;;  %v6733_v40 = vpop.xlane.xlu1 %6732  ;;  %v6738_v41 = vmul.f32 0.03125, %v6724_v55 }
0x108e   : > { %v9156_v43 = vpop.eup %9155  ;;  %9163 = vrsqrt.f32 %v6747_v54  ;;  %v6741_v45 = vmul.f32 0.03125, %v6733_v40 }
0x108f   : > { %v9158_v8 = vpop.eup %9157  ;;  %v6759_v60 = vmul.f32 %v9156_v43, %v11238_v9  ;;  %v6746_v63 = vadd.f32 1e-05, %v6738_v41 }
0x1090   : > { %v6749_v2 = vadd.f32 1e-05, %v6741_v45  ;;  %v6730_v6 = vpop.xlane.xlu0 %6729  ;;  %v6758_v31 = vmul.f32 %v9158_v8, %v11240_v49 }
0x1091   : > { %9165 = vrsqrt.f32 %v6746_v63  ;;  %v6740_v21 = vmul.f32 0.03125, %v6730_v6  ;;  %v6773_v50 = vmul.f32 %v8096_v28, %v6759_v60 }
0x1092   : > { %9167 = vrsqrt.f32 %v6749_v2  ;;  %v6772_v38 = vmul.f32 %v8096_v28, %v6758_v31 }
0x1093   : > { %v9160_v44 = vpop.eup %9159  ;;  %v6748_v46 = vadd.f32 1e-05, %v6740_v21  ;;  %v6787_v1 = vadd.f32 %v8097_v10, %v6773_v50 }
0x1094   : > { %v6786_v19 = vadd.f32 %v8097_v10, %v6772_v38  ;;  %v6761_v22 = vmul.f32 %v9160_v44, %v11247_v13 }
0x1095   : > { %9169 = vrsqrt.f32 %v6748_v46  ;;  %6795 = vst.msk [vmem:[#allocation3 + $0x8] sm:$0xff] %vm786_vm0, %v6787_v1 }
0x1096   : > { %6794 = vst.msk [vmem:[#allocation3] sm:$0xff] %vm786_vm0, %v6786_v19  ;;  %8696 = vmatprep.mubr.msk.f32.mxu0 %vm786_vm0, %v6786_v19  ;;  %v6775_v9 = vmul.f32 %v8096_v28, %v6761_v22 }
0x1097   : > { %v9162_v49 = vpop.eup %9161  ;;  %8697 = vmatmul.mubr.msk.f32.vlgmr.msra.gmra.mrb[68].mxu0 %vm786_vm0, %v6787_v1 }
0x1098   : > { %v9164_v47 = vpop.eup %9163  ;;  %v6760_v51 = vmul.f32 %v9162_v49, %v11252_v58  ;;  %v6789_v56 = vadd.f32 %v8097_v10, %v6775_v9 }
0x1099   : > { %v6763_v57 = vmul.f32 %v9164_v47, %v11255_v32 }
0x109a   : > { %v6774_v59 = vmul.f32 %v8096_v28, %v6760_v51  ;;  %6797 = vst.msk [vmem:[#allocation3 + $0x18] sm:$0xff] %vm786_vm0, %v6789_v56 }
0x109b   : > { %v9166_v13 = vpop.eup %9165  ;;  %v6777_v0 = vmul.f32 %v8096_v28, %v6763_v57 }
0x109c   : > { %v9168_v61 = vpop.eup %9167  ;;  %v6788_v3 = vadd.f32 %v8097_v10, %v6774_v59  ;;  %v6762_v4 = vmul.f32 %v9166_v13, %v11261_v39 }
0x109d   : > { %v6791_v7 = vadd.f32 %v8097_v10, %v6777_v0  ;;  %v6765_v14 = vmul.f32 %v9168_v61, %v11264_v62 }
0x109e   : > { %6796 = vst.msk [vmem:[#allocation3 + $0x10] sm:$0xff] %vm786_vm0, %v6788_v3  ;;  %8699 = vmatprep.mubr.msk.f32.mxu0 %vm786_vm0, %v6788_v3  ;;  %v6776_v58 = vmul.f32 %v8096_v28, %v6762_v4 }
0x109f   : > { %v9170_v23 = vpop.eup %9169  ;;  %8700 = vmatmul.mubr.msk.f32.gmra.mrb[70].mxu0 %vm786_vm0, %v6789_v56  ;;  %6799 = vst.msk [vmem:[#allocation3 + $0x28] sm:$0xff] %vm786_vm0, %v6791_v7  ;;  %v6779_v32 = vmul.f32 %v8096_v28, %v6765_v14 }
0x10a0   : > { %v6790_v5 = vadd.f32 %v8097_v10, %v6776_v58  ;;  %v6764_v53 = vmul.f32 %v9170_v23, %v11271_v11 }
0x10a1   : > { %v6793_v12 = vadd.f32 %v8097_v10, %v6779_v32 }
0x10a2   : > { %6798 = vst.msk [vmem:[#allocation3 + $0x20] sm:$0xff] %vm786_vm0, %v6790_v5  ;;  %8702 = vmatprep.mubr.msk.f32.mxu0 %vm786_vm0, %v6790_v5  ;;  %v6778_v39 = vmul.f32 %v8096_v28, %v6764_v53 }
0x10a3   : > { %8703 = vmatmul.mubr.msk.f32.gmra.mrb[72].mxu0 %vm786_vm0, %v6791_v7  ;;  %6801 = vst.msk [vmem:[#allocation3 + $0x38] sm:$0xff] %vm786_vm0, %v6793_v12 }
0x10a4   : > { %v6792_v62 = vadd.f32 %v8097_v10, %v6778_v39 }
0x10a6   : > { %6800 = vst.msk [vmem:[#allocation3 + $0x30] sm:$0xff] %vm786_vm0, %v6792_v62  ;;  %8705 = vmatprep.mubr.msk.f32.mxu0 %vm786_vm0, %v6792_v62 }
0x10a7   : > { %8706 = vmatmul.mubr.msk.f32.gmra.mrb[74].mxu0 %vm786_vm0, %v6793_v12 }
0x116a   : > { %v8698_v48 = vpop.f32.mrb[68].mxu0 }
0x116b   : > { %v11314_v11 = vadd.f32 %v8698_v48, %v8098_v52  ;;  %v6903_v15 = vpop.f32.mrb[69].mxu0 }
0x116c   : > { %v11316_v24 = vadd.f32 %v8098_v52, %v6903_v15 }
0x116d   : > { %v6946_v25 = vsel %vm6942_vm6, %v11314_v11, -inf }
0x116e   : > { %6947 = vmax.xlane.f32.xlu1 %v6946_v25  ;;  %v6943_v26 = vsel %vm6942_vm6, %v11316_v24, -inf }
0x116f   : > { %6944 = vmax.xlane.f32.xlu0 %v6943_v26 }
0x1172   : > { %v8701_v27 = vpop.f32.mrb[70].mxu0 }
0x1173   : > { %v11322_v30 = vadd.f32 %v8701_v27, %v8098_v52  ;;  %v6913_v33 = vpop.f32.mrb[71].mxu0 }
0x1174   : > { %v11324_v17 = vadd.f32 %v8098_v52, %v6913_v33 }
0x1175   : > { %v6952_v16 = vsel %vm6942_vm6, %v11322_v30, -inf }
0x1176   : > { %6953 = vmax.xlane.f32.xlu1 %v6952_v16  ;;  %v8704_v35 = vpop.f32.mrb[72].mxu0  ;;  %v6949_v36 = vsel %vm6942_vm6, %v11324_v17, -inf }
0x1177   : > { %v11330_v37 = vadd.f32 %v8704_v35, %v8098_v52  ;;  %6950 = vmax.xlane.f32.xlu0 %v6949_v36  ;;  %v6923_v20 = vpop.f32.mrb[73].mxu0 }
0x1178   : > { %v11332_v29 = vadd.f32 %v8098_v52, %v6923_v20 }
0x1179   : > { %v6958_v34 = vsel %vm6942_vm6, %v11330_v37, -inf }
0x117a   : > { %6959 = vmax.xlane.f32.xlu1 %v6958_v34  ;;  %v8707_v42 = vpop.f32.mrb[74].mxu0  ;;  %v6955_v18 = vsel %vm6942_vm6, %v11332_v29, -inf }
0x117b   : > { %v11338_v54 = vadd.f32 %v8707_v42, %v8098_v52  ;;  %6956 = vmax.xlane.f32.xlu0 %v6955_v18  ;;  %v6933_v55 = vpop.f32.mrb[75].mxu0 }
0x117c   : > { %v11340_v40 = vadd.f32 %v8098_v52, %v6933_v55 }
0x117d   : > { %v6964_v41 = vsel %vm6942_vm6, %v11338_v54, -inf }
0x117e   : > { %6965 = vmax.xlane.f32.xlu1 %v6964_v41  ;;  %v6961_v43 = vsel %vm6942_vm6, %v11340_v40, -inf }
0x117f   : > { %6962 = vmax.xlane.f32.xlu0 %v6961_v43 }
0x11fb   : > { %v6948_v45 = vpop.xlane.xlu1 %6947 }
0x11fc   : > { %vm6968_vm7 = vcmp.ge.f32.partialorder %v11314_v11, %v6948_v45  ;;  %v6945_v28 = vpop.xlane.xlu0 %6944  ;;  %v7016_v13 = vsub.f32 %v11314_v11, %v6948_v45 }
0x11fd   : > { %vm6967_vm8 = vcmp.ge.f32.partialorder %v11316_v24, %v6945_v28  ;;  %v6976_v8 = vsel %vm6968_vm7, -1e+30, %v11314_v11  ;;  %v7015_v0 = vsub.f32 %v11316_v24, %v6945_v28 }
0x11fe   : > { %v6986_v60 = vsel %vm6942_vm6, %v6976_v8, -inf  ;;  %v6975_v63 = vsel %vm6967_vm8, -1e+30, %v11316_v24  ;;  %v7025_v61 = vmul.f32 1.442695, %v7016_v13 }
0x11ff   : > { %6987 = vmax.xlane.f32.xlu1 %v6986_v60  ;;  %v6983_v2 = vsel %vm6942_vm6, %v6975_v63, -inf  ;;  %v7023_v3 = vmul.f32 1.442695, %v7015_v0 }
0x1200   : > { %6984 = vmax.xlane.f32.xlu0 %v6983_v2  ;;  %9171 = vpow2.f32 %v7025_v61 }
0x1201   : > { %9173 = vpow2.f32 %v7023_v3 }
0x1203   : > { %v6954_v6 = vpop.xlane.xlu1 %6953 }
0x1204   : > { %vm6970_vm9 = vcmp.ge.f32.partialorder %v11322_v30, %v6954_v6  ;;  %v6951_v10 = vpop.xlane.xlu0 %6950  ;;  %v7018_v4 = vsub.f32 %v11322_v30, %v6954_v6 }
0x1205   : > { %vm6969_vm10 = vcmp.ge.f32.partialorder %v11324_v17, %v6951_v10  ;;  %v6978_v31 = vsel %vm6970_vm9, -1e+30, %v11322_v30  ;;  %v7017_v7 = vsub.f32 %v11324_v17, %v6951_v10 }
0x1206   : > { %v6992_v21 = vsel %vm6942_vm6, %v6978_v31, -inf  ;;  %v6977_v50 = vsel %vm6969_vm10, -1e+30, %v11324_v17  ;;  %v7029_v14 = vmul.f32 1.442695, %v7018_v4 }
0x1207   : > { %v6960_v38 = vpop.xlane.xlu1 %6959  ;;  %6993 = vmax.xlane.f32.xlu1 %v6992_v21  ;;  %v6989_v44 = vsel %vm6942_vm6, %v6977_v50, -inf  ;;  %v7027_v23 = vmul.f32 1.442695, %v7017_v7 }
0x1208   : > { %vm6972_vm11 = vcmp.ge.f32.partialorder %v11330_v37, %v6960_v38  ;;  %6990 = vmax.xlane.f32.xlu0 %v6989_v44  ;;  %v6957_v46 = vpop.xlane.xlu0 %6956  ;;  %v7020_v58 = vsub.f32 %v11330_v37, %v6960_v38  ;;  %9175 = vpow2.f32 %v7029_v14 }
0x1209   : > { %vm6971_vm12 = vcmp.ge.f32.partialorder %v11332_v29, %v6957_v46  ;;  %v6980_v1 = vsel %vm6972_vm11, -1e+30, %v11330_v37  ;;  %v7019_v32 = vsub.f32 %v11332_v29, %v6957_v46  ;;  %9177 = vpow2.f32 %v7027_v23 }
0x120a   : > { %v6998_v19 = vsel %vm6942_vm6, %v6980_v1, -inf  ;;  %v6979_v22 = vsel %vm6971_vm12, -1e+30, %v11332_v29  ;;  %v7033_v5 = vmul.f32 1.442695, %v7020_v58  ;;  %v9172_v52 = vpop.eup %9171 }
0x120b   : > { %6999 = vmax.xlane.f32.xlu1 %v6998_v19  ;;  %v6966_v9 = vpop.xlane.xlu1 %6965  ;;  %v6995_v49 = vsel %vm6942_vm6, %v6979_v22, -inf  ;;  %v7031_v12 = vmul.f32 1.442695, %v7019_v32  ;;  %v9174_v15 = vpop.eup %9173 }
0x120c   : > { %vm6974_vm13 = vcmp.ge.f32.partialorder %v11338_v54, %v6966_v9  ;;  %6996 = vmax.xlane.f32.xlu0 %v6995_v49  ;;  %v6963_v47 = vpop.xlane.xlu0 %6962  ;;  %v7022_v53 = vsub.f32 %v11338_v54, %v6966_v9  ;;  %9179 = vpow2.f32 %v7033_v5 }
0x120d   : > { %vm6973_vm14 = vcmp.ge.f32.partialorder %v11340_v40, %v6963_v47  ;;  %v6982_v51 = vsel %vm6974_vm13, -1e+30, %v11338_v54  ;;  %v7021_v39 = vsub.f32 %v11340_v40, %v6963_v47  ;;  %9181 = vpow2.f32 %v7031_v12 }
0x120e   : > { %v7004_v56 = vsel %vm6942_vm6, %v6982_v51, -inf  ;;  %v6981_v57 = vsel %vm6973_vm14, -1e+30, %v11340_v40  ;;  %v7037_v26 = vmul.f32 1.442695, %v7022_v53 }
0x120f   : > { %7005 = vmax.xlane.f32.xlu1 %v7004_v56  ;;  %v7001_v59 = vsel %vm6942_vm6, %v6981_v57, -inf  ;;  %v7035_v16 = vmul.f32 1.442695, %v7021_v39 }
0x1210   : > { %7002 = vmax.xlane.f32.xlu0 %v7001_v59  ;;  %9183 = vpow2.f32 %v7037_v26 }
0x1211   : > { %9185 = vpow2.f32 %v7035_v16 }
0x128c   : > { %v6988_v62 = vpop.xlane.xlu1 %6987 }
0x128d   : > { %vm7008_vm15 = vcmp.ge.f32.partialorder %v11314_v11, %v6988_v62  ;;  %v6985_v48 = vpop.xlane.xlu0 %6984  ;;  %v9176_v11 = vpop.eup %9175 }
0x128e   : > { %v7040_v25 = vsel %vm7008_vm15, %v9172_v52, 0.0  ;;  %vm7007_vm0 = vcmp.ge.f32.partialorder %v11316_v24, %v6985_v48  ;;  %v9178_v34 = vpop.eup %9177 }
0x128f   : > { %v7039_v27 = vsel %vm7007_vm0, %v9174_v15, 0.0  ;;  %v7050_v33 = vsel %vm6942_vm6, %v7040_v25, 0.0  ;;  %v9180_v43 = vpop.eup %9179 }
0x1290   : > { %7051 = vadd.xlane.f32.xlu1 %v7050_v33  ;;  %v7047_v35 = vsel %vm6942_vm6, %v7039_v27, 0.0  ;;  %v9182_v28 = vpop.eup %9181 }
0x1291   : > { %7048 = vadd.xlane.f32.xlu0 %v7047_v35  ;;  %v9184_v2 = vpop.eup %9183 }
0x1292   : > { %v9186_v10 = vpop.eup %9185 }
0x1294   : > { %v6994_v36 = vpop.xlane.xlu1 %6993 }
0x1295   : > { %vm7010_vm1 = vcmp.ge.f32.partialorder %v11322_v30, %v6994_v36  ;;  %v6991_v20 = vpop.xlane.xlu0 %6990 }
0x1296   : > { %v7042_v24 = vsel %vm7010_vm1, %v9176_v11, 0.0  ;;  %vm7009_vm2 = vcmp.ge.f32.partialorder %v11324_v17, %v6991_v20 }
0x1297   : > { %v7041_v42 = vsel %vm7009_vm2, %v9178_v34, 0.0  ;;  %v7056_v18 = vsel %vm6942_vm6, %v7042_v24, 0.0 }
0x1298   : > { %7057 = vadd.xlane.f32.xlu1 %v7056_v18  ;;  %v7000_v55 = vpop.xlane.xlu1 %6999  ;;  %v7053_v41 = vsel %vm6942_vm6, %v7041_v42, 0.0 }
0x1299   : > { %vm7012_vm3 = vcmp.ge.f32.partialorder %v11330_v37, %v7000_v55  ;;  %7054 = vadd.xlane.f32.xlu0 %v7053_v41  ;;  %v6997_v45 = vpop.xlane.xlu0 %6996 }
0x129a   : > { %v7044_v8 = vsel %vm7012_vm3, %v9180_v43, 0.0  ;;  %vm7011_vm4 = vcmp.ge.f32.partialorder %v11332_v29, %v6997_v45 }
0x129b   : > { %v7043_v30 = vsel %vm7011_vm4, %v9182_v28, 0.0  ;;  %v7062_v60 = vsel %vm6942_vm6, %v7044_v8, 0.0 }
0x129c   : > { %7063 = vadd.xlane.f32.xlu1 %v7062_v60  ;;  %v7006_v17 = vpop.xlane.xlu1 %7005  ;;  %v7059_v63 = vsel %vm6942_vm6, %v7043_v30, 0.0 }
0x129d   : > { %vm7014_vm5 = vcmp.ge.f32.partialorder %v11338_v54, %v7006_v17  ;;  %7060 = vadd.xlane.f32.xlu0 %v7059_v63  ;;  %v7003_v6 = vpop.xlane.xlu0 %7002 }
0x129e   : > { %v7046_v37 = vsel %vm7014_vm5, %v9184_v2, 0.0  ;;  %vm7013_vm7 = vcmp.ge.f32.partialorder %v11340_v40, %v7003_v6 }
0x129f   : > { %v7045_v31 = vsel %vm7013_vm7, %v9186_v10, 0.0  ;;  %v7068_v21 = vsel %vm6942_vm6, %v7046_v37, 0.0 }
0x12a0   : > { %7069 = vadd.xlane.f32.xlu1 %v7068_v21  ;;  %v7065_v29 = vsel %vm6942_vm6, %v7045_v31, 0.0 }
0x12a1   : > { %7066 = vadd.xlane.f32.xlu0 %v7065_v29 }
0x131d   : > { %v7052_v50 = vpop.xlane.xlu1 %7051 }
0x131e   : > { %9187 = vrcp.f32 %v7052_v50  ;;  %v7049_v38 = vpop.xlane.xlu0 %7048 }
0x131f   : > { %9189 = vrcp.f32 %v7049_v38 }
0x1325   : > { %v7058_v44 = vpop.xlane.xlu1 %7057 }
0x1326   : > { %9191 = vrcp.f32 %v7058_v44  ;;  %v7055_v54 = vpop.xlane.xlu0 %7054 }
0x1327   : > { %9193 = vrcp.f32 %v7055_v54 }
0x1328   : > { %v9188_v46 = vpop.eup %9187 }
0x1329   : > { %v9190_v1 = vpop.eup %9189  ;;  %v7080_v19 = vmul.f32 %v9188_v46, %v7040_v25  ;;  %v7064_v22 = vpop.xlane.xlu1 %7063 }
0x132a   : > { %v7079_v40 = vmul.f32 %v9190_v1, %v7039_v27  ;;  %9195 = vrcp.f32 %v7064_v22  ;;  %v7061_v9 = vpop.xlane.xlu0 %7060 }
0x132b   : > { %7088 = vst.msk [vmem:[#allocation4 + $0x8] sm:$0xff] %vm6942_vm6, %v7080_v19  ;;  %9197 = vrcp.f32 %v7061_v9 }
0x132c   : > { %7087 = vst.msk [vmem:[#allocation4] sm:$0xff] %vm6942_vm6, %v7079_v40 }
0x132d   : > { %v7070_v49 = vpop.xlane.xlu1 %7069 }
0x132e   : > { %9199 = vrcp.f32 %v7070_v49  ;;  %v7067_v47 = vpop.xlane.xlu0 %7066 }
0x132f   : > { %9201 = vrcp.f32 %v7067_v47 }
0x1330   : > { %v9192_v51 = vpop.eup %9191 }
0x1331   : > { %v9194_v56 = vpop.eup %9193  ;;  %v7082_v57 = vmul.f32 %v9192_v51, %v7042_v24 }
0x1332   : > { %v7081_v59 = vmul.f32 %v9194_v56, %v7041_v42 }
0x1333   : > { %7090 = vst.msk [vmem:[#allocation4 + $0x18] sm:$0xff] %vm6942_vm6, %v7082_v57 }
0x1334   : > { %v9196_v13 = vpop.eup %9195  ;;  %7089 = vst.msk [vmem:[#allocation4 + $0x10] sm:$0xff] %vm6942_vm6, %v7081_v59 }
0x1335   : > { %v9198_v0 = vpop.eup %9197  ;;  %v7084_v61 = vmul.f32 %v9196_v13, %v7044_v8 }
0x1336   : > { %v7083_v3 = vmul.f32 %v9198_v0, %v7043_v30 }
0x1337   : > { %7092 = vst.msk [vmem:[#allocation4 + $0x28] sm:$0xff] %vm6942_vm6, %v7084_v61 }
0x1338   : > { %v9200_v4 = vpop.eup %9199  ;;  %7091 = vst.msk [vmem:[#allocation4 + $0x20] sm:$0xff] %vm6942_vm6, %v7083_v3 }
0x1339   : > { %v9202_v7 = vpop.eup %9201  ;;  %v7086_v14 = vmul.f32 %v9200_v4, %v7046_v37 }
0x133a   : > { %v7085_v58 = vmul.f32 %v9202_v7, %v7045_v31 }
0x133b   : > { %7094 = vst.msk [vmem:[#allocation4 + $0x38] sm:$0xff] %vm6942_vm6, %v7086_v14 }
0x133c   : > { %7093 = vst.msk [vmem:[#allocation4 + $0x30] sm:$0xff] %vm6942_vm6, %v7085_v58 }
0x133d PF: > { %v7111_v23 = vlaneseq  ;;  %s11737_s30 = sld [smem:[#allocation34_spill]]  ;;  %v7105_v32 = vld [vmem:[#allocation4 + $0x10] sm:$0xff]  ;;  %v7103_v12 = vld [vmem:[#allocation4] sm:$0xff]  ;;  %v7106_v39 = vld [vmem:[#allocation4 + $0x18] sm:$0xff]  ;;  %vm7123_vm8 = vcmask 31744  }
0x133e   : > { %v7104_v62 = vld [vmem:[#allocation4 + $0x8] sm:$0xff] }
0x133f   : > { %v7112_v53 = vand.u32 127, %v7111_v23  ;;  %v7108_v16 = vld [vmem:[#allocation4 + $0x28] sm:$0xff]  ;;  %v7107_v35 = vld [vmem:[#allocation4 + $0x20] sm:$0xff] }
0x1342   : > { %v7110_v24 = vld [vmem:[#allocation4 + $0x38] sm:$0xff] }
0x1343   : > { %v7113_v5 = vstv %s11737_s30  ;;  %v7109_v42 = vld [vmem:[#allocation4 + $0x30] sm:$0xff] }
0x1344   : > { %vm11403_vm9 = vcmp.eq.s32.totalorder %v7112_v53, %v7113_v5 }
0x1345   : > { %v7117_v48 = vsel %vm11403_vm9, %v7105_v32, 0.0  ;;  %v7115_v15 = vsel %vm11403_vm9, %v7103_v12, 0.0  ;;  %v7118_v25 = vsel %vm11403_vm9, %v7106_v39, 0.0  ;;  %v7116_v26 = vsel %vm11403_vm9, %v7104_v62, 0.0 }
0x1346   : > { %v7130_v27 = vsel %vm7123_vm8, %v7117_v48, 0.0  ;;  %v7124_v33 = vsel %vm7123_vm8, %v7115_v15, 0.0  ;;  %v7133_v36 = vsel %vm7123_vm8, %v7118_v25, 0.0  ;;  %v7127_v11 = vsel %vm7123_vm8, %v7116_v26, 0.0 }
0x1347   : > { %7131 = vadd.xlane.f32.xlu1 %v7130_v27  ;;  %7125 = vadd.xlane.f32.xlu0 %v7124_v33  ;;  %v7120_v20 = vsel %vm11403_vm9, %v7108_v16, 0.0  ;;  %v7119_v34 = vsel %vm11403_vm9, %v7107_v35, 0.0  ;;  %v7122_v41 = vsel %vm11403_vm9, %v7110_v24, 0.0  ;;  %v7121_v43 = vsel %vm11403_vm9, %v7109_v42, 0.0 }
0x1348   : > { %v7139_v18 = vsel %vm7123_vm8, %v7120_v20, 0.0  ;;  %v7136_v55 = vsel %vm7123_vm8, %v7119_v34, 0.0  ;;  %v7145_v45 = vsel %vm7123_vm8, %v7122_v41, 0.0  ;;  %v7142_v28 = vsel %vm7123_vm8, %v7121_v43, 0.0 }
0x134b   : > { %7134 = vadd.xlane.f32.xlu1 %v7133_v36  ;;  %7128 = vadd.xlane.f32.xlu0 %v7127_v11 }
0x134f   : > { %7140 = vadd.xlane.f32.xlu1 %v7139_v18  ;;  %7137 = vadd.xlane.f32.xlu0 %v7136_v55 }
0x1353   : > { %7146 = vadd.xlane.f32.xlu1 %v7145_v45  ;;  %7143 = vadd.xlane.f32.xlu0 %v7142_v28 }
0x13d4   : > { %v11431_v8 = vpop.xlane.xlu1 %7131  ;;  %v11433_v30 = vpop.xlane.xlu0 %7125 }
0x13d8   : > { %v11435_v60 = vpop.xlane.xlu1 %7134  ;;  %v11437_v17 = vpop.xlane.xlu0 %7128 }
0x13dc   : > { %v11439_v63 = vpop.xlane.xlu1 %7140  ;;  %v11441_v2 = vpop.xlane.xlu0 %7137 }
0x13dd   : > { %v7149_v6 = vmax.f32 %v11437_v17, %v11439_v63  ;;  %v7148_v10 = vmax.f32 %v11433_v30, %v11441_v2 }
0x13df   : > { %v7152_v50 = vmax.f32 %v7148_v10, %v7149_v6 }
0x13e0   : > { %v11447_v37 = vpop.xlane.xlu1 %7146  ;;  %v11449_v31 = vpop.xlane.xlu0 %7143 }
0x13e1   : > { %v7151_v21 = vmax.f32 %v11435_v60, %v11447_v37  ;;  %v7150_v29 = vmax.f32 %v11431_v8, %v11449_v31 }
0x13e3   : > { %v7153_v38 = vmax.f32 %v7150_v29, %v7151_v21 }
0x13e5   : > { %v7154_v44 = vmax.f32 %v7152_v50, %v7153_v38 }
0x13e7   : > { %v7155_v54 = vrot.slane %v7154_v44, 4 }
0x13e9   : > { %v7156_v46 = vmax.f32 %v7154_v44, %v7155_v54 }
0x13eb   : > { %v7157_v1 = vrot.slane %v7156_v46, 2 }
0x13ed   : > { %v7158_v19 = vmax.f32 %v7156_v46, %v7157_v1 }
0x13ef   : > { %v7159_v22 = vrot.slane %v7158_v19, 1 }
0x13f1   : > { %v7160_v40 = vmax.f32 %v7158_v19, %v7159_v22 }
0x13f3   : > { %8805 = vpush %v7160_v40 }
0x1424   : > { %s8806_s16 = spop %8805 }
0x1425   : > { %p7162_p11 = scmp.gt.f32.partialorder %s8806_s16, 0.0 }
0x1426   : > { %v7174_v9 = vld [vmem:[%s10237_s4] sm:$0xff] (%p7162_p11)  ;;  %v7175_v49 = vld [vmem:[%s10237_s4 + $0x8] sm:$0xff] (%p7162_p11)  ;;  %v7176_v47 = vld [vmem:[%s10237_s4 + $0x10] sm:$0xff] (%p7162_p11)  ;;  %vm7185_vm6 = vcmask (%p7162_p11), 261120  }
0x1427   : > { %7165 = sbr.rel (!%p7162_p11) target bundleno = 5634 (0x1602), region = 136  ;;  %v8783_v51 = vpack.c.bf16 (%p7162_p11), %v7175_v49, %v7174_v9  ;;  %v7177_v56 = vld [vmem:[%s10237_s4 + $0x18] sm:$0xff] (%p7162_p11)  ;;  %v7168_v0 = vld [vmem:[#allocation3 + $0x10] sm:$0xff] (%p7162_p11)  ;;  %v7169_v61 = vld [vmem:[#allocation3 + $0x18] sm:$0xff] (%p7162_p11) }
0x1428   : > { %v7166_v57 = vld [vmem:[#allocation3] sm:$0xff] (%p7162_p11)  ;;  %v8787_v59 = vpack.c.bf16 (%p7162_p11), %v7177_v56, %v7176_v47  ;;  %v7167_v13 = vld [vmem:[#allocation3 + $0x8] sm:$0xff] (%p7162_p11)  ;;  %v7172_v7 = vld [vmem:[#allocation3 + $0x30] sm:$0xff] (%p7162_p11) }
0x1429   : > { %8716 = vmatprep.mubr.msk.f32.mxu0 (%p7162_p11), %vm7185_vm6, %v7166_v57  ;;  %8784 = vmatprep.subr.bf16.mxu0 (%p7162_p11), %v8783_v51  ;;  %v7170_v3 = vld [vmem:[#allocation3 + $0x20] sm:$0xff] (%p7162_p11)  ;;  %v7171_v4 = vld [vmem:[#allocation3 + $0x28] sm:$0xff] (%p7162_p11)  ;;  %v7173_v14 = vld [vmem:[#allocation3 + $0x38] sm:$0xff] (%p7162_p11) }
0x142a   : > { %8786 = vmatpush3.bf16.msra.mxu0 (%p7162_p11), %v8783_v51  ;;  %v7355_v58 = vld [vmem:[%s10256_s22] sm:$0xff] (%p7162_p11)  ;;  %v7356_v23 = vld [vmem:[%s10256_s22 + $0x8] sm:$0xff] (%p7162_p11)  ;;  %v7357_v5 = vld [vmem:[%s10256_s22 + $0x10] sm:$0xff] (%p7162_p11) }
0x142b   : > { %8788 = vmatprep.subr.bf16.mxu0 (%p7162_p11), %v8787_v59  ;;  %v8791_v32 = vpack.c.bf16 (%p7162_p11), %v7356_v23, %v7355_v58  ;;  %v7358_v53 = vld [vmem:[%s10256_s22 + $0x18] sm:$0xff] (%p7162_p11)  ;;  %v8107_v39 = vld [vmem:[%s768_s0] ss:$0 sm:$0xff] (%p7162_p11) }
0x142c   : > { %v8795_v12 = vpack.c.bf16 (%p7162_p11), %v7358_v53, %v7357_v5 }
0x142d   : > { %8792 = vmatprep.subr.bf16.mxu1 (%p7162_p11), %v8791_v32 }
0x142e   : > { %8790 = vmatpush3.bf16.msra.mxu0 %v8787_v59  ;;  %8794 = vmatpush3.bf16.msra.mxu1 %v8791_v32 }
0x142f   : > { %8796 = vmatprep.subr.bf16.mxu1 %v8795_v12 }
0x1431   : > { %8717 = vmatmul.mubr.msk.f32.vlgmr.msra.gmra.mrb[0].mxu0 %vm7185_vm6, %v7167_v13 }
0x1432   : > { %8719 = vmatprep.mubr.msk.f32.mxu0 %vm7185_vm6, %v7168_v0  ;;  %8798 = vmatpush3.bf16.msra.mxu1 %v8795_v12 }
0x1435   : > { %8720 = vmatmul.mubr.msk.f32.gmra.mrb[2].mxu0 %vm7185_vm6, %v7169_v61 }
0x1436   : > { %8722 = vmatprep.mubr.msk.f32.mxu0 %vm7185_vm6, %v7170_v3 }
0x1439   : > { %8723 = vmatmul.mubr.msk.f32.gmra.mrb[4].mxu0 %vm7185_vm6, %v7171_v4 }
0x143a   : > { %8725 = vmatprep.mubr.msk.f32.mxu0 %vm7185_vm6, %v7172_v7 }
0x143d   : > { %8726 = vmatmul.mubr.msk.f32.gmra.mrb[6].mxu0 %vm7185_vm6, %v7173_v14 }
0x1504   : > { %v8718_v62 = vpop.f32.mrb[0].mxu0 }
0x1505   : > { %v7282_v52 = vadd.f32 %v8718_v62, %v8107_v39  ;;  %v7276_v48 = vpop.f32.mrb[1].mxu0  ;;  %v8116_v62 = vld [vmem:[%s771_s7] ss:$0 sm:$0xff] }
0x1506   : > { %v7277_v15 = vadd.f32 %v8107_v39, %v7276_v48 }
0x1507   : > { %v7324_v25 = vmul.f32 0.70710677, %v7282_v52  ;;  %v7316_v54 = vmul.f32 0.5, %v7282_v52 }
0x1508   : > { %v7323_v26 = vmul.f32 0.70710677, %v7277_v15  ;;  %v8721_v27 = vpop.f32.mrb[2].mxu0  ;;  %v7315_v38 = vmul.f32 0.5, %v7277_v15 }
0x1509   : > { %9211 = verf.f32 %v7324_v25  ;;  %v7292_v33 = vadd.f32 %v8721_v27, %v8107_v39  ;;  %v7286_v16 = vpop.f32.mrb[3].mxu0  ;;  %v7496_v25 = vld [vmem:[#allocation5 + $0x8] sm:$0xff] }
0x150a   : > { %9213 = verf.f32 %v7323_v26  ;;  %v7287_v35 = vadd.f32 %v8107_v39, %v7286_v16 }
0x150b   : > { %v7326_v36 = vmul.f32 0.70710677, %v7292_v33  ;;  %v7318_v47 = vmul.f32 0.5, %v7292_v33  ;;  %v7495_v33 = vld [vmem:[#allocation5] sm:$0xff] }
0x150c   : > { %v7325_v11 = vmul.f32 0.70710677, %v7287_v35  ;;  %v8724_v20 = vpop.f32.mrb[4].mxu0  ;;  %v7317_v9 = vmul.f32 0.5, %v7287_v35 }
0x150d   : > { %9215 = verf.f32 %v7326_v36  ;;  %v7302_v34 = vadd.f32 %v8724_v20, %v8107_v39  ;;  %v7296_v24 = vpop.f32.mrb[5].mxu0 }
0x150e   : > { %9217 = verf.f32 %v7325_v11  ;;  %v7297_v42 = vadd.f32 %v8107_v39, %v7296_v24  ;;  %v7498_v24 = vld [vmem:[#allocation5 + $0x18] sm:$0xff] }
0x150f   : > { %v7328_v18 = vmul.f32 0.70710677, %v7302_v34  ;;  %v7320_v3 = vmul.f32 0.5, %v7302_v34 }
0x1510   : > { %v7327_v55 = vmul.f32 0.70710677, %v7297_v42  ;;  %v8727_v41 = vpop.f32.mrb[6].mxu0  ;;  %v7319_v0 = vmul.f32 0.5, %v7297_v42 }
0x1511   : > { %9219 = verf.f32 %v7328_v18  ;;  %v7312_v43 = vadd.f32 %v8727_v41, %v8107_v39  ;;  %v7306_v45 = vpop.f32.mrb[7].mxu0 }
0x1512   : > { %9221 = verf.f32 %v7327_v55  ;;  %v7307_v28 = vadd.f32 %v8107_v39, %v7306_v45  ;;  %v7497_v55 = vld [vmem:[#allocation5 + $0x10] sm:$0xff] }
0x1513   : > { %v9212_v6 = vpop.eup %9211  ;;  %v7330_v10 = vmul.f32 0.70710677, %v7312_v43  ;;  %v7322_v53 = vmul.f32 0.5, %v7312_v43 }
0x1514   : > { %v9214_v21 = vpop.eup %9213  ;;  %v7340_v29 = vadd.f32 1.0, %v9212_v6  ;;  %v7329_v50 = vmul.f32 0.70710677, %v7307_v28  ;;  %v7321_v32 = vmul.f32 0.5, %v7307_v28  ;;  %v7500_v6 = vld [vmem:[#allocation5 + $0x28] sm:$0xff] }
0x1515   : > { %9223 = verf.f32 %v7330_v10  ;;  %v7339_v44 = vadd.f32 1.0, %v9214_v21 }
0x1516   : > { %9225 = verf.f32 %v7329_v50  ;;  %v7348_v22 = vmul.f32 %v7340_v29, %v7316_v54  ;;  %v7499_v29 = vld [vmem:[#allocation5 + $0x20] sm:$0xff] }
0x1517   : > { %v9216_v46 = vpop.eup %9215  ;;  %v7347_v1 = vmul.f32 %v7339_v44, %v7315_v38 }
0x1518   : > { %v9218_v19 = vpop.eup %9217  ;;  %v7342_v40 = vadd.f32 1.0, %v9216_v46  ;;  %v7502_v46 = vld [vmem:[#allocation5 + $0x38] sm:$0xff] }
0x1519   : > { %v7341_v49 = vadd.f32 1.0, %v9218_v19  ;;  %8736 = vmatprep.mubr.msk.f32.mxu1 %vm7185_vm6, %v7347_v1 }
0x151a   : > { %8737 = vmatmul.mubr.msk.f32.vlgmr.msra.gmra.mrb[0].mxu1 %vm7185_vm6, %v7348_v22  ;;  %v7350_v59 = vmul.f32 %v7342_v40, %v7318_v47  ;;  %v7501_v22 = vld [vmem:[#allocation5 + $0x30] sm:$0xff] }
0x151b   : > { %v9220_v51 = vpop.eup %9219  ;;  %v7349_v56 = vmul.f32 %v7341_v49, %v7317_v9 }
0x151c   : > { %v9222_v57 = vpop.eup %9221  ;;  %v7344_v13 = vadd.f32 1.0, %v9220_v51 }
0x151d   : > { %v7343_v61 = vadd.f32 1.0, %v9222_v57  ;;  %8739 = vmatprep.mubr.msk.f32.mxu1 %vm7185_vm6, %v7349_v56 }
0x151e   : > { %8740 = vmatmul.mubr.msk.f32.gmra.mrb[2].mxu1 %vm7185_vm6, %v7350_v59  ;;  %v7352_v58 = vmul.f32 %v7344_v13, %v7320_v3 }
0x151f   : > { %v9224_v4 = vpop.eup %9223  ;;  %v7351_v7 = vmul.f32 %v7343_v61, %v7319_v0 }
0x1520   : > { %v9226_v14 = vpop.eup %9225  ;;  %v7346_v23 = vadd.f32 1.0, %v9224_v4 }
0x1521   : > { %v7345_v5 = vadd.f32 1.0, %v9226_v14  ;;  %8742 = vmatprep.mubr.msk.f32.mxu1 %vm7185_vm6, %v7351_v7 }
0x1522   : > { %8743 = vmatmul.mubr.msk.f32.gmra.mrb[4].mxu1 %vm7185_vm6, %v7352_v58  ;;  %v7354_v39 = vmul.f32 %v7346_v23, %v7322_v53 }
0x1523   : > { %v7353_v12 = vmul.f32 %v7345_v5, %v7321_v32 }
0x1525   : > { %8745 = vmatprep.mubr.msk.f32.mxu1 %vm7185_vm6, %v7353_v12 }
0x1526   : > { %8746 = vmatmul.mubr.msk.f32.gmra.mrb[6].mxu1 %vm7185_vm6, %v7354_v39 }
0x15ed   : > { %v8738_v52 = vpop.f32.mrb[0].mxu1 }
0x15ee   : > { %v7462_v48 = vadd.f32 %v8738_v52, %v8116_v62  ;;  %v7456_v15 = vpop.f32.mrb[1].mxu1 }
0x15ef   : > { %v7457_v26 = vadd.f32 %v8116_v62, %v7456_v15 }
0x15f0   : > { %v7504_v27 = vmul.f32 %v7462_v48, %v11437_v17 }
0x15f1   : > { %v7503_v16 = vmul.f32 %v7457_v26, %v11433_v30  ;;  %v8741_v35 = vpop.f32.mrb[2].mxu1 }
0x15f2   : > { %v7512_v36 = vadd.f32 %v7504_v27, %v7496_v25  ;;  %v7472_v11 = vadd.f32 %v8741_v35, %v8116_v62  ;;  %v7466_v20 = vpop.f32.mrb[3].mxu1 }
0x15f3   : > { %v7511_v34 = vadd.f32 %v7503_v16, %v7495_v33  ;;  %v7467_v42 = vadd.f32 %v8116_v62, %v7466_v20 }
0x15f4   : > { %7520 = vst.msk [vmem:[#allocation5 + $0x8] sm:$0xff] %vm7185_vm6, %v7512_v36  ;;  %v7506_v18 = vmul.f32 %v7472_v11, %v11435_v60 }
0x15f5   : > { %7519 = vst.msk [vmem:[#allocation5] sm:$0xff] %vm7185_vm6, %v7511_v34  ;;  %v7505_v41 = vmul.f32 %v7467_v42, %v11431_v8  ;;  %v8744_v17 = vpop.f32.mrb[4].mxu1 }
0x15f6   : > { %v7514_v43 = vadd.f32 %v7506_v18, %v7498_v24  ;;  %v7482_v45 = vadd.f32 %v8744_v17, %v8116_v62  ;;  %v7476_v30 = vpop.f32.mrb[5].mxu1 }
0x15f7   : > { %v7513_v28 = vadd.f32 %v7505_v41, %v7497_v55  ;;  %v7477_v10 = vadd.f32 %v8116_v62, %v7476_v30 }
0x15f8   : > { %7522 = vst.msk [vmem:[#allocation5 + $0x18] sm:$0xff] %vm7185_vm6, %v7514_v43  ;;  %v7508_v21 = vmul.f32 %v7482_v45, %v11439_v63 }
0x15f9   : > { %7521 = vst.msk [vmem:[#allocation5 + $0x10] sm:$0xff] %vm7185_vm6, %v7513_v28  ;;  %v7507_v60 = vmul.f32 %v7477_v10, %v11441_v2  ;;  %v8747_v50 = vpop.f32.mrb[6].mxu1 }
0x15fa   : > { %v7516_v38 = vadd.f32 %v7508_v21, %v7500_v6  ;;  %v7492_v44 = vadd.f32 %v8747_v50, %v8116_v62  ;;  %v7486_v8 = vpop.f32.mrb[7].mxu1 }
0x15fb   : > { %v7515_v54 = vadd.f32 %v7507_v60, %v7499_v29  ;;  %v7487_v1 = vadd.f32 %v8116_v62, %v7486_v8 }
0x15fc   : > { %7524 = vst.msk [vmem:[#allocation5 + $0x28] sm:$0xff] %vm7185_vm6, %v7516_v38  ;;  %v7510_v19 = vmul.f32 %v7492_v44, %v11447_v37 }
0x15fd   : > { %7523 = vst.msk [vmem:[#allocation5 + $0x20] sm:$0xff] %vm7185_vm6, %v7515_v54  ;;  %v7509_v63 = vmul.f32 %v7487_v1, %v11449_v31 }
0x15fe   : > { %v7518_v40 = vadd.f32 %v7510_v19, %v7502_v46 }
0x15ff   : > { %v7517_v9 = vadd.f32 %v7509_v63, %v7501_v22 }
0x1600   : > { %7526 = vst.msk [vmem:[#allocation5 + $0x38] sm:$0xff] %vm7185_vm6, %v7518_v40 }
0x1601   : > { %7525 = vst.msk [vmem:[#allocation5 + $0x30] sm:$0xff] %vm7185_vm6, %v7517_v9 }
0x1602 PF: > { %s11742_s15 = sld [smem:[#allocation34_spill]] }
0x1608   : > { %p8125_p3 = scmp.ne.s32.totalorder %s11742_s15, 3 }
0x1609   : > { %s11743_s10 = sld [smem:[#allocation59_spill]] (!%p8125_p3)  ;;  %v9685_v49 = vmov (!%p8125_p3), 0.0|0.0   ;;  %vm9686_vm10 = vmmov (!%p8125_p3), 0   ;;  %v9687_v56 = vmov (!%p8125_p3), 0.0   ;;  %v7531_v57 = vld [vmem:[#allocation2] sm:$0xff] (!%p8125_p3)  ;;  %v7532_v59 = vld [vmem:[#allocation2 + $0x8] sm:$0xff] (!%p8125_p3) }
0x160a   : > { %7530 = sbr.rel (%p8125_p3) target bundleno = 5884 (0x16fc), region = 140  ;;  %8799 = vmatprep.subr.bf16.mxu0 (!%p8125_p3), %v9685_v49  ;;  %8756 = vmatprep.mubr.msk.f32.mxu0 (!%p8125_p3), %vm9686_vm10, %v9687_v56  ;;  %v7533_v13 = vld [vmem:[#allocation2 + $0x10] sm:$0xff] (!%p8125_p3)  ;;  %v7534_v0 = vld [vmem:[#allocation2 + $0x18] sm:$0xff] (!%p8125_p3)  ;;  %v7535_v61 = vld [vmem:[#allocation2 + $0x20] sm:$0xff] (!%p8125_p3)  ;;  %vm7555_vm11 = vcmask (!%p8125_p3), 261120   ;;  %vm7640_vm12 = vcmask (!%p8125_p3), 1041409  }
0x160b   : > { %v7536_v4 = vld [vmem:[#allocation2 + $0x28] sm:$0xff] (!%p8125_p3)  ;;  %v7537_v7 = vld [vmem:[#allocation2 + $0x30] sm:$0xff] (!%p8125_p3)  ;;  %v7538_v14 = vld [vmem:[#allocation2 + $0x38] sm:$0xff] (!%p8125_p3)  ;;  %vm7642_vm13 = vcmask (!%p8125_p3), 1042434   ;;  %vm7644_vm14 = vcmask (!%p8125_p3), 1043459   ;;  %vm7646_vm15 = vcmask (!%p8125_p3), 1044484  }
0x160c   : > { %v7539_v58 = vld [vmem:[#allocation5] sm:$0xff] (!%p8125_p3)  ;;  %v7540_v23 = vld [vmem:[#allocation5 + $0x8] sm:$0xff] (!%p8125_p3)  ;;  %v7541_v32 = vld [vmem:[#allocation5 + $0x10] sm:$0xff] (!%p8125_p3)  ;;  %vm7648_vm0 = vcmask (!%p8125_p3), 1045509   ;;  %vm7650_vm1 = vcmask (!%p8125_p3), 1046534   ;;  %vm7652_vm2 = vcmask (!%p8125_p3), 1047559  }
0x160d   : > { %v7542_v5 = vld [vmem:[#allocation5 + $0x18] sm:$0xff] (!%p8125_p3)  ;;  %v7543_v53 = vld [vmem:[#allocation5 + $0x20] sm:$0xff] (!%p8125_p3)  ;;  %v7544_v12 = vld [vmem:[#allocation5 + $0x28] sm:$0xff] (!%p8125_p3)  ;;  %v7547_v39 = vadd.f32 (!%p8125_p3), %v7539_v58, %v7531_v57  ;;  %v7548_v62 = vadd.f32 (!%p8125_p3), %v7540_v23, %v7532_v59  ;;  %v7549_v52 = vadd.f32 (!%p8125_p3), %v7541_v32, %v7533_v13  ;;  %s11744_s30 = sld [smem:[#allocation60_spill]] (!%p8125_p3) }
0x160e   : > { %v7545_v48 = vld [vmem:[#allocation5 + $0x30] sm:$0xff] (!%p8125_p3)  ;;  %v7546_v15 = vld [vmem:[#allocation5 + $0x38] sm:$0xff] (!%p8125_p3)  ;;  %v7550_v25 = vadd.f32 (!%p8125_p3), %v7542_v5, %v7534_v0  ;;  %v7551_v26 = vadd.f32 (!%p8125_p3), %v7543_v53, %v7535_v61  ;;  %v7552_v27 = vadd.f32 (!%p8125_p3), %v7544_v12, %v7536_v4 }
0x160f   : > { %v7621_v2 = vld [vmem:[%s11743_s10] sm:$0xff] (!%p8125_p3)  ;;  %v7622_v37 = vld [vmem:[%s11743_s10 + $0x8] sm:$0xff] (!%p8125_p3)  ;;  %v7623_v31 = vld [vmem:[%s11743_s10 + $0x10] sm:$0xff] (!%p8125_p3)  ;;  %v7553_v33 = vadd.f32 (!%p8125_p3), %v7545_v48, %v7537_v7  ;;  %v7554_v16 = vadd.f32 (!%p8125_p3), %v7546_v15, %v7538_v14  ;;  %v7556_v35 = vsel (!%p8125_p3), %vm7555_vm11, %v7547_v39, 0.0  ;;  %v7563_v36 = vsel (!%p8125_p3), %vm7555_vm11, %v7548_v62, 0.0 }
0x1610   : > { %v8800_v47 = vpack.c.bf16 (!%p8125_p3), %v7622_v37, %v7621_v2  ;;  %v7624_v51 = vld [vmem:[%s11743_s10 + $0x18] sm:$0xff] (!%p8125_p3)  ;;  %v7557_v11 = vrot.slane (!%p8125_p3), %v7556_v35, 4  ;;  %v7564_v20 = vrot.slane (!%p8125_p3), %v7563_v36, 4  ;;  %v7570_v34 = vsel (!%p8125_p3), %vm7555_vm11, %v7549_v52, 0.0 }
0x1611   : > { %v8803_v3 = vpack.c.bf16 %v7624_v51, %v7623_v31  ;;  %v7577_v24 = vsel %vm7555_vm11, %v7550_v25, 0.0  ;;  %v7571_v42 = vrot.slane %v7570_v34, 4  ;;  %v7584_v55 = vsel %vm7555_vm11, %v7551_v26, 0.0 }
0x1612   : > { %8801 = vmatpush3.bf16.msra.mxu0 %v8800_v47  ;;  %v7578_v18 = vrot.slane %v7577_v24, 4  ;;  %v7591_v41 = vsel %vm7555_vm11, %v7552_v27, 0.0  ;;  %v7558_v17 = vadd.f32 %v7557_v11, %v7556_v35  ;;  %v7565_v43 = vadd.f32 %v7564_v20, %v7563_v36 }
0x1613   : > { %8802 = vmatprep.subr.bf16.mxu0 %v9685_v49  ;;  %v7585_v45 = vrot.slane %v7584_v55, 4  ;;  %v7592_v30 = vrot.slane %v7591_v41, 4  ;;  %v7572_v28 = vadd.f32 %v7571_v42, %v7570_v34  ;;  %v7598_v10 = vsel %vm7555_vm11, %v7553_v33, 0.0 }
0x1614   : > { %v7579_v6 = vadd.f32 %v7578_v18, %v7577_v24  ;;  %v7605_v21 = vsel %vm7555_vm11, %v7554_v16, 0.0  ;;  %v7559_v29 = vrot.slane %v7558_v17, 2  ;;  %v7566_v60 = vrot.slane %v7565_v43, 2  ;;  %v8126_v18 = vld [vmem:[%s11744_s30] ss:$0 sm:$0xff] }
0x1615   : > { %v7586_v50 = vadd.f32 %v7585_v45, %v7584_v55  ;;  %v7593_v38 = vadd.f32 %v7592_v30, %v7591_v41  ;;  %v7573_v44 = vrot.slane %v7572_v28, 2  ;;  %v7599_v54 = vrot.slane %v7598_v10, 4 }
0x1616   : > { %8804 = vmatpush3.bf16.msra.mxu0 %v8803_v3  ;;  %v7580_v8 = vrot.slane %v7579_v6, 2  ;;  %v7606_v46 = vrot.slane %v7605_v21, 4  ;;  %v7560_v1 = vadd.f32 %v7559_v29, %v7558_v17  ;;  %v7567_v19 = vadd.f32 %v7566_v60, %v7565_v43 }
0x1617   : > { %v7587_v22 = vrot.slane %v7586_v50, 2  ;;  %v7594_v63 = vrot.slane %v7593_v38, 2  ;;  %v7574_v40 = vadd.f32 %v7573_v44, %v7572_v28  ;;  %v7600_v2 = vadd.f32 %v7599_v54, %v7598_v10 }
0x1618   : > { %v7581_v9 = vadd.f32 %v7580_v8, %v7579_v6  ;;  %v7607_v37 = vadd.f32 %v7606_v46, %v7605_v21  ;;  %v7561_v31 = vrot.slane %v7560_v1, 1  ;;  %v7568_v49 = vrot.slane %v7567_v19, 1 }
0x1619   : > { %v7588_v47 = vadd.f32 %v7587_v22, %v7586_v50  ;;  %v7595_v51 = vadd.f32 %v7594_v63, %v7593_v38  ;;  %v7575_v56 = vrot.slane %v7574_v40, 1  ;;  %v7601_v59 = vrot.slane %v7600_v2, 2 }
0x161a   : > { %v7582_v57 = vrot.slane %v7581_v9, 1  ;;  %v7608_v13 = vrot.slane %v7607_v37, 2  ;;  %v7562_v0 = vadd.f32 %v7561_v31, %v7560_v1  ;;  %v7569_v61 = vadd.f32 %v7568_v49, %v7567_v19 }
0x161b   : > { %v7589_v3 = vrot.slane %v7588_v47, 1  ;;  %v7596_v4 = vrot.slane %v7595_v51, 1  ;;  %v7576_v7 = vadd.f32 %v7575_v56, %v7574_v40  ;;  %v7602_v58 = vadd.f32 %v7601_v59, %v7600_v2 }
0x161c   : > { %v7583_v14 = vadd.f32 %v7582_v57, %v7581_v9  ;;  %v7609_v23 = vadd.f32 %v7608_v13, %v7607_v37  ;;  %v7613_v53 = vmul.f32 0.125, %v7562_v0  ;;  %v7614_v12 = vmul.f32 0.125, %v7569_v61 }
0x161d   : > { %v7590_v32 = vadd.f32 %v7589_v3, %v7588_v47  ;;  %v7597_v5 = vadd.f32 %v7596_v4, %v7595_v51  ;;  %v7603_v39 = vrot.slane %v7602_v58, 1  ;;  %v7615_v52 = vmul.f32 0.125, %v7576_v7 }
0x161e   : > { %v7610_v62 = vrot.slane %v7609_v23, 1  ;;  %v7616_v48 = vmul.f32 0.125, %v7583_v14  ;;  %v7641_v26 = vsel %vm7640_vm12, %v7614_v12, %v7613_v53 }
0x161f   : > { %v7617_v15 = vmul.f32 0.125, %v7590_v32  ;;  %v7618_v25 = vmul.f32 0.125, %v7597_v5  ;;  %v7604_v27 = vadd.f32 %v7603_v39, %v7602_v58  ;;  %v7643_v16 = vsel %vm7642_vm13, %v7615_v52, %v7641_v26 }
0x1620   : > { %v7611_v33 = vadd.f32 %v7610_v62, %v7609_v23  ;;  %v7645_v35 = vsel %vm7644_vm14, %v7616_v48, %v7643_v16 }
0x1621   : > { %v7619_v36 = vmul.f32 0.125, %v7604_v27  ;;  %v7647_v20 = vsel %vm7646_vm15, %v7617_v15, %v7645_v35 }
0x1622   : > { %v7620_v11 = vmul.f32 0.125, %v7611_v33  ;;  %v7649_v34 = vsel %vm7648_vm0, %v7618_v25, %v7647_v20 }
0x1623   : > { %v7651_v24 = vsel %vm7650_vm1, %v7619_v36, %v7649_v34 }
0x1624   : > { %v7653_v42 = vsel %vm7652_vm2, %v7620_v11, %v7651_v24 }
0x1625   : > { %8757 = vmatmul.mubr.msk.f32.vlgmr.msra.gmra.mrb[0].mxu0 %vm7555_vm11, %v7653_v42 }
0x16f8   : > { %v7722_v55 = vpop.f32.mrb[0].mxu0 }
0x16f9   : > { %v7723_v41 = vadd.f32 %v8126_v18, %v7722_v55  ;;  %v8758_v17 = vpop.f32.mrb[1].mxu0 }
0x16fb   : > { %7726 = vst [vmem:[%s10258_s24] sm:$0xff] %v7723_v41 }
0x16fc PF: > { %s11745_s16 = sld [smem:[#allocation35_spill]]  ;;  %s11746_s4 = sld [smem:[#allocation38_spill]] }
0x16fd   : > { %s11747_s22 = sld [smem:[#allocation61_spill]]  ;;  %s7741_s15 = sshll.u32 %s10258_s24, 4  ;;  %s7742_s15 = int_to_ptr.vmem [resolvable:$true] %s7741_s15 }
0x16fe   : > { %s7728_s7 = scalar_lea.sflag [#allocation9], %s10211_s9  ;;  %s9513_s20 = scalar_lea.vmem %s7742_s15, 128 }
0x16ff   : > { %p9514_p7 = scmp.ne.s32.totalorder %s7742_s15, %s9513_s20  ;;  %s9688_s12 = smov [#allocation23]  }
0x1700   : > { %s9517_s5 = sshll.u32 %s9688_s12, 4  ;;  %s9518_s5 = int_to_ptr.vmem [resolvable:$false] %s9517_s5 }
0x1701   : > { %s9519_s17 = scalar_lea.vmem %s9518_s5, 256  ;;  %p9520_p2 = scmp.lt.s32.totalorder %s7742_s15, %s9518_s5 }
0x1702   : > { %s8129_s23 = sshll.u32 %s11745_s16, 7  ;;  %p11748_p13 = scmp.ne.s32.totalorder %s11746_s4, 0 }
0x1703   : > { %s11538_s28 = scalar_lea.hbm %s11747_s22, %s8129_s23  ;;  %p9521_p5 = scmp.lt.s32.totalorder %s9519_s17, %s9513_s20 }
0x1704   : > { %p9515_p6 = pnand %p9514_p7, %p11748_p13 }
0x1705   : > { %p9522_p9 = por %p9521_p5, %p9520_p2 }
0x1706   : > { %p9516_p12 = pneg %p9515_p6 }
0x1708   : > { %p9523_p0 = pnand %p9522_p9, %p9516_p12 }
0x170a   : > { %9526 = shalt.err (!%p9523_p0)
}
0x170b   : > { %s9527_s9 = scalar_lea.hbm %s11538_s28, 128  ;;  %s9531_s14 = scalar_lea.hbm %s11747_s22, 256 }
0x170c   : > { %p9528_p8 = scmp.ne.s32.totalorder %s11538_s28, %s9527_s9  ;;  %p9532_p4 = scmp.lt.u32.totalorder %s11538_s28, %s11747_s22 }
0x170d   : > { %p9533_p11 = scmp.lt.u32.totalorder %s9531_s14, %s9527_s9  ;;  %p9535_p7 = scmp.lt.u32.totalorder %s9527_s9, %s11538_s28 }
0x170e   : > { %p9529_p1 = pnand %p9528_p8, %p11748_p13 }
0x170f   : > { %p9534_p3 = por %p9533_p11, %p9532_p4 }
0x1710   : > { %p9530_p10 = pneg %p9529_p1 }
0x1711   : > { %p9536_p6 = por %p9535_p7, %p9534_p3 }
0x1713   : > { %p9537_p12 = pnand %p9536_p6, %p9530_p10 }
0x1715   : > { %9540 = shalt.err (!%p9537_p12)
}
0x1716   : > { %8841 = dma.vmem_to_hbm [thread:$0]  (%p11748_p13), %s7742_s15, 128, %s11538_s28, %s7728_s7  }
0x1717 PF: > { %s11749_s29 = sld [smem:[#allocation31_spill]]  ;;  %s11750_s30 = sld [smem:[#allocation39_spill]] }
0x1718   : > { %p8894_p2 = scmp.ge.s32.totalorder %s9655_s1, 2 }
0x171d   : > { %s7753_s16 = sand.u32 1, %s11749_s29   ;;  %p11751_p5 = scmp.ne.s32.totalorder %s11750_s30, 0 }
0x171e   : > { %s7754_s23 = scalar_lea.sflag [#allocation9], %s7753_s16 }
0x171f   : > { %p8876_p9 = pnand %p8894_p2, %p11751_p5 }
0x1721   : > { %9610 = dma.done.wait (!%p8876_p9), %s7754_s23, 128  }
0x1722   : > { %9612 = vsyncadd (!%p8876_p9), %s7754_s23, 4294967168  ;;  %s37_s1 = sadd.s32 1, %s9655_s1   ;;  %s11752_s21 = sld [smem:[#allocation43_spill]] }
0x1723   : > { %p34_p0 = scmp.ge.s32.totalorder %s37_s1, 10   ;;  %s11753_s27 = sld [smem:[#allocation32_spill]] }
0x1724   : > { %s11754_s28 = sld [smem:[#allocation33_spill]]  ;;  %s11755_s29 = sld [smem:[#allocation44_spill]] }
0x1725   : > { %s11756_s30 = sld [smem:[#allocation36_spill]]  ;;  %s11757_s4 = sld [smem:[#allocation41_spill]] }
0x1726   : > { %s11758_s19 = sld [smem:[#allocation42_spill]]  ;;  %s11759_s24 = smov %s9619_s25 }
0x1727   : > { %s11760_s25 = smov %s9623_s26  ;;  %s11762_s0 = smov %s9647_s18 }
0x1728   : > { %s11761_s26 = smov %s11752_s21  ;;  %36 = sbr.rel (!%p34_p0) target bundleno = 31 (0x1f), region = 201 }
0x172b   : > { %s11763_s18 = smov %s11757_s4 }
0x172f   :  { %7759 = vsyncpa [#allocation8], 1 }
0x1730   :  { %7761 = vsyncpa [#allocation8 + $0x1], 1 }
0x1731   :  { %7762 = vsyncpa [#allocation11], 1 }
0x1732   :  { %7763 = vsyncpa [#allocation14], 1 }
0x1733   :  { %7764 = vsyncpa [#allocation17], 1 }
0x1734   :  { %7765 = vsyncpa [#allocation20], 1 }
0x1735   :  { %7766 = vsyncpa [#allocation9], 1 }
0x1736   :  { %7768 = vsyncpa [#allocation9 + $0x1], 1 }

</bundles_post_ra>
